<compile_context>
chip_gen: v7x
topology: tpu7x:2x2x1
jax: 0.10.0
libtpu: 0.0.40
codegen_flags: <defaults>
</compile_context>

<pallas_src>
import math

import jax
import jax.numpy as jnp
from jax.experimental import pallas as pl
from jax.experimental.pallas import tpu as pltpu

H1, H2 = 512, 256
OUT_PAD = 128          # lane-dense padded output width (true output width is 1)


def _round_up(x, m):
    return (x + m - 1) // m * m


def _leaky_relu(x, slope=0.2):
    return jnp.where(x > 0, x, slope * x)


# ---------------------------------------------------------------------------
# Kernels
# ---------------------------------------------------------------------------
def discriminator_kernel(x_ref, w1_ref, b1_ref, w2_ref, b2_ref, w3_ref, b3_ref,
                         o_ref):
    """One (TB, D) batch tile of the 3-layer MLP (weights fully resident).

    Matmuls run in bf16 on the MXU with f32 accumulation; bias adds and
    LeakyReLU epilogues stay f32 on the VPU (safe on v5e, no bf16 VPU path).
    """
    x = x_ref[...]                                               # (TB, D) bf16

    h1 = jnp.dot(x, w1_ref[...], preferred_element_type=jnp.float32)
    h1 = _leaky_relu(h1 + b1_ref[...])                           # (TB, 512) f32

    h2 = jnp.dot(h1.astype(jnp.bfloat16), w2_ref[...],
                 preferred_element_type=jnp.float32)
    h2 = _leaky_relu(h2 + b2_ref[...])                           # (TB, 256) f32

    out = jnp.dot(h2.astype(jnp.bfloat16), w3_ref[...],
                  preferred_element_type=jnp.float32)
    o_ref[...] = (out + b3_ref[...]).astype(o_ref.dtype)         # (TB, 128) bf16


def discriminator_kernel_ktiled(x_ref, w1_ref, b1_ref, w2_ref, b2_ref,
                                w3_ref, b3_ref, o_ref, acc_ref):
    """Large-D variant: layer 1 is K-tiled over D (grid axis 1, 'arbitrary').

    The (TB, 512) f32 accumulator lives in scratch; layers 2/3 and the store
    only run on the last K step.
    """
    k = pl.program_id(1)

    @pl.when(k == 0)
    def _():
        acc_ref[...] = jnp.zeros_like(acc_ref)

    acc_ref[...] += jnp.dot(x_ref[...], w1_ref[...],
                            preferred_element_type=jnp.float32)

    @pl.when(k == pl.num_programs(1) - 1)
    def _():
        h1 = _leaky_relu(acc_ref[...] + b1_ref[...])
        h2 = jnp.dot(h1.astype(jnp.bfloat16), w2_ref[...],
                     preferred_element_type=jnp.float32)
        h2 = _leaky_relu(h2 + b2_ref[...])
        out = jnp.dot(h2.astype(jnp.bfloat16), w3_ref[...],
                      preferred_element_type=jnp.float32)
        o_ref[...] = (out + b3_ref[...]).astype(o_ref.dtype)


# ---------------------------------------------------------------------------
# VMEM budgeting / tile selection
# ---------------------------------------------------------------------------
def _vmem_cap_bytes():
    """Generation-aware scoped-VMEM cap: ~100 MiB on 128 MiB parts (v5e/v6e),
    ~48 MiB on 64 MiB parts (v7x)."""
    phys = 64 * 1024 * 1024                      # conservative if query fails
    try:
        phys = int(pltpu.get_tpu_info().vmem_capacity_bytes)
    except Exception:
        pass
    return int(min(phys - (16 << 20), 100 << 20))


def _resident_vmem_bytes(tb, d):
    """Rough VMEM need for the fully-resident path (single-buffered weights,
    double-buffered x/out, f32+bf16 temporaries)."""
    w_bytes = (d * H1 + H1 * H2 + H2 * OUT_PAD) * 2          # bf16 weights
    b_bytes = 8 * (H1 + H2 + OUT_PAD) * 4                    # sublane-padded biases
    x_bytes = 2 * tb * d * 2                                 # 2 buffers, bf16
    o_bytes = 2 * tb * OUT_PAD * 2                           # 2 buffers, bf16
    act_bytes = tb * (H1 + H2) * (4 + 2)
    return w_bytes + b_bytes + x_bytes + o_bytes + act_bytes


def _ktiled_vmem_bytes(tb, tk):
    """Rough VMEM need for the K-tiled path (w1/x double-buffered along K)."""
    w1_bytes = 2 * tk * H1 * 2
    rest_w = (H1 * H2 + H2 * OUT_PAD) * 2
    b_bytes = 8 * (H1 + H2 + OUT_PAD) * 4
    x_bytes = 2 * tb * tk * 2
    o_bytes = 2 * tb * OUT_PAD * 2
    acc_bytes = tb * H1 * 4
    act_bytes = tb * (H1 + H2) * (4 + 2)
    return w1_bytes + rest_w + b_bytes + x_bytes + o_bytes + acc_bytes + act_bytes


def _pick_tb(B, D):
    """Adaptive batch tile: proportional for tiny B, >=2 tiles for medium B
    (v7x megacore), large tiles for big B (MXU fill / per-step overhead)."""
    big = 512 if D <= 4096 else 256
    if B <= 32:
        return max(16, _round_up(B, 16))
    if B <= 2 * big:
        return _round_up(pl.cdiv(B, 2), 16)
    return big


# ---------------------------------------------------------------------------
# pallas_call builders (with single-buffered-weights fallback)
# ---------------------------------------------------------------------------
_single_buffer_ok = [True]


def _with_weight_buffering(run):
    """Prefer single-buffered resident weights (pl.Buffered(1)); fall back to
    default double buffering if this JAX/Mosaic build rejects pipeline_mode."""
    if _single_buffer_ok[0]:
        try:
            return run(True)
        except Exception:
            _single_buffer_ok[0] = False
    return run(False)


def _call_resident(xb, prepared, *, tb, n_tiles, d, vmem_limit):
    w1b, b1, w2b, b2, w3p, b3p = prepared
    b_pad = n_tiles * tb
    flops = 2 * b_pad * (d * H1 + H1 * H2 + H2 * OUT_PAD)
    bytes_accessed = (xb.size * 2 + w1b.size * 2 + w2b.size * 2 + w3p.size * 2
                      + (b1.size + b2.size + b3p.size) * 4
                      + b_pad * OUT_PAD * 2)

    def run(single_buffer_weights):
        res = dict(pipeline_mode=pl.Buffered(1)) if single_buffer_weights else {}
        in_specs = [
            pl.BlockSpec((tb, d), lambda i: (i, 0)),               # x: per-tile DMA
            pl.BlockSpec((d, H1), lambda i: (0, 0), **res),        # w1: resident
            pl.BlockSpec((1, H1), lambda i: (0, 0), **res),        # b1
            pl.BlockSpec((H1, H2), lambda i: (0, 0), **res),       # w2
            pl.BlockSpec((1, H2), lambda i: (0, 0), **res),        # b2
            pl.BlockSpec((H2, OUT_PAD), lambda i: (0, 0), **res),  # w3 (padded)
            pl.BlockSpec((1, OUT_PAD), lambda i: (0, 0), **res),   # b3 (padded)
        ]
        return pl.pallas_call(
            discriminator_kernel,
            out_shape=jax.ShapeDtypeStruct((b_pad, OUT_PAD), jnp.bfloat16),
            grid_spec=pltpu.PrefetchScalarGridSpec(
                num_scalar_prefetch=0,
                grid=(n_tiles,),
                in_specs=in_specs,
                out_specs=pl.BlockSpec((tb, OUT_PAD), lambda i: (i, 0)),
            ),
            compiler_params=pltpu.CompilerParams(
                dimension_semantics=("parallel",),
                vmem_limit_bytes=vmem_limit,
            ),
            cost_estimate=pl.CostEstimate(
                flops=flops, transcendentals=0, bytes_accessed=bytes_accessed),
        )(xb, w1b, b1, w2b, b2, w3p, b3p)

    return _with_weight_buffering(run)


def _call_ktiled(xb, prepared, *, tb, tk, n_tiles, nk, vmem_limit):
    w1b, b1, w2b, b2, w3p, b3p = prepared
    b_pad = n_tiles * tb
    d_pad = nk * tk
    flops = 2 * b_pad * (d_pad * H1 + H1 * H2 + H2 * OUT_PAD)
    bytes_accessed = (xb.size * 2 + w1b.size * 2 + w2b.size * 2 + w3p.size * 2
                      + (b1.size + b2.size + b3p.size) * 4
                      + b_pad * OUT_PAD * 2)

    def run(single_buffer_weights):
        res = dict(pipeline_mode=pl.Buffered(1)) if single_buffer_weights else {}
        in_specs = [
            pl.BlockSpec((tb, tk), lambda i, k: (i, k)),               # x: (batch, K) tiles
            pl.BlockSpec((tk, H1), lambda i, k: (k, 0)),               # w1: streamed over K
            pl.BlockSpec((1, H1), lambda i, k: (0, 0), **res),         # b1: resident
            pl.BlockSpec((H1, H2), lambda i, k: (0, 0), **res),        # w2: resident
            pl.BlockSpec((1, H2), lambda i, k: (0, 0), **res),         # b2
            pl.BlockSpec((H2, OUT_PAD), lambda i, k: (0, 0), **res),   # w3
            pl.BlockSpec((1, OUT_PAD), lambda i, k: (0, 0), **res),    # b3
        ]
        return pl.pallas_call(
            discriminator_kernel_ktiled,
            out_shape=jax.ShapeDtypeStruct((b_pad, OUT_PAD), jnp.bfloat16),
            grid_spec=pltpu.PrefetchScalarGridSpec(
                num_scalar_prefetch=0,
                grid=(n_tiles, nk),
                in_specs=in_specs,
                out_specs=pl.BlockSpec((tb, OUT_PAD), lambda i, k: (i, 0)),
                scratch_shapes=[pltpu.VMEM((tb, H1), jnp.float32)],
            ),
            compiler_params=pltpu.CompilerParams(
                dimension_semantics=("parallel", "arbitrary"),
                vmem_limit_bytes=vmem_limit,
            ),
            cost_estimate=pl.CostEstimate(
                flops=flops, transcendentals=0, bytes_accessed=bytes_accessed),
        )(xb, w1b, b1, w2b, b2, w3p, b3p)

    return _with_weight_buffering(run)


# ---------------------------------------------------------------------------
# Public wrapper
# ---------------------------------------------------------------------------
def prepare_params(params):
    """One-time weight preparation (hoisted out of the per-call path):
    bf16 copies for the MXU, layer 3 zero-padded to a lane-dense 128 output."""
    w1, b1, w2, b2, w3, b3 = params          # (in, out) layout, biases (1, out)
    w1b = w1.astype(jnp.bfloat16)
    w2b = w2.astype(jnp.bfloat16)
    w3p = jnp.pad(w3, ((0, 0), (0, OUT_PAD - w3.shape[1]))).astype(jnp.bfloat16)
    b3p = jnp.pad(b3, ((0, 0), (0, OUT_PAD - b3.shape[1]))).astype(jnp.float32)
    return (w1b, b1.astype(jnp.float32), w2b, b2.astype(jnp.float32), w3p, b3p)


def discriminator_forward(img, prepared, *, tb=None, tk=None,
                          force_ktiled=False):
    """img: (B, C, H, W) float32, prepared = prepare_params(params).
    Returns validity (B, 1) float32."""
    w1b, b1, w2b, b2, w3p, b3p = prepared
    B = img.shape[0]
    D = int(math.prod(img.shape[1:]))

    # Flatten (torch: img.view(B, -1)); bf16 for the MXU, then pad only the
    # (small, adaptive) ragged remainder of the batch.
    x = img.reshape(B, D).astype(jnp.bfloat16)
    if tb is None:
        tb = _pick_tb(B, D)
    n_tiles = pl.cdiv(B, tb)
    b_pad = n_tiles * tb
    if b_pad != B:
        x = jnp.pad(x, ((0, b_pad - B), (0, 0)))

    cap = _vmem_cap_bytes()
    resident_est = _resident_vmem_bytes(tb, D)
    use_ktiled = force_ktiled or (2 * resident_est > cap)

    if not use_ktiled:
        vmem_limit = int(min(max(2 * resident_est, 16 << 20), cap))
        out = _call_resident(x, (w1b, b1, w2b, b2, w3p, b3p),
                             tb=tb, n_tiles=n_tiles, d=D,
                             vmem_limit=vmem_limit)
    else:
        # Layer-1 K-tiling for large D (or forced for testing).
        if tk is None:
            tk = 2048
            while tk > 256 and 2 * _ktiled_vmem_bytes(tb, tk) > cap:
                tk //= 2
        d_pad = _round_up(D, tk)
        if d_pad != D:
            # Zero-padding the contraction dim is exact (zeros add nothing).
            x = jnp.pad(x, ((0, 0), (0, d_pad - D)))
            w1b = jnp.pad(w1b, ((0, d_pad - D), (0, 0)))
        vmem_limit = int(min(max(2 * _ktiled_vmem_bytes(tb, tk), 16 << 20), cap))
        out = _call_ktiled(x, (w1b, b1, w2b, b2, w3p, b3p),
                           tb=tb, tk=tk, n_tiles=n_tiles, nk=d_pad // tk,
                           vmem_limit=vmem_limit)

    # Strip batch padding and the lane padding of the final layer; upcast.
    return out[:B, :1].astype(jnp.float32)


def init_params(key, in_dim):
    """Deterministic synthetic params (PyTorch Linear init, pre-transposed)."""
    k1, k2, k3 = jax.random.split(key, 3)

    def linear(k, fan_in, fan_out):
        bound = 1.0 / math.sqrt(fan_in)
        kw, kb = jax.random.split(k)
        # torch Linear weight is (out, in); store transposed (in, out) for x @ W.
        w = jax.random.uniform(kw, (fan_in, fan_out), jnp.float32, -bound, bound)
        b = jax.random.uniform(kb, (1, fan_out), jnp.float32, -bound, bound)
        return w, b

    w1, b1 = linear(k1, in_dim, H1)
    w2, b2 = linear(k2, H1, H2)
    w3, b3 = linear(k3, H2, 1)
    return (w1, b1, w2, b2, w3, b3)


if __name__ == "__main__":
    key = jax.random.PRNGKey(0)
    k_img, k_par = jax.random.split(key)

    # Small image shape consistent with the module: img_shape = (4, 16, 16)
    B, C, H, W = 2, 4, 16, 16
    img = jax.random.normal(k_img, (B, C, H, W), jnp.float32)

    params = init_params(k_par, C * H * W)
    prepared = prepare_params(params)        # cached across forward calls

    validity = discriminator_forward(img, prepared)
    jax.block_until_ready(validity)

    # Reference in plain JAX f32 (same math as the PyTorch module). Tolerance
    # loosened because the kernel runs matmuls in bf16 (f32 accumulation) and
    # stores the padded output slab in bf16.
    w1, b1, w2, b2, w3, b3 = params
    x = img.reshape(B, -1)
    h = x @ w1 + b1
    h = jnp.where(h > 0, h, 0.2 * h)
    h = h @ w2 + b2
    h = jnp.where(h > 0, h, 0.2 * h)
    ref = h @ w3 + b3

    assert validity.shape == (B, 1)
    assert jnp.allclose(validity, ref, atol=2e-2, rtol=2e-2), (
        f"max abs diff {jnp.max(jnp.abs(validity - ref))}")

    # Also exercise the large-D (layer-1 K-tiled) fallback path on the same
    # small shapes so it is validated, not just shipped.
    validity_kt = discriminator_forward(img, prepared, tk=256,
                                        force_ktiled=True)
    jax.block_until_ready(validity_kt)
    assert validity_kt.shape == (B, 1)
    assert jnp.allclose(validity_kt, ref, atol=2e-2, rtol=2e-2), (
        f"max abs diff (ktiled) {jnp.max(jnp.abs(validity_kt - ref))}")

    print("KERNEL_OK")
</pallas_src>

<mosaic_0001>
module attributes {stable_mosaic.version = 11 : i64} {
  func.func @discriminator_kernel(%arg0: i32, %arg1: memref<16x1024xbf16, #tpu.memory_space<vmem>>, %arg2: memref<1024x512xbf16, #tpu.memory_space<vmem>>, %arg3: memref<1x512xf32, #tpu.memory_space<vmem>>, %arg4: memref<512x256xbf16, #tpu.memory_space<vmem>>, %arg5: memref<1x256xf32, #tpu.memory_space<vmem>>, %arg6: memref<256x128xbf16, #tpu.memory_space<vmem>>, %arg7: memref<1x128xf32, #tpu.memory_space<vmem>>, %arg8: memref<16x128xbf16, #tpu.memory_space<vmem>>) attributes {dimension_semantics = [#tpu.dimension_semantics<parallel>], iteration_bounds = array<i64: 1>, scalar_prefetch = 0 : i64, scratch_operands = 0 : i64, tpu.core_type = #tpu.core_type<tc>, window_params = [{transform_indices = @transform_0, window_bounds = array<i64: 16, 1024>}, {pipeline_mode = #tpu.pipeline_mode<synchronous>, transform_indices = @transform_1, window_bounds = array<i64: 1024, 512>}, {pipeline_mode = #tpu.pipeline_mode<synchronous>, transform_indices = @transform_2, window_bounds = array<i64: 1, 512>}, {pipeline_mode = #tpu.pipeline_mode<synchronous>, transform_indices = @transform_3, window_bounds = array<i64: 512, 256>}, {pipeline_mode = #tpu.pipeline_mode<synchronous>, transform_indices = @transform_4, window_bounds = array<i64: 1, 256>}, {pipeline_mode = #tpu.pipeline_mode<synchronous>, transform_indices = @transform_5, window_bounds = array<i64: 256, 128>}, {pipeline_mode = #tpu.pipeline_mode<synchronous>, transform_indices = @transform_6, window_bounds = array<i64: 1, 128>}, {transform_indices = @transform_7, window_bounds = array<i64: 16, 128>}]} {
    %c0 = arith.constant 0 : index
    %c0_0 = arith.constant 0 : index
    %0 = vector.load %arg1[%c0, %c0_0] : memref<16x1024xbf16, #tpu.memory_space<vmem>>, vector<16x1024xbf16>
    %c0_1 = arith.constant 0 : index
    %c0_2 = arith.constant 0 : index
    %1 = vector.load %arg2[%c0_1, %c0_2] : memref<1024x512xbf16, #tpu.memory_space<vmem>>, vector<1024x512xbf16>
    %cst = arith.constant dense<0.000000e+00> : vector<16x512xf32>
    %2 = tpu.matmul %0, %1, %cst {dimension_numbers = #tpu.dot_dimension_numbers<[1], [0], [0], [1], [0, 0, 1, 1], [], []>} : vector<16x1024xbf16>, vector<1024x512xbf16>, vector<16x512xf32> -> vector<16x512xf32>
    %c0_3 = arith.constant 0 : index
    %c0_4 = arith.constant 0 : index
    %3 = vector.load %arg3[%c0_3, %c0_4] : memref<1x512xf32, #tpu.memory_space<vmem>>, vector<1x512xf32>
    %4 = vector.broadcast %3 : vector<1x512xf32> to vector<16x512xf32>
    %5 = arith.addf %2, %4 : vector<16x512xf32>
    %cst_5 = arith.constant 0.000000e+00 : f32
    %6 = vector.broadcast %cst_5 : f32 to vector<16x512xf32>
    %7 = arith.cmpf ogt, %5, %6 : vector<16x512xf32>
    %cst_6 = arith.constant 2.000000e-01 : f32
    %8 = vector.broadcast %cst_6 : f32 to vector<16x512xf32>
    %9 = arith.mulf %8, %5 : vector<16x512xf32>
    %10 = arith.select %7, %5, %9 : vector<16x512xi1>, vector<16x512xf32>
    %11 = arith.truncf %10 : vector<16x512xf32> to vector<16x512xbf16>
    %c0_7 = arith.constant 0 : index
    %c0_8 = arith.constant 0 : index
    %12 = vector.load %arg4[%c0_7, %c0_8] : memref<512x256xbf16, #tpu.memory_space<vmem>>, vector<512x256xbf16>
    %cst_9 = arith.constant dense<0.000000e+00> : vector<16x256xf32>
    %13 = tpu.matmul %11, %12, %cst_9 {dimension_numbers = #tpu.dot_dimension_numbers<[1], [0], [0], [1], [0, 0, 1, 1], [], []>} : vector<16x512xbf16>, vector<512x256xbf16>, vector<16x256xf32> -> vector<16x256xf32>
    %c0_10 = arith.constant 0 : index
    %c0_11 = arith.constant 0 : index
    %14 = vector.load %arg5[%c0_10, %c0_11] : memref<1x256xf32, #tpu.memory_space<vmem>>, vector<1x256xf32>
    %15 = vector.broadcast %14 : vector<1x256xf32> to vector<16x256xf32>
    %16 = arith.addf %13, %15 : vector<16x256xf32>
    %cst_12 = arith.constant 0.000000e+00 : f32
    %17 = vector.broadcast %cst_12 : f32 to vector<16x256xf32>
    %18 = arith.cmpf ogt, %16, %17 : vector<16x256xf32>
    %cst_13 = arith.constant 2.000000e-01 : f32
    %19 = vector.broadcast %cst_13 : f32 to vector<16x256xf32>
    %20 = arith.mulf %19, %16 : vector<16x256xf32>
    %21 = arith.select %18, %16, %20 : vector<16x256xi1>, vector<16x256xf32>
    %22 = arith.truncf %21 : vector<16x256xf32> to vector<16x256xbf16>
    %c0_14 = arith.constant 0 : index
    %c0_15 = arith.constant 0 : index
    %23 = vector.load %arg6[%c0_14, %c0_15] : memref<256x128xbf16, #tpu.memory_space<vmem>>, vector<256x128xbf16>
    %cst_16 = arith.constant dense<0.000000e+00> : vector<16x128xf32>
    %24 = tpu.matmul %22, %23, %cst_16 {dimension_numbers = #tpu.dot_dimension_numbers<[1], [0], [0], [1], [0, 0, 1, 1], [], []>} : vector<16x256xbf16>, vector<256x128xbf16>, vector<16x128xf32> -> vector<16x128xf32>
    %c0_17 = arith.constant 0 : index
    %c0_18 = arith.constant 0 : index
    %25 = vector.load %arg7[%c0_17, %c0_18] : memref<1x128xf32, #tpu.memory_space<vmem>>, vector<1x128xf32>
    %26 = vector.broadcast %25 : vector<1x128xf32> to vector<16x128xf32>
    %27 = arith.addf %24, %26 : vector<16x128xf32>
    %28 = arith.truncf %27 : vector<16x128xf32> to vector<16x128xbf16>
    %c0_19 = arith.constant 0 : index
    %c0_20 = arith.constant 0 : index
    %29 = vector.load %arg8[%c0_19, %c0_20] : memref<16x128xbf16, #tpu.memory_space<vmem>>, vector<16x128xbf16>
    tpu.vector_store %arg8[%c0_19, %c0_20], %28 {strides = array<i32>} : memref<16x128xbf16, #tpu.memory_space<vmem>>, vector<16x128xbf16>,
    return
  }
  func.func @transform_0(%arg0: i32) -> (i32, i32) {
    %c0_i32 = arith.constant 0 : i32
    %c0_i32_0 = arith.constant 0 : i32
    return %arg0, %c0_i32 : i32, i32
  }
  func.func @transform_1(%arg0: i32) -> (i32, i32) {
    %c0_i32 = arith.constant 0 : i32
    %c0_i32_0 = arith.constant 0 : i32
    %c0_i32_1 = arith.constant 0 : i32
    return %c0_i32, %c0_i32_0 : i32, i32
  }
  func.func @transform_2(%arg0: i32) -> (i32, i32) {
    %c0_i32 = arith.constant 0 : i32
    %c0_i32_0 = arith.constant 0 : i32
    %c0_i32_1 = arith.constant 0 : i32
    return %c0_i32, %c0_i32_0 : i32, i32
  }
  func.func @transform_3(%arg0: i32) -> (i32, i32) {
    %c0_i32 = arith.constant 0 : i32
    %c0_i32_0 = arith.constant 0 : i32
    %c0_i32_1 = arith.constant 0 : i32
    return %c0_i32, %c0_i32_0 : i32, i32
  }
  func.func @transform_4(%arg0: i32) -> (i32, i32) {
    %c0_i32 = arith.constant 0 : i32
    %c0_i32_0 = arith.constant 0 : i32
    %c0_i32_1 = arith.constant 0 : i32
    return %c0_i32, %c0_i32_0 : i32, i32
  }
  func.func @transform_5(%arg0: i32) -> (i32, i32) {
    %c0_i32 = arith.constant 0 : i32
    %c0_i32_0 = arith.constant 0 : i32
    %c0_i32_1 = arith.constant 0 : i32
    return %c0_i32, %c0_i32_0 : i32, i32
  }
  func.func @transform_6(%arg0: i32) -> (i32, i32) {
    %c0_i32 = arith.constant 0 : i32
    %c0_i32_0 = arith.constant 0 : i32
    %c0_i32_1 = arith.constant 0 : i32
    return %c0_i32, %c0_i32_0 : i32, i32
  }
  func.func @transform_7(%arg0: i32) -> (i32, i32) {
    %c0_i32 = arith.constant 0 : i32
    %c0_i32_0 = arith.constant 0 : i32
    return %arg0, %c0_i32 : i32, i32
  }
}

module attributes {stable_mosaic.version = 11 : i64} {
  func.func @discriminator_kernel(%arg0: i32, %arg1: memref<16x1024xbf16, #tpu.memory_space<vmem>>, %arg2: memref<1024x512xbf16, #tpu.memory_space<vmem>>, %arg3: memref<1x512xf32, #tpu.memory_space<vmem>>, %arg4: memref<512x256xbf16, #tpu.memory_space<vmem>>, %arg5: memref<1x256xf32, #tpu.memory_space<vmem>>, %arg6: memref<256x128xbf16, #tpu.memory_space<vmem>>, %arg7: memref<1x128xf32, #tpu.memory_space<vmem>>, %arg8: memref<16x128xbf16, #tpu.memory_space<vmem>>) attributes {dimension_semantics = [#tpu.dimension_semantics<parallel>], iteration_bounds = array<i64: 1>, scalar_prefetch = 0 : i64, scratch_operands = 0 : i64, tpu.core_type = #tpu.core_type<tc>, window_params = [{transform_indices = @transform_0, window_bounds = array<i64: 16, 1024>}, {pipeline_mode = #tpu.pipeline_mode<synchronous>, transform_indices = @transform_1, window_bounds = array<i64: 1024, 512>}, {pipeline_mode = #tpu.pipeline_mode<synchronous>, transform_indices = @transform_2, window_bounds = array<i64: 1, 512>}, {pipeline_mode = #tpu.pipeline_mode<synchronous>, transform_indices = @transform_3, window_bounds = array<i64: 512, 256>}, {pipeline_mode = #tpu.pipeline_mode<synchronous>, transform_indices = @transform_4, window_bounds = array<i64: 1, 256>}, {pipeline_mode = #tpu.pipeline_mode<synchronous>, transform_indices = @transform_5, window_bounds = array<i64: 256, 128>}, {pipeline_mode = #tpu.pipeline_mode<synchronous>, transform_indices = @transform_6, window_bounds = array<i64: 1, 128>}, {transform_indices = @transform_7, window_bounds = array<i64: 16, 128>}]} {
    %c0 = arith.constant 0 : index
    %c0_0 = arith.constant 0 : index
    %0 = vector.load %arg1[%c0, %c0_0] : memref<16x1024xbf16, #tpu.memory_space<vmem>>, vector<16x1024xbf16>
    %c0_1 = arith.constant 0 : index
    %c0_2 = arith.constant 0 : index
    %1 = vector.load %arg2[%c0_1, %c0_2] : memref<1024x512xbf16, #tpu.memory_space<vmem>>, vector<1024x512xbf16>
    %cst = arith.constant dense<0.000000e+00> : vector<16x512xf32>
    %2 = tpu.matmul %0, %1, %cst {dimension_numbers = #tpu.dot_dimension_numbers<[1], [0], [0], [1], [0, 0, 1, 1], [], []>} : vector<16x1024xbf16>, vector<1024x512xbf16>, vector<16x512xf32> -> vector<16x512xf32>
    %c0_3 = arith.constant 0 : index
    %c0_4 = arith.constant 0 : index
    %3 = vector.load %arg3[%c0_3, %c0_4] : memref<1x512xf32, #tpu.memory_space<vmem>>, vector<1x512xf32>
    %4 = vector.broadcast %3 : vector<1x512xf32> to vector<16x512xf32>
    %5 = arith.addf %2, %4 : vector<16x512xf32>
    %cst_5 = arith.constant 0.000000e+00 : f32
    %6 = vector.broadcast %cst_5 : f32 to vector<16x512xf32>
    %7 = arith.cmpf ogt, %5, %6 : vector<16x512xf32>
    %cst_6 = arith.constant 2.000000e-01 : f32
    %8 = vector.broadcast %cst_6 : f32 to vector<16x512xf32>
    %9 = arith.mulf %8, %5 : vector<16x512xf32>
    %10 = arith.select %7, %5, %9 : vector<16x512xi1>, vector<16x512xf32>
    %11 = arith.truncf %10 : vector<16x512xf32> to vector<16x512xbf16>
    %c0_7 = arith.constant 0 : index
    %c0_8 = arith.constant 0 : index
    %12 = vector.load %arg4[%c0_7, %c0_8] : memref<512x256xbf16, #tpu.memory_space<vmem>>, vector<512x256xbf16>
    %cst_9 = arith.constant dense<0.000000e+00> : vector<16x256xf32>
    %13 = tpu.matmul %11, %12, %cst_9 {dimension_numbers = #tpu.dot_dimension_numbers<[1], [0], [0], [1], [0, 0, 1, 1], [], []>} : vector<16x512xbf16>, vector<512x256xbf16>, vector<16x256xf32> -> vector<16x256xf32>
    %c0_10 = arith.constant 0 : index
    %c0_11 = arith.constant 0 : index
    %14 = vector.load %arg5[%c0_10, %c0_11] : memref<1x256xf32, #tpu.memory_space<vmem>>, vector<1x256xf32>
    %15 = vector.broadcast %14 : vector<1x256xf32> to vector<16x256xf32>
    %16 = arith.addf %13, %15 : vector<16x256xf32>
    %cst_12 = arith.constant 0.000000e+00 : f32
    %17 = vector.broadcast %cst_12 : f32 to vector<16x256xf32>
    %18 = arith.cmpf ogt, %16, %17 : vector<16x256xf32>
    %cst_13 = arith.constant 2.000000e-01 : f32
    %19 = vector.broadcast %cst_13 : f32 to vector<16x256xf32>
    %20 = arith.mulf %19, %16 : vector<16x256xf32>
    %21 = arith.select %18, %16, %20 : vector<16x256xi1>, vector<16x256xf32>
    %22 = arith.truncf %21 : vector<16x256xf32> to vector<16x256xbf16>
    %c0_14 = arith.constant 0 : index
    %c0_15 = arith.constant 0 : index
    %23 = vector.load %arg6[%c0_14, %c0_15] : memref<256x128xbf16, #tpu.memory_space<vmem>>, vector<256x128xbf16>
    %cst_16 = arith.constant dense<0.000000e+00> : vector<16x128xf32>
    %24 = tpu.matmul %22, %23, %cst_16 {dimension_numbers = #tpu.dot_dimension_numbers<[1], [0], [0], [1], [0, 0, 1, 1], [], []>} : vector<16x256xbf16>, vector<256x128xbf16>, vector<16x128xf32> -> vector<16x128xf32>
    %c0_17 = arith.constant 0 : index
    %c0_18 = arith.constant 0 : index
    %25 = vector.load %arg7[%c0_17, %c0_18] : memref<1x128xf32, #tpu.memory_space<vmem>>, vector<1x128xf32>
    %26 = vector.broadcast %25 : vector<1x128xf32> to vector<16x128xf32>
    %27 = arith.addf %24, %26 : vector<16x128xf32>
    %28 = arith.truncf %27 : vector<16x128xf32> to vector<16x128xbf16>
    %c0_19 = arith.constant 0 : index
    %c0_20 = arith.constant 0 : index
    %29 = vector.load %arg8[%c0_19, %c0_20] : memref<16x128xbf16, #tpu.memory_space<vmem>>, vector<16x128xbf16>
    tpu.vector_store %arg8[%c0_19, %c0_20], %28 {strides = array<i32>} : memref<16x128xbf16, #tpu.memory_space<vmem>>, vector<16x128xbf16>,
    return
  }
  func.func @transform_0(%arg0: i32) -> (i32, i32) {
    %c0_i32 = arith.constant 0 : i32
    %c0_i32_0 = arith.constant 0 : i32
    return %arg0, %c0_i32 : i32, i32
  }
  func.func @transform_1(%arg0: i32) -> (i32, i32) {
    %c0_i32 = arith.constant 0 : i32
    %c0_i32_0 = arith.constant 0 : i32
    %c0_i32_1 = arith.constant 0 : i32
    return %c0_i32, %c0_i32_0 : i32, i32
  }
  func.func @transform_2(%arg0: i32) -> (i32, i32) {
    %c0_i32 = arith.constant 0 : i32
    %c0_i32_0 = arith.constant 0 : i32
    %c0_i32_1 = arith.constant 0 : i32
    return %c0_i32, %c0_i32_0 : i32, i32
  }
  func.func @transform_3(%arg0: i32) -> (i32, i32) {
    %c0_i32 = arith.constant 0 : i32
    %c0_i32_0 = arith.constant 0 : i32
    %c0_i32_1 = arith.constant 0 : i32
    return %c0_i32, %c0_i32_0 : i32, i32
  }
  func.func @transform_4(%arg0: i32) -> (i32, i32) {
    %c0_i32 = arith.constant 0 : i32
    %c0_i32_0 = arith.constant 0 : i32
    %c0_i32_1 = arith.constant 0 : i32
    return %c0_i32, %c0_i32_0 : i32, i32
  }
  func.func @transform_5(%arg0: i32) -> (i32, i32) {
    %c0_i32 = arith.constant 0 : i32
    %c0_i32_0 = arith.constant 0 : i32
    %c0_i32_1 = arith.constant 0 : i32
    return %c0_i32, %c0_i32_0 : i32, i32
  }
  func.func @transform_6(%arg0: i32) -> (i32, i32) {
    %c0_i32 = arith.constant 0 : i32
    %c0_i32_0 = arith.constant 0 : i32
    %c0_i32_1 = arith.constant 0 : i32
    return %c0_i32, %c0_i32_0 : i32, i32
  }
  func.func @transform_7(%arg0: i32) -> (i32, i32) {
    %c0_i32 = arith.constant 0 : i32
    %c0_i32_0 = arith.constant 0 : i32
    return %arg0, %c0_i32 : i32, i32
  }
}

</mosaic_0001>

<bundles_post_ra>
// kernel: tpu_custom_call.1
= control target key start
LH: loop header
LB: loop body
LE: loop exit
PB: predicated region body
PF: predicated region fallthrough
CT: control target
= control target key end

     0   :  { %12 = vsyncpa [#allocation3], 0  ;;  %s4006_s0 = inlined_call_operand.hbm [shape: bf16[16,1024], index: 0, kind: input, shape index: {}]   ;;  %s4007_s1 = inlined_call_operand.hbm [shape: bf16[1024,512], index: 1, kind: input, shape index: {}]   ;;  %s4008_s2 = inlined_call_operand.vmem [shape: f32[1,512], index: 2, kind: input, shape index: {}]   ;;  %s4009_s3 = inlined_call_operand.hbm [shape: bf16[512,256], index: 3, kind: input, shape index: {}]   ;;  %s4010_s4 = inlined_call_operand.vmem [shape: f32[1,256], index: 4, kind: input, shape index: {}]   ;;  %s4011_s5 = inlined_call_operand.hbm [shape: bf16[256,128], index: 5, kind: input, shape index: {}]   ;;  %s4012_s6 = inlined_call_operand.vmem [shape: f32[1,128], index: 6, kind: input, shape index: {}]   ;;  %s4013_s7 = inlined_call_operand.hbm [shape: bf16[16,128], index: 7, kind: output, shape index: {}]  }
   0x1   :  { %13 = vsyncpa [#allocation6], 0 }
   0x2   :  { %14 = vsyncpa [#allocation9], 0 }
   0x3   :  { %15 = vsyncpa [#allocation4], 0  ;;  %s3805_s24 = smov [#allocation5]   ;;  %s3687_s28 = scalar_lea.hbm %s4007_s1, 32768 }
   0x4   :  { %s33_s25 = sshll.u32 %s3805_s24, 4  ;;  %p3688_p0 = scmp.ne.s32.totalorder %s4007_s1, %s3687_s28  ;;  %s34_s25 = int_to_ptr.vmem [resolvable:$true] %s33_s25 }
   0x5   :  { %p3691_p1 = scmp.lt.u32.totalorder %s3687_s28, %s4007_s1 }
   0x7   :  { %p3693_p2 = pnand %p3691_p1, %p3688_p0 }
   0x9   :  { %3696 = shalt.err (!%p3693_p2)
}
   0xa   :  { %s3697_s10 = scalar_lea.vmem %s34_s25, 32768  ;;  %p3702_p4 = scmp.lt.s32.totalorder %s34_s25, %s34_s25 }
   0xb   :  { %p3698_p3 = scmp.ne.s32.totalorder %s34_s25, %s3697_s10  ;;  %p3703_p5 = scmp.lt.s32.totalorder %s3697_s10, %s3697_s10 }
   0xd   :  { %p3704_p6 = por %p3703_p5, %p3702_p4 }
   0xf   :  { %p3705_p7 = pnand %p3704_p6, %p3698_p3 }
  0x11   :  { %3708 = shalt.err (!%p3705_p7)
}
  0x12   :  { %s3806_s11 = smov 256   ;;  %s3807_s12 = smov 16  }
  0x13   :  { %39 = dma.hbm_to_vmem [thread:$0]  %s4007_s1, 32768, %s34_s25, [#allocation6], %s3806_s11, %s3806_s11, %s3807_s12  }
  0x14   :  { %s3808_s15 = smov [#allocation2]   ;;  %s3709_s19 = scalar_lea.hbm %s4006_s0, 1024 }
  0x15   :  { %s21_s16 = sshll.u32 %s3808_s15, 4  ;;  %p3710_p8 = scmp.ne.s32.totalorder %s4006_s0, %s3709_s19  ;;  %s22_s16 = int_to_ptr.vmem [resolvable:$true] %s21_s16 }
  0x16   :  { %p3713_p9 = scmp.lt.u32.totalorder %s3709_s19, %s4006_s0 }
  0x18   :  { %p3715_p10 = pnand %p3713_p9, %p3710_p8 }
  0x1a   :  { %3718 = shalt.err (!%p3715_p10)
}
  0x1b   :  { %s3719_s24 = scalar_lea.vmem %s22_s16, 1024  ;;  %p3724_p12 = scmp.lt.s32.totalorder %s22_s16, %s22_s16 }
  0x1c   :  { %p3720_p11 = scmp.ne.s32.totalorder %s22_s16, %s3719_s24  ;;  %p3725_p13 = scmp.lt.s32.totalorder %s3719_s24, %s3719_s24 }
  0x1e   :  { %p3726_p0 = por %p3725_p13, %p3724_p12 }
  0x20   :  { %p3727_p1 = pnand %p3726_p0, %p3720_p11 }
  0x22   :  { %3730 = shalt.err (!%p3727_p1)
}
  0x23   :  { %s3809_s1 = smov 512   ;;  %s3810_s25 = smov 32  }
  0x24   :  { %27 = dma.hbm_to_vmem [thread:$0]  %s4006_s0, 1024, %s22_s16, [#allocation3], %s3809_s1, %s3809_s1, %s3810_s25  }
  0x25   :  { %s3811_s28 = smov [#allocation7]   ;;  %s3731_s9 = scalar_lea.hbm %s4009_s3, 8192 }
  0x26   :  { %s47_s29 = sshll.u32 %s3811_s28, 4  ;;  %p3732_p2 = scmp.ne.s32.totalorder %s4009_s3, %s3731_s9  ;;  %s48_s29 = int_to_ptr.vmem [resolvable:$true] %s47_s29 }
  0x27   :  { %p3735_p3 = scmp.lt.u32.totalorder %s3731_s9, %s4009_s3 }
  0x29   :  { %p3737_p4 = pnand %p3735_p3, %p3732_p2 }
  0x2b   :  { %3740 = shalt.err (!%p3737_p4)
}
  0x2c   :  { %s3741_s14 = scalar_lea.vmem %s48_s29, 8192  ;;  %p3746_p6 = scmp.lt.s32.totalorder %s48_s29, %s48_s29 }
  0x2d   :  { %p3742_p5 = scmp.ne.s32.totalorder %s48_s29, %s3741_s14  ;;  %p3747_p7 = scmp.lt.s32.totalorder %s3741_s14, %s3741_s14 }
  0x2f   :  { %p3748_p8 = por %p3747_p7, %p3746_p6 }
  0x31   :  { %p3749_p9 = pnand %p3748_p8, %p3742_p5 }
  0x33   :  { %3752 = shalt.err (!%p3749_p9)
}
  0x34   :  { %s3812_s0 = smov 128   ;;  %s3813_s15 = smov 8  }
  0x35   :  { %53 = dma.hbm_to_vmem [thread:$0]  %s4009_s3, 8192, %s48_s29, [#allocation6], %s3812_s0, %s3812_s0, %s3813_s15  }
  0x36   :  { %s3814_s18 = smov [#allocation8]   ;;  %s3753_s22 = scalar_lea.hbm %s4011_s5, 2048 }
  0x37   :  { %s61_s19 = sshll.u32 %s3814_s18, 4  ;;  %p3754_p10 = scmp.ne.s32.totalorder %s4011_s5, %s3753_s22  ;;  %s62_s19 = int_to_ptr.vmem [resolvable:$true] %s61_s19 }
  0x38   :  { %p3757_p11 = scmp.lt.u32.totalorder %s3753_s22, %s4011_s5 }
  0x3a   :  { %p3759_p12 = pnand %p3757_p11, %p3754_p10 }
  0x3c   :  { %3762 = shalt.err (!%p3759_p12)
}
  0x3d   :  { %s3763_s26 = scalar_lea.vmem %s62_s19, 2048  ;;  %p3768_p0 = scmp.lt.s32.totalorder %s62_s19, %s62_s19 }
  0x3e   :  { %p3764_p13 = scmp.ne.s32.totalorder %s62_s19, %s3763_s26  ;;  %p3769_p1 = scmp.lt.s32.totalorder %s3763_s26, %s3763_s26 }
  0x40   :  { %p3770_p2 = por %p3769_p1, %p3768_p0 }
  0x42   :  { %p3771_p3 = pnand %p3770_p2, %p3764_p13 }
  0x44   :  { %3774 = shalt.err (!%p3771_p3)
}
  0x45   :  { %s3815_s3 = smov 64   ;;  %s3816_s27 = smov 4  }
  0x46   :  { %67 = dma.hbm_to_vmem [thread:$0]  %s4011_s5, 2048, %s62_s19, [#allocation9], %s3815_s3, %s3815_s3, %s3816_s27  }
  0x47   :  { %3797 = dma.done.wait [#allocation3], 1024  }
  0x48   :  { %3798 = vsyncadd [#allocation3], 4294966272 }
  0x49   :  { %3799 = dma.done.wait [#allocation6], 40960  }
  0x4a   :  { %3800 = vsyncadd [#allocation6], 4294926336 }
  0x4b   :  { %3801 = dma.done.wait [#allocation9], 2048  }
  0x4c   :  { %3802 = vsyncadd [#allocation9], 4294965248  ;;  %v3191_v0 = vld [vmem:[#allocation5 + $0x4] ss:$16 sps:$4 sm:$0xff]   ;;  %v3195_v2 = vld [vmem:[#allocation5] ss:$16 sps:$4 sm:$0xff]  }
  0x4d   :  { %v3193_v1 = vld [vmem:[#allocation5 + $0x204] ss:$16 sps:$4 sm:$0xff]   ;;  %1689 = vmatprep.subr.bf16.mxu1 %v3191_v0  ;;  %v3196_v3 = vld [vmem:[#allocation5 + $0x200] ss:$16 sps:$4 sm:$0xff]   ;;  %v84_v50 = vld [vmem:[#allocation2 + $0x8] sm:$0xff]  ;;  %s3817_s10 = smov [#allocation10]  }
  0x4e   :  { %1732 = vmatprep.subr.bf16.mxu0 %v3193_v1  ;;  %v3197_v4 = vld [vmem:[#allocation5 + $0x24] ss:$16 sps:$4 sm:$0xff]   ;;  %1690 = vmatpush1.bf16.msra.mxu1 %v3195_v2  ;;  %v3201_v6 = vld [vmem:[#allocation5 + $0x20] ss:$16 sps:$4 sm:$0xff]   ;;  %v88_v51 = vld [vmem:[#allocation2 + $0x28] sm:$0xff]  ;;  %s2748_s11 = sshll.u32 %s3817_s10, 4  ;;  %s2749_s11 = int_to_ptr.vmem [resolvable:$true] %s2748_s11 }
  0x4f   :  { %1733 = vmatpush1.bf16.msra.mxu0 %v3196_v3  ;;  %v3199_v5 = vld [vmem:[#allocation5 + $0x224] ss:$16 sps:$4 sm:$0xff]   ;;  %1691 = vmatprep.subr.bf16.mxu1 %v3197_v4  ;;  %v3202_v7 = vld [vmem:[#allocation5 + $0x220] ss:$16 sps:$4 sm:$0xff]   ;;  %v3909_v55 = vcombine.high %v84_v50, %v88_v51  ;;  %s3775_s12 = scalar_lea.vmem %s2749_s11, 128  ;;  %p3780_p5 = scmp.lt.s32.totalorder %s2749_s11, %s2749_s11 }
  0x50   :  { %1734 = vmatprep.subr.bf16.mxu0 %v3199_v5  ;;  %v3203_v8 = vld [vmem:[#allocation5 + $0x44] ss:$16 sps:$4 sm:$0xff]   ;;  %v3207_v10 = vld [vmem:[#allocation5 + $0x40] ss:$16 sps:$4 sm:$0xff]   ;;  %p3776_p4 = scmp.ne.s32.totalorder %s2749_s11, %s3775_s12  ;;  %p3781_p6 = scmp.lt.s32.totalorder %s3775_s12, %s3775_s12 }
  0x51   :  { %v3205_v9 = vld [vmem:[#allocation5 + $0x244] ss:$16 sps:$4 sm:$0xff]   ;;  %v3208_v11 = vld [vmem:[#allocation5 + $0x240] ss:$16 sps:$4 sm:$0xff]   ;;  %1764 = vmatprep.mubr.bf16.mxu0 %v3909_v55 }
  0x52   :  { %1692 = vmatpush1.bf16.msra.mxu1 %v3201_v6  ;;  %v3209_v12 = vld [vmem:[#allocation5 + $0x64] ss:$16 sps:$4 sm:$0xff]   ;;  %v3213_v14 = vld [vmem:[#allocation5 + $0x60] ss:$16 sps:$4 sm:$0xff]   ;;  %p3782_p7 = por %p3781_p6, %p3780_p5 }
  0x53   :  { %1735 = vmatpush1.bf16.msra.mxu0 %v3202_v7  ;;  %1693 = vmatprep.subr.bf16.mxu1 %v3203_v8  ;;  %v3211_v13 = vld [vmem:[#allocation5 + $0x264] ss:$16 sps:$4 sm:$0xff]   ;;  %v3214_v15 = vld [vmem:[#allocation5 + $0x260] ss:$16 sps:$4 sm:$0xff]   ;;  %v3292_v7 = vld [vmem:[#allocation5 + $0xc] ss:$16 sps:$4 sm:$0xff]  }
  0x54   :  { %1736 = vmatprep.subr.bf16.mxu0 %v3205_v9  ;;  %v3215_v16 = vld [vmem:[#allocation5 + $0x84] ss:$16 sps:$4 sm:$0xff]   ;;  %v3219_v18 = vld [vmem:[#allocation5 + $0x80] ss:$16 sps:$4 sm:$0xff]   ;;  %v3914_v9 = vcombine.low %v84_v50, %v88_v51  ;;  %v3344_v50 = vld [vmem:[#allocation5 + $0x128] ss:$16 sps:$4 sm:$0xff]   ;;  %p3783_p8 = pnand %p3782_p7, %p3776_p4 }
  0x55   :  { %v3217_v17 = vld [vmem:[#allocation5 + $0x284] ss:$16 sps:$4 sm:$0xff]   ;;  %v3220_v19 = vld [vmem:[#allocation5 + $0x280] ss:$16 sps:$4 sm:$0xff]  }
  0x56   :  { %1694 = vmatpush1.bf16.msra.mxu1 %v3207_v10  ;;  %v3221_v20 = vld [vmem:[#allocation5 + $0xa4] ss:$16 sps:$4 sm:$0xff]   ;;  %v3225_v22 = vld [vmem:[#allocation5 + $0xa0] ss:$16 sps:$4 sm:$0xff]  }
  0x57   :  { %1737 = vmatpush1.bf16.msra.mxu0 %v3208_v11  ;;  %1695 = vmatprep.subr.bf16.mxu1 %v3209_v12  ;;  %v3223_v21 = vld [vmem:[#allocation5 + $0x2a4] ss:$16 sps:$4 sm:$0xff]   ;;  %v3226_v23 = vld [vmem:[#allocation5 + $0x2a0] ss:$16 sps:$4 sm:$0xff]   ;;  %v3290_v11 = vld [vmem:[#allocation5 + $0x8] ss:$16 sps:$4 sm:$0xff]  }
  0x58   :  { %1738 = vmatprep.subr.bf16.mxu0 %v3211_v13  ;;  %v3227_v24 = vld [vmem:[#allocation5 + $0xc4] ss:$16 sps:$4 sm:$0xff]   ;;  %v3231_v26 = vld [vmem:[#allocation5 + $0xc0] ss:$16 sps:$4 sm:$0xff]   ;;  %v3298_v13 = vld [vmem:[#allocation5 + $0x2c] ss:$16 sps:$4 sm:$0xff]  }
  0x59   :  { %v3229_v25 = vld [vmem:[#allocation5 + $0x2c4] ss:$16 sps:$4 sm:$0xff]   ;;  %v3232_v27 = vld [vmem:[#allocation5 + $0x2c0] ss:$16 sps:$4 sm:$0xff]  }
  0x5a   :  { %1696 = vmatpush1.bf16.msra.mxu1 %v3213_v14  ;;  %v3233_v28 = vld [vmem:[#allocation5 + $0xe4] ss:$16 sps:$4 sm:$0xff]   ;;  %v3237_v30 = vld [vmem:[#allocation5 + $0xe0] ss:$16 sps:$4 sm:$0xff]  }
  0x5b   :  { %1739 = vmatpush1.bf16.msra.mxu0 %v3214_v15  ;;  %1697 = vmatprep.subr.bf16.mxu1 %v3215_v16  ;;  %v3235_v29 = vld [vmem:[#allocation5 + $0x2e4] ss:$16 sps:$4 sm:$0xff]   ;;  %v3238_v31 = vld [vmem:[#allocation5 + $0x2e0] ss:$16 sps:$4 sm:$0xff]   ;;  %v3296_v15 = vld [vmem:[#allocation5 + $0x28] ss:$16 sps:$4 sm:$0xff]  }
  0x5c   :  { %1740 = vmatprep.subr.bf16.mxu0 %v3217_v17  ;;  %v3239_v32 = vld [vmem:[#allocation5 + $0x104] ss:$16 sps:$4 sm:$0xff]   ;;  %v3243_v34 = vld [vmem:[#allocation5 + $0x100] ss:$16 sps:$4 sm:$0xff]   ;;  %v3304_v17 = vld [vmem:[#allocation5 + $0x4c] ss:$16 sps:$4 sm:$0xff]  }
  0x5d   :  { %v3241_v33 = vld [vmem:[#allocation5 + $0x304] ss:$16 sps:$4 sm:$0xff]   ;;  %v3244_v35 = vld [vmem:[#allocation5 + $0x300] ss:$16 sps:$4 sm:$0xff]  }
  0x5e   :  { %1698 = vmatpush1.bf16.msra.mxu1 %v3219_v18  ;;  %v3245_v36 = vld [vmem:[#allocation5 + $0x124] ss:$16 sps:$4 sm:$0xff]   ;;  %v3249_v38 = vld [vmem:[#allocation5 + $0x120] ss:$16 sps:$4 sm:$0xff]  }
  0x5f   :  { %1741 = vmatpush1.bf16.msra.mxu0 %v3220_v19  ;;  %1699 = vmatprep.subr.bf16.mxu1 %v3221_v20  ;;  %v3247_v37 = vld [vmem:[#allocation5 + $0x324] ss:$16 sps:$4 sm:$0xff]   ;;  %v3250_v39 = vld [vmem:[#allocation5 + $0x320] ss:$16 sps:$4 sm:$0xff]   ;;  %v3302_v19 = vld [vmem:[#allocation5 + $0x48] ss:$16 sps:$4 sm:$0xff]  }
  0x60   :  { %1742 = vmatprep.subr.bf16.mxu0 %v3223_v21  ;;  %v3251_v40 = vld [vmem:[#allocation5 + $0x144] ss:$16 sps:$4 sm:$0xff]   ;;  %v3255_v42 = vld [vmem:[#allocation5 + $0x140] ss:$16 sps:$4 sm:$0xff]   ;;  %v3310_v21 = vld [vmem:[#allocation5 + $0x6c] ss:$16 sps:$4 sm:$0xff]  }
  0x61   :  { %v3253_v41 = vld [vmem:[#allocation5 + $0x344] ss:$16 sps:$4 sm:$0xff]   ;;  %v3256_v43 = vld [vmem:[#allocation5 + $0x340] ss:$16 sps:$4 sm:$0xff]  }
  0x62   :  { %1700 = vmatpush1.bf16.msra.mxu1 %v3225_v22  ;;  %v3257_v44 = vld [vmem:[#allocation5 + $0x164] ss:$16 sps:$4 sm:$0xff]   ;;  %v3261_v46 = vld [vmem:[#allocation5 + $0x160] ss:$16 sps:$4 sm:$0xff]  }
  0x63   :  { %1743 = vmatpush1.bf16.msra.mxu0 %v3226_v23  ;;  %1701 = vmatprep.subr.bf16.mxu1 %v3227_v24  ;;  %v3259_v45 = vld [vmem:[#allocation5 + $0x364] ss:$16 sps:$4 sm:$0xff]   ;;  %v3262_v47 = vld [vmem:[#allocation5 + $0x360] ss:$16 sps:$4 sm:$0xff]   ;;  %v3308_v23 = vld [vmem:[#allocation5 + $0x68] ss:$16 sps:$4 sm:$0xff]  }
  0x64   :  { %1744 = vmatprep.subr.bf16.mxu0 %v3229_v25  ;;  %v83_v48 = vld [vmem:[#allocation2] sm:$0xff]  ;;  %v3316_v25 = vld [vmem:[#allocation5 + $0x8c] ss:$16 sps:$4 sm:$0xff]  }
  0x65   :  { %v87_v49 = vld [vmem:[#allocation2 + $0x20] sm:$0xff] }
  0x66   :  { %1702 = vmatpush1.bf16.msra.mxu1 %v3231_v26  ;;  %v3263_v52 = vld [vmem:[#allocation5 + $0x184] ss:$16 sps:$4 sm:$0xff]   ;;  %v2763_v53 = vcombine.high %v83_v48, %v87_v49  ;;  %v3267_v56 = vld [vmem:[#allocation5 + $0x180] ss:$16 sps:$4 sm:$0xff]   ;;  %v3912_v8 = vcombine.low %v83_v48, %v87_v49  ;;  %v3346_v48 = vld [vmem:[#allocation5 + $0x12c] ss:$16 sps:$4 sm:$0xff]  }
  0x67   :  { %1745 = vmatpush1.bf16.msra.mxu0 %v3232_v27  ;;  %1703 = vmatprep.subr.bf16.mxu1 %v3233_v28  ;;  %v3265_v54 = vld [vmem:[#allocation5 + $0x384] ss:$16 sps:$4 sm:$0xff]   ;;  %v3268_v57 = vld [vmem:[#allocation5 + $0x380] ss:$16 sps:$4 sm:$0xff]   ;;  %v3314_v27 = vld [vmem:[#allocation5 + $0x88] ss:$16 sps:$4 sm:$0xff]  }
  0x68   :  { %1746 = vmatprep.subr.bf16.mxu0 %v3235_v29  ;;  %1721 = vmatprep.mubr.bf16.mxu1 %v2763_v53  ;;  %v3269_v58 = vld [vmem:[#allocation5 + $0x1a4] ss:$16 sps:$4 sm:$0xff]   ;;  %v3273_v60 = vld [vmem:[#allocation5 + $0x1a0] ss:$16 sps:$4 sm:$0xff]   ;;  %v3322_v29 = vld [vmem:[#allocation5 + $0xac] ss:$16 sps:$4 sm:$0xff]  }
  0x69   :  { %v3271_v59 = vld [vmem:[#allocation5 + $0x3a4] ss:$16 sps:$4 sm:$0xff]   ;;  %v3274_v61 = vld [vmem:[#allocation5 + $0x3a0] ss:$16 sps:$4 sm:$0xff]  }
  0x6a   :  { %1704 = vmatpush1.bf16.msra.mxu1 %v3237_v30  ;;  %v3275_v62 = vld [vmem:[#allocation5 + $0x1c4] ss:$16 sps:$4 sm:$0xff]   ;;  %v3279_v0 = vld [vmem:[#allocation5 + $0x1c0] ss:$16 sps:$4 sm:$0xff]  }
  0x6b   :  { %1747 = vmatpush1.bf16.msra.mxu0 %v3238_v31  ;;  %1705 = vmatprep.subr.bf16.mxu1 %v3239_v32  ;;  %v3277_v63 = vld [vmem:[#allocation5 + $0x3c4] ss:$16 sps:$4 sm:$0xff]   ;;  %v3280_v1 = vld [vmem:[#allocation5 + $0x3c0] ss:$16 sps:$4 sm:$0xff]   ;;  %v3320_v31 = vld [vmem:[#allocation5 + $0xa8] ss:$16 sps:$4 sm:$0xff]  }
  0x6c   :  { %1748 = vmatprep.subr.bf16.mxu0 %v3241_v33  ;;  %v3281_v2 = vld [vmem:[#allocation5 + $0x1e4] ss:$16 sps:$4 sm:$0xff]   ;;  %v3285_v4 = vld [vmem:[#allocation5 + $0x1e0] ss:$16 sps:$4 sm:$0xff]   ;;  %v3328_v33 = vld [vmem:[#allocation5 + $0xcc] ss:$16 sps:$4 sm:$0xff]  }
  0x6d   :  { %v3283_v3 = vld [vmem:[#allocation5 + $0x3e4] ss:$16 sps:$4 sm:$0xff]   ;;  %v3286_v5 = vld [vmem:[#allocation5 + $0x3e0] ss:$16 sps:$4 sm:$0xff]  }
  0x6e   :  { %1706 = vmatpush1.bf16.msra.mxu1 %v3243_v34  ;;  %v3289_v6 = vld [vmem:[#allocation5 + $0x404] ss:$16 sps:$4 sm:$0xff]   ;;  %v3287_v10 = vld [vmem:[#allocation5 + $0x400] ss:$16 sps:$4 sm:$0xff]  }
  0x6f   :  { %1749 = vmatpush1.bf16.msra.mxu0 %v3244_v35  ;;  %1707 = vmatprep.subr.bf16.mxu1 %v3245_v36  ;;  %v3295_v12 = vld [vmem:[#allocation5 + $0x424] ss:$16 sps:$4 sm:$0xff]   ;;  %v3293_v14 = vld [vmem:[#allocation5 + $0x420] ss:$16 sps:$4 sm:$0xff]  }
  0x70   :  { %1750 = vmatprep.subr.bf16.mxu0 %v3247_v37  ;;  %v3301_v16 = vld [vmem:[#allocation5 + $0x444] ss:$16 sps:$4 sm:$0xff]   ;;  %v3299_v18 = vld [vmem:[#allocation5 + $0x440] ss:$16 sps:$4 sm:$0xff]   ;;  %v3326_v37 = vld [vmem:[#allocation5 + $0xc8] ss:$16 sps:$4 sm:$0xff]  }
  0x71   :  { %v3307_v20 = vld [vmem:[#allocation5 + $0x464] ss:$16 sps:$4 sm:$0xff]   ;;  %v3305_v22 = vld [vmem:[#allocation5 + $0x460] ss:$16 sps:$4 sm:$0xff]  }
  0x72   :  { %1708 = vmatpush1.bf16.msra.mxu1 %v3249_v38  ;;  %v3313_v24 = vld [vmem:[#allocation5 + $0x484] ss:$16 sps:$4 sm:$0xff]   ;;  %v3311_v26 = vld [vmem:[#allocation5 + $0x480] ss:$16 sps:$4 sm:$0xff]  }
  0x73   :  { %1751 = vmatpush1.bf16.msra.mxu0 %v3250_v39  ;;  %1709 = vmatprep.subr.bf16.mxu1 %v3251_v40  ;;  %v3319_v28 = vld [vmem:[#allocation5 + $0x4a4] ss:$16 sps:$4 sm:$0xff]   ;;  %v3317_v30 = vld [vmem:[#allocation5 + $0x4a0] ss:$16 sps:$4 sm:$0xff]   ;;  %v3334_v40 = vld [vmem:[#allocation5 + $0xec] ss:$16 sps:$4 sm:$0xff]  }
  0x74   :  { %1752 = vmatprep.subr.bf16.mxu0 %v3253_v41  ;;  %v3325_v32 = vld [vmem:[#allocation5 + $0x4c4] ss:$16 sps:$4 sm:$0xff]   ;;  %v3323_v36 = vld [vmem:[#allocation5 + $0x4c0] ss:$16 sps:$4 sm:$0xff]  }
  0x75   :  { %v3918_v34 = vld [vmem:[#allocation2 + $0x10] sm:$0xff] }
  0x76   :  { %1710 = vmatpush1.bf16.msra.mxu1 %v3255_v42  ;;  %v3920_v35 = vld [vmem:[#allocation2 + $0x30] sm:$0xff]  ;;  %v3332_v42 = vld [vmem:[#allocation5 + $0xe8] ss:$16 sps:$4 sm:$0xff]  }
  0x77   :  { %1753 = vmatpush1.bf16.msra.mxu0 %v3256_v43  ;;  %1711 = vmatprep.subr.bf16.mxu1 %v3257_v44  ;;  %v3924_v38 = vcombine.high %v3918_v34, %v3920_v35  ;;  %v3331_v39 = vld [vmem:[#allocation5 + $0x4e4] ss:$16 sps:$4 sm:$0xff]   ;;  %v3329_v41 = vld [vmem:[#allocation5 + $0x4e0] ss:$16 sps:$4 sm:$0xff]   ;;  %v3340_v44 = vld [vmem:[#allocation5 + $0x10c] ss:$16 sps:$4 sm:$0xff]  }
  0x78   :  { %1754 = vmatprep.subr.bf16.mxu0 %v3259_v45  ;;  %v3337_v43 = vld [vmem:[#allocation5 + $0x504] ss:$16 sps:$4 sm:$0xff]   ;;  %v3335_v45 = vld [vmem:[#allocation5 + $0x500] ss:$16 sps:$4 sm:$0xff]  }
  0x79   :  { %v3341_v49 = vld [vmem:[#allocation5 + $0x520] ss:$16 sps:$4 sm:$0xff]   ;;  %v3349_v51 = vld [vmem:[#allocation5 + $0x544] ss:$16 sps:$4 sm:$0xff]  }
  0x7a   :  { %1712 = vmatpush1.bf16.msra.mxu1 %v3261_v46  ;;  %v3338_v46 = vld [vmem:[#allocation5 + $0x108] ss:$16 sps:$4 sm:$0xff]  }
  0x7b   :  { %1755 = vmatpush1.bf16.msra.mxu0 %v3262_v47  ;;  %1713 = vmatprep.subr.bf16.mxu1 %v3263_v52  ;;  %v3343_v47 = vld [vmem:[#allocation5 + $0x524] ss:$16 sps:$4 sm:$0xff]   ;;  %v3352_v52 = vld [vmem:[#allocation5 + $0x14c] ss:$16 sps:$4 sm:$0xff]  }
  0x7c   :  { %1756 = vmatprep.subr.bf16.mxu0 %v3265_v54  ;;  %v3350_v54 = vld [vmem:[#allocation5 + $0x148] ss:$16 sps:$4 sm:$0xff]  }
  0x7e   :  { %1714 = vmatpush1.bf16.msra.mxu1 %v3267_v56  ;;  %v3355_v56 = vld [vmem:[#allocation5 + $0x564] ss:$16 sps:$4 sm:$0xff]  }
  0x7f   :  { %1757 = vmatpush1.bf16.msra.mxu0 %v3268_v57  ;;  %1715 = vmatprep.subr.bf16.mxu1 %v3269_v58  ;;  %v3358_v57 = vld [vmem:[#allocation5 + $0x16c] ss:$16 sps:$4 sm:$0xff]   ;;  %v3353_v58 = vld [vmem:[#allocation5 + $0x560] ss:$16 sps:$4 sm:$0xff]  }
  0x80   :  { %1758 = vmatprep.subr.bf16.mxu0 %v3271_v59  ;;  %v3356_v59 = vld [vmem:[#allocation5 + $0x168] ss:$16 sps:$4 sm:$0xff]  }
  0x82   :  { %1716 = vmatpush1.bf16.msra.mxu1 %v3273_v60  ;;  %v3361_v60 = vld [vmem:[#allocation5 + $0x584] ss:$16 sps:$4 sm:$0xff]  }
  0x83   :  { %1759 = vmatpush1.bf16.msra.mxu0 %v3274_v61  ;;  %1717 = vmatprep.subr.bf16.mxu1 %v3275_v62  ;;  %v3364_v61 = vld [vmem:[#allocation5 + $0x18c] ss:$16 sps:$4 sm:$0xff]   ;;  %v3359_v62 = vld [vmem:[#allocation5 + $0x580] ss:$16 sps:$4 sm:$0xff]  }
  0x84   :  { %1760 = vmatprep.subr.bf16.mxu0 %v3277_v63  ;;  %v3362_v63 = vld [vmem:[#allocation5 + $0x188] ss:$16 sps:$4 sm:$0xff]  }
  0x86   :  { %1718 = vmatpush1.bf16.msra.mxu1 %v3279_v0  ;;  %v3367_v0 = vld [vmem:[#allocation5 + $0x5a4] ss:$16 sps:$4 sm:$0xff]  }
  0x87   :  { %1761 = vmatpush1.bf16.msra.mxu0 %v3280_v1  ;;  %1719 = vmatprep.subr.bf16.mxu1 %v3281_v2  ;;  %v3370_v1 = vld [vmem:[#allocation5 + $0x1ac] ss:$16 sps:$4 sm:$0xff]   ;;  %v3365_v2 = vld [vmem:[#allocation5 + $0x5a0] ss:$16 sps:$4 sm:$0xff]  }
  0x88   :  { %1762 = vmatprep.subr.bf16.mxu0 %v3283_v3  ;;  %v3368_v3 = vld [vmem:[#allocation5 + $0x1a8] ss:$16 sps:$4 sm:$0xff]  }
  0x8a   :  { %1720 = vmatpush1.bf16.msra.mxu1 %v3285_v4  ;;  %v3373_v4 = vld [vmem:[#allocation5 + $0x5c4] ss:$16 sps:$4 sm:$0xff]  }
  0x8b   :  { %1763 = vmatpush1.bf16.msra.mxu0 %v3286_v5  ;;  %1861 = vmatprep.subr.bf16.mxu1 %v3292_v7  ;;  %v3376_v5 = vld [vmem:[#allocation5 + $0x1cc] ss:$16 sps:$4 sm:$0xff]   ;;  %v3374_v7 = vld [vmem:[#allocation5 + $0x1c8] ss:$16 sps:$4 sm:$0xff]  }
  0x8c   :  { %1775 = vmatprep.subr.bf16.mxu0 %v3289_v6  ;;  %v3371_v6 = vld [vmem:[#allocation5 + $0x5c0] ss:$16 sps:$4 sm:$0xff]  }
  0x8d   :  { %1722 = vmatmul.mubr.bf16.vlgmr.msra.gmra.mrb[0].mxu1 %v3912_v8 }
  0x8e   :  { %1765 = vmatmul.mubr.bf16.vlgmr.msra.gmra.mrb[0].mxu0 %v3914_v9  ;;  %1862 = vmatpush1.bf16.msra.mxu1 %v3290_v11  ;;  %v3382_v11 = vld [vmem:[#allocation5 + $0x1ec] ss:$16 sps:$4 sm:$0xff]  }
  0x8f   :  { %1776 = vmatpush1.bf16.msra.mxu0 %v3287_v10  ;;  %1863 = vmatprep.subr.bf16.mxu1 %v3298_v13  ;;  %v3379_v10 = vld [vmem:[#allocation5 + $0x5e4] ss:$16 sps:$4 sm:$0xff]   ;;  %v3380_v13 = vld [vmem:[#allocation5 + $0x1e8] ss:$16 sps:$4 sm:$0xff]  }
  0x90   :  { %1777 = vmatprep.subr.bf16.mxu0 %v3295_v12  ;;  %1893 = vmatprep.mubr.bf16.mxu1 %v2763_v53  ;;  %v3347_v53 = vld [vmem:[#allocation5 + $0x540] ss:$16 sps:$4 sm:$0xff]  }
  0x91   :  { %1807 = vmatprep.mubr.bf16.mxu0 %v3924_v38  ;;  %v3377_v12 = vld [vmem:[#allocation5 + $0x5e0] ss:$16 sps:$4 sm:$0xff]  }
  0x92   :  { %1864 = vmatpush1.bf16.msra.mxu1 %v3296_v15  ;;  %v3388_v15 = vld [vmem:[#allocation5 + $0x20c] ss:$16 sps:$4 sm:$0xff]  }
  0x93   :  { %1778 = vmatpush1.bf16.msra.mxu0 %v3293_v14  ;;  %1865 = vmatprep.subr.bf16.mxu1 %v3304_v17  ;;  %v3385_v14 = vld [vmem:[#allocation5 + $0x604] ss:$16 sps:$4 sm:$0xff]   ;;  %v3383_v17 = vld [vmem:[#allocation5 + $0x600] ss:$16 sps:$4 sm:$0xff]  }
  0x94   :  { %1779 = vmatprep.subr.bf16.mxu0 %v3301_v16  ;;  %v3929_v16 = vcombine.low %v3918_v34, %v3920_v35  ;;  %v3412_v34 = vld [vmem:[#allocation5 + $0x28c] ss:$16 sps:$4 sm:$0xff]   ;;  %v3407_v35 = vld [vmem:[#allocation5 + $0x680] ss:$16 sps:$4 sm:$0xff]  }
  0x96   :  { %1866 = vmatpush1.bf16.msra.mxu1 %v3302_v19  ;;  %v3391_v19 = vld [vmem:[#allocation5 + $0x624] ss:$16 sps:$4 sm:$0xff]  }
  0x97   :  { %1780 = vmatpush1.bf16.msra.mxu0 %v3299_v18  ;;  %1867 = vmatprep.subr.bf16.mxu1 %v3310_v21  ;;  %v3386_v18 = vld [vmem:[#allocation5 + $0x208] ss:$16 sps:$4 sm:$0xff]  }
  0x98   :  { %1781 = vmatprep.subr.bf16.mxu0 %v3307_v20  ;;  %v3394_v20 = vld [vmem:[#allocation5 + $0x22c] ss:$16 sps:$4 sm:$0xff]  }
  0x99   :  { %v3931_v21 = vld [vmem:[#allocation2 + $0x18] sm:$0xff] }
  0x9a   :  { %1868 = vmatpush1.bf16.msra.mxu1 %v3308_v23  ;;  %v3389_v23 = vld [vmem:[#allocation5 + $0x620] ss:$16 sps:$4 sm:$0xff]  }
  0x9b   :  { %1782 = vmatpush1.bf16.msra.mxu0 %v3305_v22  ;;  %1869 = vmatprep.subr.bf16.mxu1 %v3316_v25  ;;  %v3933_v22 = vld [vmem:[#allocation2 + $0x38] sm:$0xff] }
  0x9c   :  { %1783 = vmatprep.subr.bf16.mxu0 %v3313_v24  ;;  %v3392_v24 = vld [vmem:[#allocation5 + $0x228] ss:$16 sps:$4 sm:$0xff]   ;;  %v3939_v25 = vcombine.high %v3931_v21, %v3933_v22 }
  0x9e   :  { %1870 = vmatpush1.bf16.msra.mxu1 %v3314_v27  ;;  %v3400_v27 = vld [vmem:[#allocation5 + $0x24c] ss:$16 sps:$4 sm:$0xff]  }
  0x9f   :  { %1784 = vmatpush1.bf16.msra.mxu0 %v3311_v26  ;;  %1871 = vmatprep.subr.bf16.mxu1 %v3322_v29  ;;  %v3397_v26 = vld [vmem:[#allocation5 + $0x644] ss:$16 sps:$4 sm:$0xff]   ;;  %v3398_v29 = vld [vmem:[#allocation5 + $0x248] ss:$16 sps:$4 sm:$0xff]  }
  0xa0   :  { %1785 = vmatprep.subr.bf16.mxu0 %v3319_v28  ;;  %v3395_v28 = vld [vmem:[#allocation5 + $0x640] ss:$16 sps:$4 sm:$0xff]  }
  0xa2   :  { %1872 = vmatpush1.bf16.msra.mxu1 %v3320_v31  ;;  %v3401_v31 = vld [vmem:[#allocation5 + $0x660] ss:$16 sps:$4 sm:$0xff]  }
  0xa3   :  { %1786 = vmatpush1.bf16.msra.mxu0 %v3317_v30  ;;  %1873 = vmatprep.subr.bf16.mxu1 %v3328_v33  ;;  %v3406_v30 = vld [vmem:[#allocation5 + $0x26c] ss:$16 sps:$4 sm:$0xff]   ;;  %v3409_v33 = vld [vmem:[#allocation5 + $0x684] ss:$16 sps:$4 sm:$0xff]  }
  0xa4   :  { %1787 = vmatprep.subr.bf16.mxu0 %v3325_v32  ;;  %v3404_v32 = vld [vmem:[#allocation5 + $0x268] ss:$16 sps:$4 sm:$0xff]  }
  0xa6   :  { %1874 = vmatpush1.bf16.msra.mxu1 %v3326_v37  ;;  %v3418_v37 = vld [vmem:[#allocation5 + $0x2ac] ss:$16 sps:$4 sm:$0xff]  }
  0xa7   :  { %1788 = vmatpush1.bf16.msra.mxu0 %v3323_v36  ;;  %1875 = vmatprep.subr.bf16.mxu1 %v3334_v40  ;;  %v3410_v36 = vld [vmem:[#allocation5 + $0x288] ss:$16 sps:$4 sm:$0xff]  }
  0xa8   :  { %1789 = vmatprep.subr.bf16.mxu0 %v3331_v39  ;;  %v3413_v39 = vld [vmem:[#allocation5 + $0x6a0] ss:$16 sps:$4 sm:$0xff]   ;;  %v3416_v40 = vld [vmem:[#allocation5 + $0x2a8] ss:$16 sps:$4 sm:$0xff]  }
  0xaa   :  { %1876 = vmatpush1.bf16.msra.mxu1 %v3332_v42  ;;  %v3424_v42 = vld [vmem:[#allocation5 + $0x2cc] ss:$16 sps:$4 sm:$0xff]  }
  0xab   :  { %1790 = vmatpush1.bf16.msra.mxu0 %v3329_v41  ;;  %1877 = vmatprep.subr.bf16.mxu1 %v3340_v44  ;;  %v3421_v41 = vld [vmem:[#allocation5 + $0x6c4] ss:$16 sps:$4 sm:$0xff]   ;;  %v3422_v44 = vld [vmem:[#allocation5 + $0x2c8] ss:$16 sps:$4 sm:$0xff]  }
  0xac   :  { %1791 = vmatprep.subr.bf16.mxu0 %v3337_v43  ;;  %v3419_v43 = vld [vmem:[#allocation5 + $0x6c0] ss:$16 sps:$4 sm:$0xff]  }
  0xae   :  { %1878 = vmatpush1.bf16.msra.mxu1 %v3338_v46  ;;  %v3430_v46 = vld [vmem:[#allocation5 + $0x2ec] ss:$16 sps:$4 sm:$0xff]  }
  0xaf   :  { %1792 = vmatpush1.bf16.msra.mxu0 %v3335_v45  ;;  %1879 = vmatprep.subr.bf16.mxu1 %v3346_v48  ;;  %v3427_v45 = vld [vmem:[#allocation5 + $0x6e4] ss:$16 sps:$4 sm:$0xff]   ;;  %v3428_v48 = vld [vmem:[#allocation5 + $0x2e8] ss:$16 sps:$4 sm:$0xff]  }
  0xb0   :  { %1793 = vmatprep.subr.bf16.mxu0 %v3343_v47  ;;  %v3425_v47 = vld [vmem:[#allocation5 + $0x6e0] ss:$16 sps:$4 sm:$0xff]  }
  0xb2   :  { %1880 = vmatpush1.bf16.msra.mxu1 %v3344_v50  ;;  %v3436_v50 = vld [vmem:[#allocation5 + $0x30c] ss:$16 sps:$4 sm:$0xff]  }
  0xb3   :  { %1794 = vmatpush1.bf16.msra.mxu0 %v3341_v49  ;;  %1881 = vmatprep.subr.bf16.mxu1 %v3352_v52  ;;  %v3433_v49 = vld [vmem:[#allocation5 + $0x704] ss:$16 sps:$4 sm:$0xff]   ;;  %v3434_v52 = vld [vmem:[#allocation5 + $0x308] ss:$16 sps:$4 sm:$0xff]  }
  0xb4   :  { %1795 = vmatprep.subr.bf16.mxu0 %v3349_v51  ;;  %v3431_v51 = vld [vmem:[#allocation5 + $0x700] ss:$16 sps:$4 sm:$0xff]  }
  0xb6   :  { %1882 = vmatpush1.bf16.msra.mxu1 %v3350_v54  ;;  %v3442_v54 = vld [vmem:[#allocation5 + $0x32c] ss:$16 sps:$4 sm:$0xff]  }
  0xb7   :  { %1796 = vmatpush1.bf16.msra.mxu0 %v3347_v53  ;;  %1883 = vmatprep.subr.bf16.mxu1 %v3358_v57  ;;  %v3439_v53 = vld [vmem:[#allocation5 + $0x724] ss:$16 sps:$4 sm:$0xff]   ;;  %v3440_v57 = vld [vmem:[#allocation5 + $0x328] ss:$16 sps:$4 sm:$0xff]  }
  0xb8   :  { %1797 = vmatprep.subr.bf16.mxu0 %v3355_v56  ;;  %v3437_v56 = vld [vmem:[#allocation5 + $0x720] ss:$16 sps:$4 sm:$0xff]  }
  0xba   :  { %1884 = vmatpush1.bf16.msra.mxu1 %v3356_v59  ;;  %v3448_v59 = vld [vmem:[#allocation5 + $0x34c] ss:$16 sps:$4 sm:$0xff]  }
  0xbb   :  { %1798 = vmatpush1.bf16.msra.mxu0 %v3353_v58  ;;  %1885 = vmatprep.subr.bf16.mxu1 %v3364_v61  ;;  %v3445_v58 = vld [vmem:[#allocation5 + $0x744] ss:$16 sps:$4 sm:$0xff]   ;;  %v3446_v61 = vld [vmem:[#allocation5 + $0x348] ss:$16 sps:$4 sm:$0xff]  }
  0xbc   :  { %1799 = vmatprep.subr.bf16.mxu0 %v3361_v60  ;;  %v3443_v60 = vld [vmem:[#allocation5 + $0x740] ss:$16 sps:$4 sm:$0xff]  }
  0xbe   :  { %1886 = vmatpush1.bf16.msra.mxu1 %v3362_v63  ;;  %v3454_v63 = vld [vmem:[#allocation5 + $0x36c] ss:$16 sps:$4 sm:$0xff]  }
  0xbf   :  { %1800 = vmatpush1.bf16.msra.mxu0 %v3359_v62  ;;  %1887 = vmatprep.subr.bf16.mxu1 %v3370_v1  ;;  %v3451_v62 = vld [vmem:[#allocation5 + $0x764] ss:$16 sps:$4 sm:$0xff]   ;;  %v3452_v1 = vld [vmem:[#allocation5 + $0x368] ss:$16 sps:$4 sm:$0xff]  }
  0xc0   :  { %1801 = vmatprep.subr.bf16.mxu0 %v3367_v0  ;;  %v3449_v0 = vld [vmem:[#allocation5 + $0x760] ss:$16 sps:$4 sm:$0xff]  }
  0xc2   :  { %1888 = vmatpush1.bf16.msra.mxu1 %v3368_v3  ;;  %v3460_v3 = vld [vmem:[#allocation5 + $0x38c] ss:$16 sps:$4 sm:$0xff]  }
  0xc3   :  { %1802 = vmatpush1.bf16.msra.mxu0 %v3365_v2  ;;  %1889 = vmatprep.subr.bf16.mxu1 %v3376_v5  ;;  %v3457_v2 = vld [vmem:[#allocation5 + $0x784] ss:$16 sps:$4 sm:$0xff]   ;;  %v3458_v5 = vld [vmem:[#allocation5 + $0x388] ss:$16 sps:$4 sm:$0xff]  }
  0xc4   :  { %1803 = vmatprep.subr.bf16.mxu0 %v3373_v4  ;;  %v3455_v4 = vld [vmem:[#allocation5 + $0x780] ss:$16 sps:$4 sm:$0xff]  }
  0xc6   :  { %1890 = vmatpush1.bf16.msra.mxu1 %v3374_v7  ;;  %v3466_v7 = vld [vmem:[#allocation5 + $0x3ac] ss:$16 sps:$4 sm:$0xff]  }
  0xc7   :  { %1804 = vmatpush1.bf16.msra.mxu0 %v3371_v6  ;;  %1891 = vmatprep.subr.bf16.mxu1 %v3382_v11  ;;  %v3463_v6 = vld [vmem:[#allocation5 + $0x7a4] ss:$16 sps:$4 sm:$0xff]   ;;  %v3464_v11 = vld [vmem:[#allocation5 + $0x3a8] ss:$16 sps:$4 sm:$0xff]  }
  0xc8   :  { %1805 = vmatprep.subr.bf16.mxu0 %v3379_v10  ;;  %v3461_v10 = vld [vmem:[#allocation5 + $0x7a0] ss:$16 sps:$4 sm:$0xff]  }
  0xca   :  { %1892 = vmatpush1.bf16.msra.mxu1 %v3380_v13  ;;  %v3472_v13 = vld [vmem:[#allocation5 + $0x3cc] ss:$16 sps:$4 sm:$0xff]  }
  0xcb   :  { %1806 = vmatpush1.bf16.msra.mxu0 %v3377_v12  ;;  %1904 = vmatprep.subr.bf16.mxu1 %v3388_v15  ;;  %v3469_v12 = vld [vmem:[#allocation5 + $0x7c4] ss:$16 sps:$4 sm:$0xff]   ;;  %v3470_v15 = vld [vmem:[#allocation5 + $0x3c8] ss:$16 sps:$4 sm:$0xff]  }
  0xcc   :  { %1818 = vmatprep.subr.bf16.mxu0 %v3385_v14  ;;  %v3467_v14 = vld [vmem:[#allocation5 + $0x7c0] ss:$16 sps:$4 sm:$0xff]  }
  0xcd   :  { %1894 = vmatmul.mubr.bf16.vlgmr.msra.gmra.mrb[4].mxu1 %v3912_v8  ;;  %v3403_v8 = vld [vmem:[#allocation5 + $0x664] ss:$16 sps:$4 sm:$0xff]  }
  0xce   :  { %1808 = vmatmul.mubr.bf16.vlgmr.msra.gmra.mrb[0].mxu0 %v3929_v16  ;;  %1905 = vmatpush1.bf16.msra.mxu1 %v3386_v18  ;;  %v3478_v18 = vld [vmem:[#allocation5 + $0x3ec] ss:$16 sps:$4 sm:$0xff]  }
  0xcf   :  { %1819 = vmatpush1.bf16.msra.mxu0 %v3383_v17  ;;  %1906 = vmatprep.subr.bf16.mxu1 %v3394_v20  ;;  %v3475_v17 = vld [vmem:[#allocation5 + $0x7e4] ss:$16 sps:$4 sm:$0xff]   ;;  %v3476_v20 = vld [vmem:[#allocation5 + $0x3e8] ss:$16 sps:$4 sm:$0xff]  }
  0xd0   :  { %1820 = vmatprep.subr.bf16.mxu0 %v3391_v19  ;;  %1850 = vmatprep.mubr.bf16.mxu0 %v3939_v25  ;;  %v3473_v19 = vld [vmem:[#allocation5 + $0x7e0] ss:$16 sps:$4 sm:$0xff]  }
  0xd1   :  { %1936 = vmatprep.mubr.bf16.mxu1 %v3909_v55  ;;  %v3415_v55 = vld [vmem:[#allocation5 + $0x6a4] ss:$16 sps:$4 sm:$0xff]  }
  0xd2   :  { %1907 = vmatpush1.bf16.msra.mxu1 %v3392_v24  ;;  %v3479_v24 = vld [vmem:[#allocation5 + $0x408] ss:$16 sps:$4 sm:$0xff]  }
  0xd3   :  { %1821 = vmatpush1.bf16.msra.mxu0 %v3389_v23  ;;  %1908 = vmatprep.subr.bf16.mxu1 %v3400_v27  ;;  %v3481_v23 = vld [vmem:[#allocation5 + $0x40c] ss:$16 sps:$4 sm:$0xff]  }
  0xd4   :  { %1822 = vmatprep.subr.bf16.mxu0 %v3397_v26  ;;  %v3945_v26 = vcombine.low %v3931_v21, %v3933_v22  ;;  %v3484_v27 = vld [vmem:[#allocation5 + $0x42c] ss:$16 sps:$4 sm:$0xff]   ;;  %v3578_v21 = vld [vmem:[#allocation7 + $0x10] ss:$8 sps:$4 sm:$0xff]  }
  0xd5   :  { %v3583_v22 = vld [vmem:[#allocation7 + $0x24] ss:$8 sps:$4 sm:$0xff]  }
  0xd6   :  { %1909 = vmatpush1.bf16.msra.mxu1 %v3398_v29  ;;  %v3577_v29 = vld [vmem:[#allocation7 + $0x4] ss:$8 sps:$4 sm:$0xff]  }
  0xd7   :  { %1823 = vmatpush1.bf16.msra.mxu0 %v3395_v28  ;;  %1910 = vmatprep.subr.bf16.mxu1 %v3406_v30  ;;  %v3575_v28 = vld [vmem:[#allocation7] ss:$8 sps:$4 sm:$0xff]   ;;  %v3580_v30 = vld [vmem:[#allocation7 + $0x14] ss:$8 sps:$4 sm:$0xff]  }
  0xd8   :  { %1824 = vmatprep.subr.bf16.mxu0 %v3403_v8  ;;  %v3482_v8 = vld [vmem:[#allocation5 + $0x428] ss:$16 sps:$4 sm:$0xff]  }
  0xda   :  { %1911 = vmatpush1.bf16.msra.mxu1 %v3404_v32  ;;  %v3485_v32 = vld [vmem:[#allocation5 + $0x448] ss:$16 sps:$4 sm:$0xff]  }
  0xdb   :  { %1825 = vmatpush1.bf16.msra.mxu0 %v3401_v31  ;;  %1912 = vmatprep.subr.bf16.mxu1 %v3412_v34  ;;  %v3487_v31 = vld [vmem:[#allocation5 + $0x44c] ss:$16 sps:$4 sm:$0xff]   ;;  %v3488_v34 = vld [vmem:[#allocation5 + $0x468] ss:$16 sps:$4 sm:$0xff]  }
  0xdc   :  { %1826 = vmatprep.subr.bf16.mxu0 %v3409_v33  ;;  %v3490_v33 = vld [vmem:[#allocation5 + $0x46c] ss:$16 sps:$4 sm:$0xff]  }
  0xde   :  { %1913 = vmatpush1.bf16.msra.mxu1 %v3410_v36  ;;  %v3586_v36 = vld [vmem:[#allocation7 + $0x34] ss:$8 sps:$4 sm:$0xff]  }
  0xdf   :  { %1827 = vmatpush1.bf16.msra.mxu0 %v3407_v35  ;;  %1914 = vmatprep.subr.bf16.mxu1 %v3418_v37  ;;  %v3493_v35 = vld [vmem:[#allocation5 + $0x48c] ss:$16 sps:$4 sm:$0xff]   ;;  %v3491_v37 = vld [vmem:[#allocation5 + $0x488] ss:$16 sps:$4 sm:$0xff]  }
  0xe0   :  { %1828 = vmatprep.subr.bf16.mxu0 %v3415_v55  ;;  %v3589_v55 = vld [vmem:[#allocation7 + $0x44] ss:$8 sps:$4 sm:$0xff]  }
  0xe2   :  { %1915 = vmatpush1.bf16.msra.mxu1 %v3416_v40  ;;  %v3587_v40 = vld [vmem:[#allocation7 + $0x40] ss:$8 sps:$4 sm:$0xff]  }
  0xe3   :  { %1829 = vmatpush1.bf16.msra.mxu0 %v3413_v39  ;;  %1916 = vmatprep.subr.bf16.mxu1 %v3424_v42  ;;  %v3496_v39 = vld [vmem:[#allocation5 + $0x4ac] ss:$16 sps:$4 sm:$0xff]   ;;  %v3494_v42 = vld [vmem:[#allocation5 + $0x4a8] ss:$16 sps:$4 sm:$0xff]  }
  0xe4   :  { %1830 = vmatprep.subr.bf16.mxu0 %v3421_v41  ;;  %v3592_v41 = vld [vmem:[#allocation7 + $0x54] ss:$8 sps:$4 sm:$0xff]  }
  0xe6   :  { %1917 = vmatpush1.bf16.msra.mxu1 %v3422_v44  ;;  %v3590_v44 = vld [vmem:[#allocation7 + $0x50] ss:$8 sps:$4 sm:$0xff]  }
  0xe7   :  { %1831 = vmatpush1.bf16.msra.mxu0 %v3419_v43  ;;  %1918 = vmatprep.subr.bf16.mxu1 %v3430_v46  ;;  %v3499_v43 = vld [vmem:[#allocation5 + $0x4cc] ss:$16 sps:$4 sm:$0xff]   ;;  %v3497_v46 = vld [vmem:[#allocation5 + $0x4c8] ss:$16 sps:$4 sm:$0xff]  }
  0xe8   :  { %1832 = vmatprep.subr.bf16.mxu0 %v3427_v45  ;;  %v3595_v45 = vld [vmem:[#allocation7 + $0x64] ss:$8 sps:$4 sm:$0xff]  }
  0xea   :  { %1919 = vmatpush1.bf16.msra.mxu1 %v3428_v48  ;;  %v3593_v48 = vld [vmem:[#allocation7 + $0x60] ss:$8 sps:$4 sm:$0xff]  }
  0xeb   :  { %1833 = vmatpush1.bf16.msra.mxu0 %v3425_v47  ;;  %1920 = vmatprep.subr.bf16.mxu1 %v3436_v50  ;;  %v3502_v47 = vld [vmem:[#allocation5 + $0x4ec] ss:$16 sps:$4 sm:$0xff]   ;;  %v3500_v50 = vld [vmem:[#allocation5 + $0x4e8] ss:$16 sps:$4 sm:$0xff]  }
  0xec   :  { %1834 = vmatprep.subr.bf16.mxu0 %v3433_v49  ;;  %v3598_v49 = vld [vmem:[#allocation7 + $0x74] ss:$8 sps:$4 sm:$0xff]  }
  0xee   :  { %1921 = vmatpush1.bf16.msra.mxu1 %v3434_v52  ;;  %v3596_v52 = vld [vmem:[#allocation7 + $0x70] ss:$8 sps:$4 sm:$0xff]  }
  0xef   :  { %1835 = vmatpush1.bf16.msra.mxu0 %v3431_v51  ;;  %1922 = vmatprep.subr.bf16.mxu1 %v3442_v54  ;;  %v3505_v51 = vld [vmem:[#allocation5 + $0x50c] ss:$16 sps:$4 sm:$0xff]   ;;  %v3503_v54 = vld [vmem:[#allocation5 + $0x508] ss:$16 sps:$4 sm:$0xff]  }
  0xf0   :  { %1836 = vmatprep.subr.bf16.mxu0 %v3439_v53  ;;  %v3601_v53 = vld [vmem:[#allocation7 + $0x84] ss:$8 sps:$4 sm:$0xff]  }
  0xf2   :  { %1923 = vmatpush1.bf16.msra.mxu1 %v3440_v57  ;;  %v3599_v57 = vld [vmem:[#allocation7 + $0x80] ss:$8 sps:$4 sm:$0xff]  }
  0xf3   :  { %1837 = vmatpush1.bf16.msra.mxu0 %v3437_v56  ;;  %1924 = vmatprep.subr.bf16.mxu1 %v3448_v59  ;;  %v3508_v56 = vld [vmem:[#allocation5 + $0x52c] ss:$16 sps:$4 sm:$0xff]   ;;  %v3506_v59 = vld [vmem:[#allocation5 + $0x528] ss:$16 sps:$4 sm:$0xff]  }
  0xf4   :  { %1838 = vmatprep.subr.bf16.mxu0 %v3445_v58  ;;  %v3604_v58 = vld [vmem:[#allocation7 + $0x94] ss:$8 sps:$4 sm:$0xff]  }
  0xf6   :  { %1925 = vmatpush1.bf16.msra.mxu1 %v3446_v61  ;;  %v3602_v61 = vld [vmem:[#allocation7 + $0x90] ss:$8 sps:$4 sm:$0xff]  }
  0xf7   :  { %1839 = vmatpush1.bf16.msra.mxu0 %v3443_v60  ;;  %1926 = vmatprep.subr.bf16.mxu1 %v3454_v63  ;;  %v3511_v60 = vld [vmem:[#allocation5 + $0x54c] ss:$16 sps:$4 sm:$0xff]   ;;  %v3509_v63 = vld [vmem:[#allocation5 + $0x548] ss:$16 sps:$4 sm:$0xff]  }
  0xf8   :  { %1840 = vmatprep.subr.bf16.mxu0 %v3451_v62  ;;  %v3607_v62 = vld [vmem:[#allocation7 + $0xa4] ss:$8 sps:$4 sm:$0xff]  }
  0xfa   :  { %1927 = vmatpush1.bf16.msra.mxu1 %v3452_v1  ;;  %v3605_v1 = vld [vmem:[#allocation7 + $0xa0] ss:$8 sps:$4 sm:$0xff]  }
  0xfb   :  { %1841 = vmatpush1.bf16.msra.mxu0 %v3449_v0  ;;  %1928 = vmatprep.subr.bf16.mxu1 %v3460_v3  ;;  %v3514_v0 = vld [vmem:[#allocation5 + $0x56c] ss:$16 sps:$4 sm:$0xff]   ;;  %v3512_v3 = vld [vmem:[#allocation5 + $0x568] ss:$16 sps:$4 sm:$0xff]  }
  0xfc   :  { %1842 = vmatprep.subr.bf16.mxu0 %v3457_v2  ;;  %v3610_v2 = vld [vmem:[#allocation7 + $0xb4] ss:$8 sps:$4 sm:$0xff]  }
  0xfe   :  { %1929 = vmatpush1.bf16.msra.mxu1 %v3458_v5  ;;  %v3608_v5 = vld [vmem:[#allocation7 + $0xb0] ss:$8 sps:$4 sm:$0xff]  }
  0xff   :  { %1843 = vmatpush1.bf16.msra.mxu0 %v3455_v4  ;;  %1930 = vmatprep.subr.bf16.mxu1 %v3466_v7  ;;  %v3517_v4 = vld [vmem:[#allocation5 + $0x58c] ss:$16 sps:$4 sm:$0xff]   ;;  %v3515_v7 = vld [vmem:[#allocation5 + $0x588] ss:$16 sps:$4 sm:$0xff]  }
 0x100   :  { %1844 = vmatprep.subr.bf16.mxu0 %v3463_v6  ;;  %v3613_v6 = vld [vmem:[#allocation7 + $0xc4] ss:$8 sps:$4 sm:$0xff]  }
 0x102   :  { %1931 = vmatpush1.bf16.msra.mxu1 %v3464_v11  ;;  %v3611_v11 = vld [vmem:[#allocation7 + $0xc0] ss:$8 sps:$4 sm:$0xff]  }
 0x103   :  { %1845 = vmatpush1.bf16.msra.mxu0 %v3461_v10  ;;  %1932 = vmatprep.subr.bf16.mxu1 %v3472_v13  ;;  %v3520_v10 = vld [vmem:[#allocation5 + $0x5ac] ss:$16 sps:$4 sm:$0xff]  }
 0x104   :  { %1846 = vmatprep.subr.bf16.mxu0 %v3469_v12  ;;  %v3518_v12 = vld [vmem:[#allocation5 + $0x5a8] ss:$16 sps:$4 sm:$0xff]   ;;  %v3523_v13 = vld [vmem:[#allocation5 + $0x5cc] ss:$16 sps:$4 sm:$0xff]  }
 0x106   :  { %1933 = vmatpush1.bf16.msra.mxu1 %v3470_v15  ;;  %v3526_v15 = vld [vmem:[#allocation5 + $0x5ec] ss:$16 sps:$4 sm:$0xff]  }
 0x107   :  { %1847 = vmatpush1.bf16.msra.mxu0 %v3467_v14  ;;  %1934 = vmatprep.subr.bf16.mxu1 %v3478_v18  ;;  %v3521_v14 = vld [vmem:[#allocation5 + $0x5c8] ss:$16 sps:$4 sm:$0xff]   ;;  %v3529_v18 = vld [vmem:[#allocation5 + $0x60c] ss:$16 sps:$4 sm:$0xff]  }
 0x108   :  { %1848 = vmatprep.subr.bf16.mxu0 %v3475_v17  ;;  %v3524_v17 = vld [vmem:[#allocation5 + $0x5e8] ss:$16 sps:$4 sm:$0xff]  }
 0x10a   :  { %1935 = vmatpush1.bf16.msra.mxu1 %v3476_v20  ;;  %v3532_v20 = vld [vmem:[#allocation5 + $0x62c] ss:$16 sps:$4 sm:$0xff]  }
 0x10b   :  { %1849 = vmatpush1.bf16.msra.mxu0 %v3473_v19  ;;  %1947 = vmatprep.subr.bf16.mxu1 %v3481_v23  ;;  %v3527_v19 = vld [vmem:[#allocation5 + $0x608] ss:$16 sps:$4 sm:$0xff]  }
 0x10c   :  { %2457 = vmatprep.subr.bf16.mxu0 %v3577_v29  ;;  %v3530_v23 = vld [vmem:[#allocation5 + $0x628] ss:$16 sps:$4 sm:$0xff]  }
 0x10d   :  { %1937 = vmatmul.mubr.bf16.vlgmr.msra.gmra.mrb[4].mxu1 %v3914_v9  ;;  %v3581_v9 = vld [vmem:[#allocation7 + $0x20] ss:$8 sps:$4 sm:$0xff]  }
 0x10e   :  { %1851 = vmatmul.mubr.bf16.vlgmr.msra.gmra.mrb[0].mxu0 %v3945_v26  ;;  %1948 = vmatpush1.bf16.msra.mxu1 %v3479_v24  ;;  %v3535_v24 = vld [vmem:[#allocation5 + $0x64c] ss:$16 sps:$4 sm:$0xff]   ;;  %v3536_v29 = vld [vmem:[#allocation5 + $0x668] ss:$16 sps:$4 sm:$0xff]  }
 0x10f   :  { %1979 = vmatprep.mubr.bf16.mxu1 %v3924_v38  ;;  %1949 = vmatprep.subr.bf16.mxu1 %v3484_v27  ;;  %v3584_v38 = vld [vmem:[#allocation7 + $0x30] ss:$8 sps:$4 sm:$0xff]  }
 0x110   :  { %2458 = vmatpush1.bf16.msra.mxu0 %v3575_v28  ;;  %v3533_v27 = vld [vmem:[#allocation5 + $0x648] ss:$16 sps:$4 sm:$0xff]   ;;  %v3538_v28 = vld [vmem:[#allocation5 + $0x66c] ss:$16 sps:$4 sm:$0xff]  }
 0x111   :  { %2459 = vmatprep.subr.bf16.mxu0 %v3580_v30  ;;  %v3539_v30 = vld [vmem:[#allocation5 + $0x688] ss:$16 sps:$4 sm:$0xff]  }
 0x112   :  { %1950 = vmatpush1.bf16.msra.mxu1 %v3482_v8  ;;  %v3541_v8 = vld [vmem:[#allocation5 + $0x68c] ss:$16 sps:$4 sm:$0xff]  }
 0x113   :  { %1951 = vmatprep.subr.bf16.mxu1 %v3487_v31  ;;  %v3544_v31 = vld [vmem:[#allocation5 + $0x6ac] ss:$16 sps:$4 sm:$0xff]  }
 0x114   :  { %2460 = vmatpush1.bf16.msra.mxu0 %v3578_v21  ;;  %v3616_v21 = vld [vmem:[#allocation7 + $0xd4] ss:$8 sps:$4 sm:$0xff]  }
 0x115   :  { %2461 = vmatprep.subr.bf16.mxu0 %v3583_v22  ;;  %v3547_v22 = vld [vmem:[#allocation5 + $0x6cc] ss:$16 sps:$4 sm:$0xff]  }
 0x116   :  { %1952 = vmatpush1.bf16.msra.mxu1 %v3485_v32 }
 0x117   :  { %1953 = vmatprep.subr.bf16.mxu1 %v3490_v33 }
 0x118   :  { %2462 = vmatpush1.bf16.msra.mxu0 %v3581_v9  ;;  %v3545_v9 = vld [vmem:[#allocation5 + $0x6c8] ss:$16 sps:$4 sm:$0xff]  }
 0x119   :  { %2463 = vmatprep.subr.bf16.mxu0 %v3586_v36 }
 0x11a   :  { %1954 = vmatpush1.bf16.msra.mxu1 %v3488_v34 }
 0x11b   :  { %1955 = vmatprep.subr.bf16.mxu1 %v3493_v35  ;;  %v3619_v35 = vld [vmem:[#allocation7 + $0xe4] ss:$8 sps:$4 sm:$0xff]  }
 0x11c   :  { %2464 = vmatpush1.bf16.msra.mxu0 %v3584_v38  ;;  %v3550_v38 = vld [vmem:[#allocation5 + $0x6ec] ss:$16 sps:$4 sm:$0xff]  }
 0x11d   :  { %2465 = vmatprep.subr.bf16.mxu0 %v3589_v55  ;;  %v3617_v55 = vld [vmem:[#allocation7 + $0xe0] ss:$8 sps:$4 sm:$0xff]  }
 0x11e   :  { %1956 = vmatpush1.bf16.msra.mxu1 %v3491_v37  ;;  %v3548_v37 = vld [vmem:[#allocation5 + $0x6e8] ss:$16 sps:$4 sm:$0xff]  }
 0x11f   :  { %1957 = vmatprep.subr.bf16.mxu1 %v3496_v39  ;;  %v3622_v39 = vld [vmem:[#allocation7 + $0xf4] ss:$8 sps:$4 sm:$0xff]  }
 0x120   :  { %2466 = vmatpush1.bf16.msra.mxu0 %v3587_v40  ;;  %v3553_v40 = vld [vmem:[#allocation5 + $0x70c] ss:$16 sps:$4 sm:$0xff]  }
 0x121   :  { %2467 = vmatprep.subr.bf16.mxu0 %v3592_v41  ;;  %v3620_v41 = vld [vmem:[#allocation7 + $0xf0] ss:$8 sps:$4 sm:$0xff]  }
 0x122   :  { %1958 = vmatpush1.bf16.msra.mxu1 %v3494_v42  ;;  %v3551_v42 = vld [vmem:[#allocation5 + $0x708] ss:$16 sps:$4 sm:$0xff]  }
 0x123   :  { %1959 = vmatprep.subr.bf16.mxu1 %v3499_v43  ;;  %v3556_v43 = vld [vmem:[#allocation5 + $0x72c] ss:$16 sps:$4 sm:$0xff]  }
 0x124   :  { %2468 = vmatpush1.bf16.msra.mxu0 %v3590_v44  ;;  %v3625_v44 = vld [vmem:[#allocation7 + $0x104] ss:$8 sps:$4 sm:$0xff]  }
 0x125   :  { %2469 = vmatprep.subr.bf16.mxu0 %v3595_v45  ;;  %v3554_v45 = vld [vmem:[#allocation5 + $0x728] ss:$16 sps:$4 sm:$0xff]  }
 0x126   :  { %1960 = vmatpush1.bf16.msra.mxu1 %v3497_v46  ;;  %v3559_v46 = vld [vmem:[#allocation5 + $0x74c] ss:$16 sps:$4 sm:$0xff]  }
 0x127   :  { %1961 = vmatprep.subr.bf16.mxu1 %v3502_v47  ;;  %v3557_v47 = vld [vmem:[#allocation5 + $0x748] ss:$16 sps:$4 sm:$0xff]  }
 0x128   :  { %2470 = vmatpush1.bf16.msra.mxu0 %v3593_v48  ;;  %v3562_v48 = vld [vmem:[#allocation5 + $0x76c] ss:$16 sps:$4 sm:$0xff]  }
 0x129   :  { %2471 = vmatprep.subr.bf16.mxu0 %v3598_v49  ;;  %v3560_v49 = vld [vmem:[#allocation5 + $0x768] ss:$16 sps:$4 sm:$0xff]  }
 0x12a   :  { %1962 = vmatpush1.bf16.msra.mxu1 %v3500_v50  ;;  %v3565_v50 = vld [vmem:[#allocation5 + $0x78c] ss:$16 sps:$4 sm:$0xff]  }
 0x12b   :  { %1963 = vmatprep.subr.bf16.mxu1 %v3505_v51  ;;  %v3563_v51 = vld [vmem:[#allocation5 + $0x788] ss:$16 sps:$4 sm:$0xff]  }
 0x12c   :  { %2472 = vmatpush1.bf16.msra.mxu0 %v3596_v52  ;;  %v3568_v52 = vld [vmem:[#allocation5 + $0x7ac] ss:$16 sps:$4 sm:$0xff]  }
 0x12d   :  { %2473 = vmatprep.subr.bf16.mxu0 %v3601_v53  ;;  %v3566_v53 = vld [vmem:[#allocation5 + $0x7a8] ss:$16 sps:$4 sm:$0xff]  }
 0x12e   :  { %1964 = vmatpush1.bf16.msra.mxu1 %v3503_v54  ;;  %v3571_v54 = vld [vmem:[#allocation5 + $0x7cc] ss:$16 sps:$4 sm:$0xff]  }
 0x12f   :  { %1965 = vmatprep.subr.bf16.mxu1 %v3508_v56  ;;  %v3569_v56 = vld [vmem:[#allocation5 + $0x7c8] ss:$16 sps:$4 sm:$0xff]  }
 0x130   :  { %2474 = vmatpush1.bf16.msra.mxu0 %v3599_v57  ;;  %v3574_v57 = vld [vmem:[#allocation5 + $0x7ec] ss:$16 sps:$4 sm:$0xff]  }
 0x131   :  { %2475 = vmatprep.subr.bf16.mxu0 %v3604_v58  ;;  %v3572_v58 = vld [vmem:[#allocation5 + $0x7e8] ss:$16 sps:$4 sm:$0xff]  }
 0x132   :  { %1966 = vmatpush1.bf16.msra.mxu1 %v3506_v59  ;;  %v349_v59 = vlaneseq }
 0x133   :  { %1967 = vmatprep.subr.bf16.mxu1 %v3511_v60 }
 0x134   :  { %2476 = vmatpush1.bf16.msra.mxu0 %v3602_v61  ;;  %v3959_v60 = vshrl.u32 %v349_v59, 7  ;;  %v3664_v59 = vld [vmem:[#allocation7 + $0x1d4] ss:$8 sps:$4 sm:$0xff]  }
 0x135   :  { %2477 = vmatprep.subr.bf16.mxu0 %v3607_v62  ;;  %v3965_v62 = vld [vmem:[%s4008_s2] sm:$0xf] }
 0x136   :  { %1968 = vmatpush1.bf16.msra.mxu1 %v3509_v63  ;;  %v351_v61 = vsub.s32 0, %v3959_v60  ;;  %v355_v63 = vsub.s32 1, %v3959_v60 }
 0x137   :  { %1969 = vmatprep.subr.bf16.mxu1 %v3514_v0 }
 0x138   :  { %2478 = vmatpush1.bf16.msra.mxu0 %v3605_v1  ;;  %v352_v0 = vrot.slane %v3965_v62, %v351_v61 }
 0x139   :  { %2479 = vmatprep.subr.bf16.mxu0 %v3610_v2 }
 0x13a   :  { %1970 = vmatpush1.bf16.msra.mxu1 %v3512_v3 }
 0x13b   :  { %1971 = vmatprep.subr.bf16.mxu1 %v3517_v4 }
 0x13c   :  { %2480 = vmatpush1.bf16.msra.mxu0 %v3608_v5 }
 0x13d   :  { %2481 = vmatprep.subr.bf16.mxu0 %v3613_v6 }
 0x13e   :  { %1972 = vmatpush1.bf16.msra.mxu1 %v3515_v7 }
 0x13f   :  { %1973 = vmatprep.subr.bf16.mxu1 %v3520_v10 }
 0x140   :  { %2482 = vmatpush1.bf16.msra.mxu0 %v3611_v11 }
 0x141   :  { %2483 = vmatprep.subr.bf16.mxu0 %v3616_v21  ;;  %v3673_v21 = vld [vmem:[#allocation8 + $0x48] sm:$0xff]  }
 0x142   :  { %1974 = vmatpush1.bf16.msra.mxu1 %v3518_v12 }
 0x143   :  { %1975 = vmatprep.subr.bf16.mxu1 %v3523_v13 }
 0x146   :  { %1976 = vmatpush1.bf16.msra.mxu1 %v3521_v14 }
 0x147   :  { %1977 = vmatprep.subr.bf16.mxu1 %v3526_v15 }
 0x14a   :  { %1978 = vmatpush1.bf16.msra.mxu1 %v3524_v17 }
 0x14b   :  { %1990 = vmatprep.subr.bf16.mxu1 %v3529_v18 }
 0x14d   :  { %1980 = vmatmul.mubr.bf16.vlgmr.msra.gmra.mrb[4].mxu1 %v3929_v16  ;;  %v3542_v16 = vld [vmem:[#allocation5 + $0x6a8] ss:$16 sps:$4 sm:$0xff]  }
 0x14e   :  { %1991 = vmatpush1.bf16.msra.mxu1 %v3527_v19  ;;  %2022 = vmatprep.mubr.bf16.mxu1 %v3939_v25  ;;  %v3614_v25 = vld [vmem:[#allocation7 + $0xd0] ss:$8 sps:$4 sm:$0xff]  }
 0x14f   :  { %1992 = vmatprep.subr.bf16.mxu1 %v3532_v20  ;;  %2484 = vmatpush1.bf16.msra.mxu0 %v3614_v25  ;;  %v3631_v25 = vld [vmem:[#allocation7 + $0x124] ss:$8 sps:$4 sm:$0xff]  }
 0x150   :  { %2485 = vmatprep.subr.bf16.mxu0 %v3619_v35  ;;  %v3676_v35 = vld [vmem:[#allocation8 + $0x10] sm:$0xff]  }
 0x152   :  { %1993 = vmatpush1.bf16.msra.mxu1 %v3530_v23 }
 0x153   :  { %1994 = vmatprep.subr.bf16.mxu1 %v3535_v24  ;;  %2486 = vmatpush1.bf16.msra.mxu0 %v3617_v55  ;;  %v3637_v55 = vld [vmem:[#allocation7 + $0x144] ss:$8 sps:$4 sm:$0xff]  }
 0x154   :  { %2487 = vmatprep.subr.bf16.mxu0 %v3622_v39  ;;  %v3679_v39 = vld [vmem:[#allocation8 + $0x60] sm:$0xff]  }
 0x156   :  { %1995 = vmatpush1.bf16.msra.mxu1 %v3533_v27 }
 0x157   :  { %1996 = vmatprep.subr.bf16.mxu1 %v3538_v28  ;;  %2488 = vmatpush1.bf16.msra.mxu0 %v3620_v41  ;;  %v3640_v41 = vld [vmem:[#allocation7 + $0x154] ss:$8 sps:$4 sm:$0xff]  }
 0x158   :  { %2500 = vmatprep.subr.bf16.mxu0 %v3625_v44  ;;  %v3643_v44 = vld [vmem:[#allocation7 + $0x164] ss:$8 sps:$4 sm:$0xff]  }
 0x15a   :  { %1997 = vmatpush1.bf16.msra.mxu1 %v3536_v29 }
 0x15b   :  { %1998 = vmatprep.subr.bf16.mxu1 %v3541_v8  ;;  %v3623_v8 = vld [vmem:[#allocation7 + $0x100] ss:$8 sps:$4 sm:$0xff]  }
 0x15e   :  { %1999 = vmatpush1.bf16.msra.mxu1 %v3539_v30  ;;  %v3628_v30 = vld [vmem:[#allocation7 + $0x114] ss:$8 sps:$4 sm:$0xff]  }
 0x15f   :  { %2000 = vmatprep.subr.bf16.mxu1 %v3544_v31  ;;  %v3671_v31 = vld [vmem:[#allocation8 + $0x40] sm:$0xff]  }
 0x160   :  { %v3952_v32 = vpop.f32.mrb[0].mxu1 }
 0x161   :  { %v3954_v33 = vpop.f32.mrb[1].mxu1  ;;  %v1724_v1 = vadd.f32 %v3952_v32, %v352_v0  ;;  %v3674_v32 = vld [vmem:[#allocation8 + $0x8] sm:$0xff]  }
 0x162   :  { %v3956_v34 = vpop.f32.mrb[2].mxu1  ;;  %2001 = vmatpush1.bf16.msra.mxu1 %v3542_v16  ;;  %v3672_v16 = vld [vmem:[#allocation8] sm:$0xff]  }
 0x163   :  { %v1729_v36 = vpop.f32.mrb[3].mxu1  ;;  %2002 = vmatprep.subr.bf16.mxu1 %v3547_v22  ;;  %v1728_v4 = vadd.f32 %v3956_v34, %v352_v0  ;;  %v3626_v22 = vld [vmem:[#allocation7 + $0x110] ss:$8 sps:$4 sm:$0xff]   ;;  %v3629_v34 = vld [vmem:[#allocation7 + $0x120] ss:$8 sps:$4 sm:$0xff]  }
 0x164   :  { %v3662_v0 = vld [vmem:[#allocation7 + $0x1d0] ss:$8 sps:$4 sm:$0xff]  }
 0x166   :  { %2003 = vmatpush1.bf16.msra.mxu1 %v3545_v9  ;;  %v3634_v9 = vld [vmem:[#allocation7 + $0x134] ss:$8 sps:$4 sm:$0xff]  }
 0x167   :  { %2004 = vmatprep.subr.bf16.mxu1 %v3550_v38  ;;  %v3632_v38 = vld [vmem:[#allocation7 + $0x130] ss:$8 sps:$4 sm:$0xff]  }
 0x16a   :  { %2005 = vmatpush1.bf16.msra.mxu1 %v3548_v37  ;;  %v3678_v37 = vld [vmem:[#allocation8 + $0x18] sm:$0xff]  }
 0x16b   :  { %2006 = vmatprep.subr.bf16.mxu1 %v3553_v40  ;;  %v3635_v40 = vld [vmem:[#allocation7 + $0x140] ss:$8 sps:$4 sm:$0xff]  }
 0x16e   :  { %2007 = vmatpush1.bf16.msra.mxu1 %v3551_v42  ;;  %v3680_v42 = vld [vmem:[#allocation8 + $0x20] sm:$0xff]  }
 0x16f   :  { %2008 = vmatprep.subr.bf16.mxu1 %v3556_v43  ;;  %v3638_v43 = vld [vmem:[#allocation7 + $0x150] ss:$8 sps:$4 sm:$0xff]  }
 0x172   :  { %2009 = vmatpush1.bf16.msra.mxu1 %v3554_v45  ;;  %v3641_v45 = vld [vmem:[#allocation7 + $0x160] ss:$8 sps:$4 sm:$0xff]  }
 0x173   :  { %2010 = vmatprep.subr.bf16.mxu1 %v3559_v46  ;;  %v3646_v46 = vld [vmem:[#allocation7 + $0x174] ss:$8 sps:$4 sm:$0xff]  }
 0x176   :  { %2011 = vmatpush1.bf16.msra.mxu1 %v3557_v47  ;;  %v3644_v47 = vld [vmem:[#allocation7 + $0x170] ss:$8 sps:$4 sm:$0xff]  }
 0x177   :  { %2012 = vmatprep.subr.bf16.mxu1 %v3562_v48  ;;  %v3649_v48 = vld [vmem:[#allocation7 + $0x184] ss:$8 sps:$4 sm:$0xff]  }
 0x17a   :  { %2013 = vmatpush1.bf16.msra.mxu1 %v3560_v49  ;;  %v3647_v49 = vld [vmem:[#allocation7 + $0x180] ss:$8 sps:$4 sm:$0xff]  }
 0x17b   :  { %2014 = vmatprep.subr.bf16.mxu1 %v3565_v50  ;;  %v3652_v50 = vld [vmem:[#allocation7 + $0x194] ss:$8 sps:$4 sm:$0xff]  }
 0x17e   :  { %2015 = vmatpush1.bf16.msra.mxu1 %v3563_v51  ;;  %v3650_v51 = vld [vmem:[#allocation7 + $0x190] ss:$8 sps:$4 sm:$0xff]  }
 0x17f   :  { %2016 = vmatprep.subr.bf16.mxu1 %v3568_v52  ;;  %v3655_v52 = vld [vmem:[#allocation7 + $0x1a4] ss:$8 sps:$4 sm:$0xff]  }
 0x182   :  { %2017 = vmatpush1.bf16.msra.mxu1 %v3566_v53  ;;  %v3653_v53 = vld [vmem:[#allocation7 + $0x1a0] ss:$8 sps:$4 sm:$0xff]  }
 0x183   :  { %2018 = vmatprep.subr.bf16.mxu1 %v3571_v54  ;;  %v3658_v54 = vld [vmem:[#allocation7 + $0x1b4] ss:$8 sps:$4 sm:$0xff]  }
 0x186   :  { %2019 = vmatpush1.bf16.msra.mxu1 %v3569_v56  ;;  %v3656_v56 = vld [vmem:[#allocation7 + $0x1b0] ss:$8 sps:$4 sm:$0xff]  }
 0x187   :  { %2020 = vmatprep.subr.bf16.mxu1 %v3574_v57  ;;  %v3661_v57 = vld [vmem:[#allocation7 + $0x1c4] ss:$8 sps:$4 sm:$0xff]  }
 0x18a   :  { %2021 = vmatpush1.bf16.msra.mxu1 %v3572_v58  ;;  %v3659_v58 = vld [vmem:[#allocation7 + $0x1c0] ss:$8 sps:$4 sm:$0xff]  }
 0x18b   :  { %3116 = vmatprep.subr.bf16.mxu1 %v3671_v31  ;;  %v3681_v31 = vld [vmem:[#allocation8 + $0x68] sm:$0xff]  }
 0x18d   :  { %2023 = vmatmul.mubr.bf16.vlgmr.msra.gmra.mrb[4].mxu1 %v3945_v26  ;;  %v356_v26 = vrot.slane %v3965_v62, %v355_v63 }
 0x18e   :  { %3117 = vmatpush3.bf16.msra.mxu1 %v3672_v16  ;;  %v3682_v16 = vld [vmem:[#allocation8 + $0x28] sm:$0xff]  }
 0x18f   :  { %v1726_v2 = vadd.f32 %v3954_v33, %v356_v26  ;;  %v1730_v7 = vadd.f32 %v1729_v36, %v356_v26  ;;  %3118 = vmatprep.subr.bf16.mxu1 %v3673_v21  ;;  %v3675_v33 = vld [vmem:[#allocation8 + $0x50] sm:$0xff]   ;;  %v3677_v36 = vld [vmem:[#allocation8 + $0x58] sm:$0xff]   ;;  %v3667_v26 = vld [vmem:[#allocation7 + $0x1e4] ss:$8 sps:$4 sm:$0xff]  }
 0x190   :  { %v3683_v21 = vld [vmem:[#allocation8 + $0x70] sm:$0xff]  }
 0x192   :  { %3119 = vmatpush3.bf16.msra.mxu1 %v3674_v32  ;;  %v3686_v32 = vld [vmem:[#allocation8 + $0x38] sm:$0xff]  }
 0x193   :  { %3120 = vmatprep.subr.bf16.mxu1 %v3675_v33  ;;  %v2125_v33 = vld [vmem:[%s4010_s4] sm:$0x3] }
 0x196   :  { %3121 = vmatpush3.bf16.msra.mxu1 %v3676_v35 }
 0x197   :  { %3122 = vmatprep.subr.bf16.mxu1 %v3677_v36 }
 0x19a   :  { %3123 = vmatpush3.bf16.msra.mxu1 %v3678_v37 }
 0x19b   :  { %3124 = vmatprep.subr.bf16.mxu1 %v3679_v39 }
 0x19e   :  { %3125 = vmatpush3.bf16.msra.mxu1 %v3680_v42 }
 0x19f   :  { %3126 = vmatprep.subr.bf16.mxu1 %v3681_v31 }
 0x1a2   :  { %3127 = vmatpush3.bf16.msra.mxu1 %v3682_v16 }
 0x1a3   :  { %3128 = vmatprep.subr.bf16.mxu1 %v3683_v21 }
 0x1e1   :  { %v1852_v3 = vpop.f32.mrb[0].mxu0 }
 0x1e2   :  { %v3139_v5 = vadd.f32 %v1852_v3, %v1724_v1  ;;  %v1854_v6 = vpop.f32.mrb[1].mxu0  ;;  %v3665_v1 = vld [vmem:[#allocation7 + $0x1e0] ss:$8 sps:$4 sm:$0xff]   ;;  %v3668_v3 = vld [vmem:[#allocation7 + $0x1f0] ss:$8 sps:$4 sm:$0xff]  }
 0x1e3   :  { %v3141_v10 = vadd.f32 %v1854_v6, %v1726_v2  ;;  %v1856_v11 = vpop.f32.mrb[2].mxu0  ;;  %v3670_v2 = vld [vmem:[#allocation7 + $0x1f4] ss:$8 sps:$4 sm:$0xff]  }
 0x1e4   :  { %v2041_v12 = vmul.f32 0.2, %v3139_v5  ;;  %v3143_v13 = vadd.f32 %v1856_v11, %v1728_v4  ;;  %v1858_v14 = vpop.f32.mrb[3].mxu0  ;;  %vm2033_vm0 = vcmp.gt.f32.partialorder %v3139_v5, 0.0  ;;  %v359_v4 = vsub.s32 2, %v3959_v60 }
 0x1e5   :  { %v2042_v15 = vmul.f32 0.2, %v3141_v10  ;;  %v3145_v17 = vadd.f32 %v1858_v14, %v1730_v7  ;;  %vm2034_vm1 = vcmp.gt.f32.partialorder %v3141_v10, 0.0 }
 0x1e6   :  { %vm2037_vm2 = vcmp.gt.f32.partialorder %v3143_v13, 0.0  ;;  %v2045_v18 = vmul.f32 0.2, %v3143_v13  ;;  %v2049_v20 = vsel %vm2033_vm0, %v3139_v5, %v2041_v12  ;;  %v363_v5 = vsub.s32 3, %v3959_v60 }
 0x1e7   :  { %vm2038_vm3 = vcmp.gt.f32.partialorder %v3145_v17, 0.0  ;;  %v2046_v19 = vmul.f32 0.2, %v3145_v17  ;;  %v2050_v27 = vsel %vm2034_vm1, %v3141_v10, %v2042_v15  ;;  %v360_v6 = vrot.slane %v3965_v62, %v359_v4 }
 0x1e8   :  { %v2053_v23 = vsel %vm2037_vm2, %v3143_v13, %v2045_v18  ;;  %v364_v7 = vrot.slane %v3965_v62, %v363_v5 }
 0x1e9   :  { %v2057_v24 = vpack.c.bf16 %v2053_v23, %v2049_v20  ;;  %v2054_v28 = vsel %vm2038_vm3, %v3145_v17, %v2046_v19 }
 0x1ea   :  { %v2058_v29 = vpack.c.bf16 %v2054_v28, %v2050_v27 }
 0x1ec   :  { %2489 = vmatprep.mubr.bf16.mxu0 %v2058_v29 }
 0x1ed   :  { %2490 = vmatmul.mubr.bf16.vlgmr.msra.gmra.mrb[4].mxu0 %v2057_v24 }
 0x1ee   :  { %2501 = vmatpush1.bf16.msra.mxu0 %v3623_v8 }
 0x1ef   :  { %2502 = vmatprep.subr.bf16.mxu0 %v3628_v30 }
 0x1f2   :  { %2503 = vmatpush1.bf16.msra.mxu0 %v3626_v22  ;;  %v3684_v22 = vld [vmem:[#allocation8 + $0x30] sm:$0xff]  }
 0x1f3   :  { %2504 = vmatprep.subr.bf16.mxu0 %v3631_v25  ;;  %3129 = vmatpush3.bf16.msra.mxu1 %v3684_v22  ;;  %v3685_v25 = vld [vmem:[#allocation8 + $0x78] sm:$0xff]  }
 0x1f4   :  { %3130 = vmatprep.subr.bf16.mxu1 %v3685_v25 }
 0x1f6   :  { %2505 = vmatpush1.bf16.msra.mxu0 %v3629_v34  ;;  %v2130_v34 = vrot.slane %v2125_v33, %v351_v61 }
 0x1f7   :  { %2506 = vmatprep.subr.bf16.mxu0 %v3634_v9  ;;  %3131 = vmatpush3.bf16.msra.mxu1 %v3686_v32  ;;  %v2134_v9 = vrot.slane %v2125_v33, %v355_v63 }
 0x1fa   :  { %2507 = vmatpush1.bf16.msra.mxu0 %v3632_v38 }
 0x1fb   :  { %2508 = vmatprep.subr.bf16.mxu0 %v3637_v55 }
 0x1fe   :  { %2509 = vmatpush1.bf16.msra.mxu0 %v3635_v40 }
 0x1ff   :  { %2510 = vmatprep.subr.bf16.mxu0 %v3640_v41 }
 0x202   :  { %2511 = vmatpush1.bf16.msra.mxu0 %v3638_v43 }
 0x203   :  { %2512 = vmatprep.subr.bf16.mxu0 %v3643_v44 }
 0x206   :  { %2513 = vmatpush1.bf16.msra.mxu0 %v3641_v45 }
 0x207   :  { %2514 = vmatprep.subr.bf16.mxu0 %v3646_v46 }
 0x20a   :  { %2515 = vmatpush1.bf16.msra.mxu0 %v3644_v47 }
 0x20b   :  { %2516 = vmatprep.subr.bf16.mxu0 %v3649_v48 }
 0x20e   :  { %2517 = vmatpush1.bf16.msra.mxu0 %v3647_v49 }
 0x20f   :  { %2518 = vmatprep.subr.bf16.mxu0 %v3652_v50 }
 0x212   :  { %2519 = vmatpush1.bf16.msra.mxu0 %v3650_v51 }
 0x213   :  { %2520 = vmatprep.subr.bf16.mxu0 %v3655_v52 }
 0x216   :  { %2521 = vmatpush1.bf16.msra.mxu0 %v3653_v53  ;;  %v3090_v53 = vld [vmem:[%s4012_s6] ss:$0 sm:$0xff] }
 0x217   :  { %2522 = vmatprep.subr.bf16.mxu0 %v3658_v54 }
 0x21a   :  { %2523 = vmatpush1.bf16.msra.mxu0 %v3656_v56 }
 0x21b   :  { %2524 = vmatprep.subr.bf16.mxu0 %v3661_v57 }
 0x21e   :  { %2525 = vmatpush1.bf16.msra.mxu0 %v3659_v58 }
 0x21f   :  { %2526 = vmatprep.subr.bf16.mxu0 %v3664_v59 }
 0x222   :  { %2527 = vmatpush1.bf16.msra.mxu0 %v3662_v0 }
 0x223   :  { %2528 = vmatprep.subr.bf16.mxu0 %v3667_v26 }
 0x226   :  { %2529 = vmatpush1.bf16.msra.mxu0 %v3665_v1 }
 0x227   :  { %2530 = vmatprep.subr.bf16.mxu0 %v3670_v2 }
 0x22a   :  { %2531 = vmatpush1.bf16.msra.mxu0 %v3668_v3 }
 0x260   :  { %v2024_v10 = vpop.f32.mrb[4].mxu1 }
 0x261   :  { %v3146_v11 = vadd.f32 %v2024_v10, %v360_v6  ;;  %v2026_v12 = vpop.f32.mrb[5].mxu1 }
 0x262   :  { %v3147_v13 = vadd.f32 %v2026_v12, %v364_v7  ;;  %v2028_v14 = vpop.f32.mrb[6].mxu1 }
 0x263   :  { %v2043_v15 = vmul.f32 0.2, %v3146_v11  ;;  %v3148_v17 = vadd.f32 %v2028_v14, %v360_v6  ;;  %v2030_v18 = vpop.f32.mrb[7].mxu1  ;;  %vm2035_vm4 = vcmp.gt.f32.partialorder %v3146_v11, 0.0 }
 0x264   :  { %v2044_v19 = vmul.f32 0.2, %v3147_v13  ;;  %v3149_v20 = vadd.f32 %v2030_v18, %v364_v7  ;;  %vm2036_vm5 = vcmp.gt.f32.partialorder %v3147_v13, 0.0 }
 0x265   :  { %vm2039_vm6 = vcmp.gt.f32.partialorder %v3148_v17, 0.0  ;;  %v2047_v23 = vmul.f32 0.2, %v3148_v17  ;;  %v2051_v27 = vsel %vm2035_vm4, %v3146_v11, %v2043_v15 }
 0x266   :  { %vm2040_vm7 = vcmp.gt.f32.partialorder %v3149_v20, 0.0  ;;  %v2048_v24 = vmul.f32 0.2, %v3149_v20  ;;  %v2052_v62 = vsel %vm2036_vm5, %v3147_v13, %v2044_v19 }
 0x267   :  { %v2055_v28 = vsel %vm2039_vm6, %v3148_v17, %v2047_v23 }
 0x268   :  { %v2059_v29 = vpack.c.bf16 %v2055_v28, %v2051_v27  ;;  %v2056_v8 = vsel %vm2040_vm7, %v3149_v20, %v2048_v24 }
 0x269   :  { %v2060_v30 = vpack.c.bf16 %v2056_v8, %v2052_v62 }
 0x26b   :  { %2532 = vmatprep.mubr.bf16.mxu0 %v2060_v30 }
 0x26c   :  { %2533 = vmatmul.mubr.bf16.vlgmr.msra.gmra.mrb[4].mxu0 %v2059_v29 }
 0x33f   :  { %v2534_v35 = vpop.f32.mrb[4].mxu0 }
 0x340   :  { %v3150_v36 = vadd.f32 %v2534_v35, %v2130_v34  ;;  %v2536_v38 = vpop.f32.mrb[5].mxu0 }
 0x341   :  { %v3151_v55 = vadd.f32 %v2536_v38, %v2134_v9  ;;  %v2538_v37 = vpop.f32.mrb[6].mxu0 }
 0x342   :  { %v2547_v39 = vmul.f32 0.2, %v3150_v36  ;;  %v3152_v40 = vadd.f32 %v2538_v37, %v2130_v34  ;;  %v2540_v41 = vpop.f32.mrb[7].mxu0  ;;  %vm2543_vm8 = vcmp.gt.f32.partialorder %v3150_v36, 0.0 }
 0x343   :  { %v2548_v42 = vmul.f32 0.2, %v3151_v55  ;;  %v3153_v43 = vadd.f32 %v2540_v41, %v2134_v9  ;;  %vm2544_vm9 = vcmp.gt.f32.partialorder %v3151_v55, 0.0 }
 0x344   :  { %vm2545_vm10 = vcmp.gt.f32.partialorder %v3152_v40, 0.0  ;;  %v2549_v44 = vmul.f32 0.2, %v3152_v40  ;;  %v2551_v61 = vsel %vm2543_vm8, %v3150_v36, %v2547_v39 }
 0x345   :  { %vm2546_vm11 = vcmp.gt.f32.partialorder %v3153_v43, 0.0  ;;  %v2550_v45 = vmul.f32 0.2, %v3153_v43  ;;  %v2552_v63 = vsel %vm2544_vm9, %v3151_v55, %v2548_v42 }
 0x346   :  { %v2553_v46 = vsel %vm2545_vm10, %v3152_v40, %v2549_v44 }
 0x347   :  { %v2555_v60 = vpack.c.bf16 %v2553_v46, %v2551_v61  ;;  %v2554_v47 = vsel %vm2546_vm11, %v3153_v43, %v2550_v45 }
 0x348   :  { %v2556_v48 = vpack.c.bf16 %v2554_v47, %v2552_v63 }
 0x34a   :  { %2724 = vmatprep.mubr.bf16.mxu1 %v2556_v48 }
 0x34b   :  { %2725 = vmatmul.mubr.bf16.vlgmr.msra.gmra.mrb[8].mxu1 %v2555_v60 }
 0x41e   :  { %v3132_v49 = vpop.f32.mrb[8].mxu1 }
 0x41f   :  { %v3133_v50 = vpop.f32.mrb[9].mxu1 }
 0x420   :  { %v3134_v51 = vadd.f32 %v3133_v50, %v3132_v49  ;;  %v3135_v52 = vpop.f32.mrb[10].mxu1 }
 0x421   :  { %v3136_v54 = vpop.f32.mrb[11].mxu1 }
 0x422   :  { %v3137_v56 = vadd.f32 %v3136_v54, %v3135_v52  ;;  %v2727_v57 = vadd.f32 %v3134_v51, %v3090_v53 }
 0x424   :  { %v2730_v58 = vadd.f32 %v3137_v56, %v3090_v53 }
 0x426   :  { %v3114_v59 = vpack.c.bf16 %v2730_v58, %v2727_v57 }
 0x428   :  { %3115 = vst [vmem:[#allocation10] sm:$0xff] %v3114_v59  }
 0x429   :  { %3786 = shalt.err (!%p3783_p8)
}
 0x42a   :  { %s3787_s6 = scalar_lea.hbm %s4013_s7, 128 }
 0x42b   :  { %p3788_p9 = scmp.ne.s32.totalorder %s4013_s7, %s3787_s6  ;;  %p3791_p10 = scmp.lt.u32.totalorder %s3787_s6, %s4013_s7 }
 0x42d   :  { %p3793_p11 = pnand %p3791_p10, %p3788_p9 }
 0x42f   :  { %3796 = shalt.err (!%p3793_p11)
}
 0x430   :  { %2754 = dma.vmem_to_hbm [thread:$0]  %s2749_s11, 128, %s4013_s7, [#allocation4], %s3815_s3, %s3815_s3, %s3816_s27  }
 0x431   :  { %3803 = dma.done.wait [#allocation4], 128  }
 0x432   :  { %3804 = vsyncadd [#allocation4], 4294967168 }
 0x433   :  { %2758 = vsyncpa [#allocation3], 1 }
 0x434   :  { %2759 = vsyncpa [#allocation6], 1 }
 0x435   :  { %2760 = vsyncpa [#allocation9], 1 }
 0x436   :  { %2761 = vsyncpa [#allocation4], 1 }

// kernel: tpu_custom_call.1
= control target key start
LH: loop header
LB: loop body
LE: loop exit
PB: predicated region body
PF: predicated region fallthrough
CT: control target
= control target key end

     0   :  { %12 = vsyncpa [#allocation3], 0  ;;  %s4006_s0 = inlined_call_operand.hbm [shape: bf16[16,1024], index: 0, kind: input, shape index: {}]   ;;  %s4007_s1 = inlined_call_operand.hbm [shape: bf16[1024,512], index: 1, kind: input, shape index: {}]   ;;  %s4008_s2 = inlined_call_operand.vmem [shape: f32[1,512], index: 2, kind: input, shape index: {}]   ;;  %s4009_s3 = inlined_call_operand.hbm [shape: bf16[512,256], index: 3, kind: input, shape index: {}]   ;;  %s4010_s4 = inlined_call_operand.vmem [shape: f32[1,256], index: 4, kind: input, shape index: {}]   ;;  %s4011_s5 = inlined_call_operand.hbm [shape: bf16[256,128], index: 5, kind: input, shape index: {}]   ;;  %s4012_s6 = inlined_call_operand.vmem [shape: f32[1,128], index: 6, kind: input, shape index: {}]   ;;  %s4013_s7 = inlined_call_operand.hbm [shape: bf16[16,128], index: 7, kind: output, shape index: {}]  }
   0x1   :  { %13 = vsyncpa [#allocation6], 0 }
   0x2   :  { %14 = vsyncpa [#allocation9], 0 }
   0x3   :  { %15 = vsyncpa [#allocation4], 0  ;;  %s3805_s24 = smov [#allocation5]   ;;  %s3687_s28 = scalar_lea.hbm %s4007_s1, 32768 }
   0x4   :  { %s33_s25 = sshll.u32 %s3805_s24, 4  ;;  %p3688_p0 = scmp.ne.s32.totalorder %s4007_s1, %s3687_s28  ;;  %s34_s25 = int_to_ptr.vmem [resolvable:$true] %s33_s25 }
   0x5   :  { %p3691_p1 = scmp.lt.u32.totalorder %s3687_s28, %s4007_s1 }
   0x7   :  { %p3693_p2 = pnand %p3691_p1, %p3688_p0 }
   0x9   :  { %3696 = shalt.err (!%p3693_p2)
}
   0xa   :  { %s3697_s10 = scalar_lea.vmem %s34_s25, 32768  ;;  %p3702_p4 = scmp.lt.s32.totalorder %s34_s25, %s34_s25 }
   0xb   :  { %p3698_p3 = scmp.ne.s32.totalorder %s34_s25, %s3697_s10  ;;  %p3703_p5 = scmp.lt.s32.totalorder %s3697_s10, %s3697_s10 }
   0xd   :  { %p3704_p6 = por %p3703_p5, %p3702_p4 }
   0xf   :  { %p3705_p7 = pnand %p3704_p6, %p3698_p3 }
  0x11   :  { %3708 = shalt.err (!%p3705_p7)
}
  0x12   :  { %s3806_s11 = smov 256   ;;  %s3807_s12 = smov 16  }
  0x13   :  { %39 = dma.hbm_to_vmem [thread:$0]  %s4007_s1, 32768, %s34_s25, [#allocation6], %s3806_s11, %s3806_s11, %s3807_s12  }
  0x14   :  { %s3808_s15 = smov [#allocation2]   ;;  %s3709_s19 = scalar_lea.hbm %s4006_s0, 1024 }
  0x15   :  { %s21_s16 = sshll.u32 %s3808_s15, 4  ;;  %p3710_p8 = scmp.ne.s32.totalorder %s4006_s0, %s3709_s19  ;;  %s22_s16 = int_to_ptr.vmem [resolvable:$true] %s21_s16 }
  0x16   :  { %p3713_p9 = scmp.lt.u32.totalorder %s3709_s19, %s4006_s0 }
  0x18   :  { %p3715_p10 = pnand %p3713_p9, %p3710_p8 }
  0x1a   :  { %3718 = shalt.err (!%p3715_p10)
}
  0x1b   :  { %s3719_s24 = scalar_lea.vmem %s22_s16, 1024  ;;  %p3724_p12 = scmp.lt.s32.totalorder %s22_s16, %s22_s16 }
  0x1c   :  { %p3720_p11 = scmp.ne.s32.totalorder %s22_s16, %s3719_s24  ;;  %p3725_p13 = scmp.lt.s32.totalorder %s3719_s24, %s3719_s24 }
  0x1e   :  { %p3726_p0 = por %p3725_p13, %p3724_p12 }
  0x20   :  { %p3727_p1 = pnand %p3726_p0, %p3720_p11 }
  0x22   :  { %3730 = shalt.err (!%p3727_p1)
}
  0x23   :  { %s3809_s1 = smov 512   ;;  %s3810_s25 = smov 32  }
  0x24   :  { %27 = dma.hbm_to_vmem [thread:$0]  %s4006_s0, 1024, %s22_s16, [#allocation3], %s3809_s1, %s3809_s1, %s3810_s25  }
  0x25   :  { %s3811_s28 = smov [#allocation7]   ;;  %s3731_s9 = scalar_lea.hbm %s4009_s3, 8192 }
  0x26   :  { %s47_s29 = sshll.u32 %s3811_s28, 4  ;;  %p3732_p2 = scmp.ne.s32.totalorder %s4009_s3, %s3731_s9  ;;  %s48_s29 = int_to_ptr.vmem [resolvable:$true] %s47_s29 }
  0x27   :  { %p3735_p3 = scmp.lt.u32.totalorder %s3731_s9, %s4009_s3 }
  0x29   :  { %p3737_p4 = pnand %p3735_p3, %p3732_p2 }
  0x2b   :  { %3740 = shalt.err (!%p3737_p4)
}
  0x2c   :  { %s3741_s14 = scalar_lea.vmem %s48_s29, 8192  ;;  %p3746_p6 = scmp.lt.s32.totalorder %s48_s29, %s48_s29 }
  0x2d   :  { %p3742_p5 = scmp.ne.s32.totalorder %s48_s29, %s3741_s14  ;;  %p3747_p7 = scmp.lt.s32.totalorder %s3741_s14, %s3741_s14 }
  0x2f   :  { %p3748_p8 = por %p3747_p7, %p3746_p6 }
  0x31   :  { %p3749_p9 = pnand %p3748_p8, %p3742_p5 }
  0x33   :  { %3752 = shalt.err (!%p3749_p9)
}
  0x34   :  { %s3812_s0 = smov 128   ;;  %s3813_s15 = smov 8  }
  0x35   :  { %53 = dma.hbm_to_vmem [thread:$0]  %s4009_s3, 8192, %s48_s29, [#allocation6], %s3812_s0, %s3812_s0, %s3813_s15  }
  0x36   :  { %s3814_s18 = smov [#allocation8]   ;;  %s3753_s22 = scalar_lea.hbm %s4011_s5, 2048 }
  0x37   :  { %s61_s19 = sshll.u32 %s3814_s18, 4  ;;  %p3754_p10 = scmp.ne.s32.totalorder %s4011_s5, %s3753_s22  ;;  %s62_s19 = int_to_ptr.vmem [resolvable:$true] %s61_s19 }
  0x38   :  { %p3757_p11 = scmp.lt.u32.totalorder %s3753_s22, %s4011_s5 }
  0x3a   :  { %p3759_p12 = pnand %p3757_p11, %p3754_p10 }
  0x3c   :  { %3762 = shalt.err (!%p3759_p12)
}
  0x3d   :  { %s3763_s26 = scalar_lea.vmem %s62_s19, 2048  ;;  %p3768_p0 = scmp.lt.s32.totalorder %s62_s19, %s62_s19 }
  0x3e   :  { %p3764_p13 = scmp.ne.s32.totalorder %s62_s19, %s3763_s26  ;;  %p3769_p1 = scmp.lt.s32.totalorder %s3763_s26, %s3763_s26 }
  0x40   :  { %p3770_p2 = por %p3769_p1, %p3768_p0 }
  0x42   :  { %p3771_p3 = pnand %p3770_p2, %p3764_p13 }
  0x44   :  { %3774 = shalt.err (!%p3771_p3)
}
  0x45   :  { %s3815_s3 = smov 64   ;;  %s3816_s27 = smov 4  }
  0x46   :  { %67 = dma.hbm_to_vmem [thread:$0]  %s4011_s5, 2048, %s62_s19, [#allocation9], %s3815_s3, %s3815_s3, %s3816_s27  }
  0x47   :  { %3797 = dma.done.wait [#allocation3], 1024  }
  0x48   :  { %3798 = vsyncadd [#allocation3], 4294966272 }
  0x49   :  { %3799 = dma.done.wait [#allocation6], 40960  }
  0x4a   :  { %3800 = vsyncadd [#allocation6], 4294926336 }
  0x4b   :  { %3801 = dma.done.wait [#allocation9], 2048  }
  0x4c   :  { %3802 = vsyncadd [#allocation9], 4294965248  ;;  %v3191_v0 = vld [vmem:[#allocation5 + $0x4] ss:$16 sps:$4 sm:$0xff]   ;;  %v3195_v2 = vld [vmem:[#allocation5] ss:$16 sps:$4 sm:$0xff]  }
  0x4d   :  { %v3193_v1 = vld [vmem:[#allocation5 + $0x204] ss:$16 sps:$4 sm:$0xff]   ;;  %1689 = vmatprep.subr.bf16.mxu1 %v3191_v0  ;;  %v3196_v3 = vld [vmem:[#allocation5 + $0x200] ss:$16 sps:$4 sm:$0xff]   ;;  %v84_v50 = vld [vmem:[#allocation2 + $0x8] sm:$0xff]  ;;  %s3817_s10 = smov [#allocation10]  }
  0x4e   :  { %1732 = vmatprep.subr.bf16.mxu0 %v3193_v1  ;;  %v3197_v4 = vld [vmem:[#allocation5 + $0x24] ss:$16 sps:$4 sm:$0xff]   ;;  %1690 = vmatpush1.bf16.msra.mxu1 %v3195_v2  ;;  %v3201_v6 = vld [vmem:[#allocation5 + $0x20] ss:$16 sps:$4 sm:$0xff]   ;;  %v88_v51 = vld [vmem:[#allocation2 + $0x28] sm:$0xff]  ;;  %s2748_s11 = sshll.u32 %s3817_s10, 4  ;;  %s2749_s11 = int_to_ptr.vmem [resolvable:$true] %s2748_s11 }
  0x4f   :  { %1733 = vmatpush1.bf16.msra.mxu0 %v3196_v3  ;;  %v3199_v5 = vld [vmem:[#allocation5 + $0x224] ss:$16 sps:$4 sm:$0xff]   ;;  %1691 = vmatprep.subr.bf16.mxu1 %v3197_v4  ;;  %v3202_v7 = vld [vmem:[#allocation5 + $0x220] ss:$16 sps:$4 sm:$0xff]   ;;  %v3909_v55 = vcombine.high %v84_v50, %v88_v51  ;;  %s3775_s12 = scalar_lea.vmem %s2749_s11, 128  ;;  %p3780_p5 = scmp.lt.s32.totalorder %s2749_s11, %s2749_s11 }
  0x50   :  { %1734 = vmatprep.subr.bf16.mxu0 %v3199_v5  ;;  %v3203_v8 = vld [vmem:[#allocation5 + $0x44] ss:$16 sps:$4 sm:$0xff]   ;;  %v3207_v10 = vld [vmem:[#allocation5 + $0x40] ss:$16 sps:$4 sm:$0xff]   ;;  %p3776_p4 = scmp.ne.s32.totalorder %s2749_s11, %s3775_s12  ;;  %p3781_p6 = scmp.lt.s32.totalorder %s3775_s12, %s3775_s12 }
  0x51   :  { %v3205_v9 = vld [vmem:[#allocation5 + $0x244] ss:$16 sps:$4 sm:$0xff]   ;;  %v3208_v11 = vld [vmem:[#allocation5 + $0x240] ss:$16 sps:$4 sm:$0xff]   ;;  %1764 = vmatprep.mubr.bf16.mxu0 %v3909_v55 }
  0x52   :  { %1692 = vmatpush1.bf16.msra.mxu1 %v3201_v6  ;;  %v3209_v12 = vld [vmem:[#allocation5 + $0x64] ss:$16 sps:$4 sm:$0xff]   ;;  %v3213_v14 = vld [vmem:[#allocation5 + $0x60] ss:$16 sps:$4 sm:$0xff]   ;;  %p3782_p7 = por %p3781_p6, %p3780_p5 }
  0x53   :  { %1735 = vmatpush1.bf16.msra.mxu0 %v3202_v7  ;;  %1693 = vmatprep.subr.bf16.mxu1 %v3203_v8  ;;  %v3211_v13 = vld [vmem:[#allocation5 + $0x264] ss:$16 sps:$4 sm:$0xff]   ;;  %v3214_v15 = vld [vmem:[#allocation5 + $0x260] ss:$16 sps:$4 sm:$0xff]   ;;  %v3292_v7 = vld [vmem:[#allocation5 + $0xc] ss:$16 sps:$4 sm:$0xff]  }
  0x54   :  { %1736 = vmatprep.subr.bf16.mxu0 %v3205_v9  ;;  %v3215_v16 = vld [vmem:[#allocation5 + $0x84] ss:$16 sps:$4 sm:$0xff]   ;;  %v3219_v18 = vld [vmem:[#allocation5 + $0x80] ss:$16 sps:$4 sm:$0xff]   ;;  %v3914_v9 = vcombine.low %v84_v50, %v88_v51  ;;  %v3344_v50 = vld [vmem:[#allocation5 + $0x128] ss:$16 sps:$4 sm:$0xff]   ;;  %p3783_p8 = pnand %p3782_p7, %p3776_p4 }
  0x55   :  { %v3217_v17 = vld [vmem:[#allocation5 + $0x284] ss:$16 sps:$4 sm:$0xff]   ;;  %v3220_v19 = vld [vmem:[#allocation5 + $0x280] ss:$16 sps:$4 sm:$0xff]  }
  0x56   :  { %1694 = vmatpush1.bf16.msra.mxu1 %v3207_v10  ;;  %v3221_v20 = vld [vmem:[#allocation5 + $0xa4] ss:$16 sps:$4 sm:$0xff]   ;;  %v3225_v22 = vld [vmem:[#allocation5 + $0xa0] ss:$16 sps:$4 sm:$0xff]  }
  0x57   :  { %1737 = vmatpush1.bf16.msra.mxu0 %v3208_v11  ;;  %1695 = vmatprep.subr.bf16.mxu1 %v3209_v12  ;;  %v3223_v21 = vld [vmem:[#allocation5 + $0x2a4] ss:$16 sps:$4 sm:$0xff]   ;;  %v3226_v23 = vld [vmem:[#allocation5 + $0x2a0] ss:$16 sps:$4 sm:$0xff]   ;;  %v3290_v11 = vld [vmem:[#allocation5 + $0x8] ss:$16 sps:$4 sm:$0xff]  }
  0x58   :  { %1738 = vmatprep.subr.bf16.mxu0 %v3211_v13  ;;  %v3227_v24 = vld [vmem:[#allocation5 + $0xc4] ss:$16 sps:$4 sm:$0xff]   ;;  %v3231_v26 = vld [vmem:[#allocation5 + $0xc0] ss:$16 sps:$4 sm:$0xff]   ;;  %v3298_v13 = vld [vmem:[#allocation5 + $0x2c] ss:$16 sps:$4 sm:$0xff]  }
  0x59   :  { %v3229_v25 = vld [vmem:[#allocation5 + $0x2c4] ss:$16 sps:$4 sm:$0xff]   ;;  %v3232_v27 = vld [vmem:[#allocation5 + $0x2c0] ss:$16 sps:$4 sm:$0xff]  }
  0x5a   :  { %1696 = vmatpush1.bf16.msra.mxu1 %v3213_v14  ;;  %v3233_v28 = vld [vmem:[#allocation5 + $0xe4] ss:$16 sps:$4 sm:$0xff]   ;;  %v3237_v30 = vld [vmem:[#allocation5 + $0xe0] ss:$16 sps:$4 sm:$0xff]  }
  0x5b   :  { %1739 = vmatpush1.bf16.msra.mxu0 %v3214_v15  ;;  %1697 = vmatprep.subr.bf16.mxu1 %v3215_v16  ;;  %v3235_v29 = vld [vmem:[#allocation5 + $0x2e4] ss:$16 sps:$4 sm:$0xff]   ;;  %v3238_v31 = vld [vmem:[#allocation5 + $0x2e0] ss:$16 sps:$4 sm:$0xff]   ;;  %v3296_v15 = vld [vmem:[#allocation5 + $0x28] ss:$16 sps:$4 sm:$0xff]  }
  0x5c   :  { %1740 = vmatprep.subr.bf16.mxu0 %v3217_v17  ;;  %v3239_v32 = vld [vmem:[#allocation5 + $0x104] ss:$16 sps:$4 sm:$0xff]   ;;  %v3243_v34 = vld [vmem:[#allocation5 + $0x100] ss:$16 sps:$4 sm:$0xff]   ;;  %v3304_v17 = vld [vmem:[#allocation5 + $0x4c] ss:$16 sps:$4 sm:$0xff]  }
  0x5d   :  { %v3241_v33 = vld [vmem:[#allocation5 + $0x304] ss:$16 sps:$4 sm:$0xff]   ;;  %v3244_v35 = vld [vmem:[#allocation5 + $0x300] ss:$16 sps:$4 sm:$0xff]  }
  0x5e   :  { %1698 = vmatpush1.bf16.msra.mxu1 %v3219_v18  ;;  %v3245_v36 = vld [vmem:[#allocation5 + $0x124] ss:$16 sps:$4 sm:$0xff]   ;;  %v3249_v38 = vld [vmem:[#allocation5 + $0x120] ss:$16 sps:$4 sm:$0xff]  }
  0x5f   :  { %1741 = vmatpush1.bf16.msra.mxu0 %v3220_v19  ;;  %1699 = vmatprep.subr.bf16.mxu1 %v3221_v20  ;;  %v3247_v37 = vld [vmem:[#allocation5 + $0x324] ss:$16 sps:$4 sm:$0xff]   ;;  %v3250_v39 = vld [vmem:[#allocation5 + $0x320] ss:$16 sps:$4 sm:$0xff]   ;;  %v3302_v19 = vld [vmem:[#allocation5 + $0x48] ss:$16 sps:$4 sm:$0xff]  }
  0x60   :  { %1742 = vmatprep.subr.bf16.mxu0 %v3223_v21  ;;  %v3251_v40 = vld [vmem:[#allocation5 + $0x144] ss:$16 sps:$4 sm:$0xff]   ;;  %v3255_v42 = vld [vmem:[#allocation5 + $0x140] ss:$16 sps:$4 sm:$0xff]   ;;  %v3310_v21 = vld [vmem:[#allocation5 + $0x6c] ss:$16 sps:$4 sm:$0xff]  }
  0x61   :  { %v3253_v41 = vld [vmem:[#allocation5 + $0x344] ss:$16 sps:$4 sm:$0xff]   ;;  %v3256_v43 = vld [vmem:[#allocation5 + $0x340] ss:$16 sps:$4 sm:$0xff]  }
  0x62   :  { %1700 = vmatpush1.bf16.msra.mxu1 %v3225_v22  ;;  %v3257_v44 = vld [vmem:[#allocation5 + $0x164] ss:$16 sps:$4 sm:$0xff]   ;;  %v3261_v46 = vld [vmem:[#allocation5 + $0x160] ss:$16 sps:$4 sm:$0xff]  }
  0x63   :  { %1743 = vmatpush1.bf16.msra.mxu0 %v3226_v23  ;;  %1701 = vmatprep.subr.bf16.mxu1 %v3227_v24  ;;  %v3259_v45 = vld [vmem:[#allocation5 + $0x364] ss:$16 sps:$4 sm:$0xff]   ;;  %v3262_v47 = vld [vmem:[#allocation5 + $0x360] ss:$16 sps:$4 sm:$0xff]   ;;  %v3308_v23 = vld [vmem:[#allocation5 + $0x68] ss:$16 sps:$4 sm:$0xff]  }
  0x64   :  { %1744 = vmatprep.subr.bf16.mxu0 %v3229_v25  ;;  %v83_v48 = vld [vmem:[#allocation2] sm:$0xff]  ;;  %v3316_v25 = vld [vmem:[#allocation5 + $0x8c] ss:$16 sps:$4 sm:$0xff]  }
  0x65   :  { %v87_v49 = vld [vmem:[#allocation2 + $0x20] sm:$0xff] }
  0x66   :  { %1702 = vmatpush1.bf16.msra.mxu1 %v3231_v26  ;;  %v3263_v52 = vld [vmem:[#allocation5 + $0x184] ss:$16 sps:$4 sm:$0xff]   ;;  %v2763_v53 = vcombine.high %v83_v48, %v87_v49  ;;  %v3267_v56 = vld [vmem:[#allocation5 + $0x180] ss:$16 sps:$4 sm:$0xff]   ;;  %v3912_v8 = vcombine.low %v83_v48, %v87_v49  ;;  %v3346_v48 = vld [vmem:[#allocation5 + $0x12c] ss:$16 sps:$4 sm:$0xff]  }
  0x67   :  { %1745 = vmatpush1.bf16.msra.mxu0 %v3232_v27  ;;  %1703 = vmatprep.subr.bf16.mxu1 %v3233_v28  ;;  %v3265_v54 = vld [vmem:[#allocation5 + $0x384] ss:$16 sps:$4 sm:$0xff]   ;;  %v3268_v57 = vld [vmem:[#allocation5 + $0x380] ss:$16 sps:$4 sm:$0xff]   ;;  %v3314_v27 = vld [vmem:[#allocation5 + $0x88] ss:$16 sps:$4 sm:$0xff]  }
  0x68   :  { %1746 = vmatprep.subr.bf16.mxu0 %v3235_v29  ;;  %1721 = vmatprep.mubr.bf16.mxu1 %v2763_v53  ;;  %v3269_v58 = vld [vmem:[#allocation5 + $0x1a4] ss:$16 sps:$4 sm:$0xff]   ;;  %v3273_v60 = vld [vmem:[#allocation5 + $0x1a0] ss:$16 sps:$4 sm:$0xff]   ;;  %v3322_v29 = vld [vmem:[#allocation5 + $0xac] ss:$16 sps:$4 sm:$0xff]  }
  0x69   :  { %v3271_v59 = vld [vmem:[#allocation5 + $0x3a4] ss:$16 sps:$4 sm:$0xff]   ;;  %v3274_v61 = vld [vmem:[#allocation5 + $0x3a0] ss:$16 sps:$4 sm:$0xff]  }
  0x6a   :  { %1704 = vmatpush1.bf16.msra.mxu1 %v3237_v30  ;;  %v3275_v62 = vld [vmem:[#allocation5 + $0x1c4] ss:$16 sps:$4 sm:$0xff]   ;;  %v3279_v0 = vld [vmem:[#allocation5 + $0x1c0] ss:$16 sps:$4 sm:$0xff]  }
  0x6b   :  { %1747 = vmatpush1.bf16.msra.mxu0 %v3238_v31  ;;  %1705 = vmatprep.subr.bf16.mxu1 %v3239_v32  ;;  %v3277_v63 = vld [vmem:[#allocation5 + $0x3c4] ss:$16 sps:$4 sm:$0xff]   ;;  %v3280_v1 = vld [vmem:[#allocation5 + $0x3c0] ss:$16 sps:$4 sm:$0xff]   ;;  %v3320_v31 = vld [vmem:[#allocation5 + $0xa8] ss:$16 sps:$4 sm:$0xff]  }
  0x6c   :  { %1748 = vmatprep.subr.bf16.mxu0 %v3241_v33  ;;  %v3281_v2 = vld [vmem:[#allocation5 + $0x1e4] ss:$16 sps:$4 sm:$0xff]   ;;  %v3285_v4 = vld [vmem:[#allocation5 + $0x1e0] ss:$16 sps:$4 sm:$0xff]   ;;  %v3328_v33 = vld [vmem:[#allocation5 + $0xcc] ss:$16 sps:$4 sm:$0xff]  }
  0x6d   :  { %v3283_v3 = vld [vmem:[#allocation5 + $0x3e4] ss:$16 sps:$4 sm:$0xff]   ;;  %v3286_v5 = vld [vmem:[#allocation5 + $0x3e0] ss:$16 sps:$4 sm:$0xff]  }
  0x6e   :  { %1706 = vmatpush1.bf16.msra.mxu1 %v3243_v34  ;;  %v3289_v6 = vld [vmem:[#allocation5 + $0x404] ss:$16 sps:$4 sm:$0xff]   ;;  %v3287_v10 = vld [vmem:[#allocation5 + $0x400] ss:$16 sps:$4 sm:$0xff]  }
  0x6f   :  { %1749 = vmatpush1.bf16.msra.mxu0 %v3244_v35  ;;  %1707 = vmatprep.subr.bf16.mxu1 %v3245_v36  ;;  %v3295_v12 = vld [vmem:[#allocation5 + $0x424] ss:$16 sps:$4 sm:$0xff]   ;;  %v3293_v14 = vld [vmem:[#allocation5 + $0x420] ss:$16 sps:$4 sm:$0xff]  }
  0x70   :  { %1750 = vmatprep.subr.bf16.mxu0 %v3247_v37  ;;  %v3301_v16 = vld [vmem:[#allocation5 + $0x444] ss:$16 sps:$4 sm:$0xff]   ;;  %v3299_v18 = vld [vmem:[#allocation5 + $0x440] ss:$16 sps:$4 sm:$0xff]   ;;  %v3326_v37 = vld [vmem:[#allocation5 + $0xc8] ss:$16 sps:$4 sm:$0xff]  }
  0x71   :  { %v3307_v20 = vld [vmem:[#allocation5 + $0x464] ss:$16 sps:$4 sm:$0xff]   ;;  %v3305_v22 = vld [vmem:[#allocation5 + $0x460] ss:$16 sps:$4 sm:$0xff]  }
  0x72   :  { %1708 = vmatpush1.bf16.msra.mxu1 %v3249_v38  ;;  %v3313_v24 = vld [vmem:[#allocation5 + $0x484] ss:$16 sps:$4 sm:$0xff]   ;;  %v3311_v26 = vld [vmem:[#allocation5 + $0x480] ss:$16 sps:$4 sm:$0xff]  }
  0x73   :  { %1751 = vmatpush1.bf16.msra.mxu0 %v3250_v39  ;;  %1709 = vmatprep.subr.bf16.mxu1 %v3251_v40  ;;  %v3319_v28 = vld [vmem:[#allocation5 + $0x4a4] ss:$16 sps:$4 sm:$0xff]   ;;  %v3317_v30 = vld [vmem:[#allocation5 + $0x4a0] ss:$16 sps:$4 sm:$0xff]   ;;  %v3334_v40 = vld [vmem:[#allocation5 + $0xec] ss:$16 sps:$4 sm:$0xff]  }
  0x74   :  { %1752 = vmatprep.subr.bf16.mxu0 %v3253_v41  ;;  %v3325_v32 = vld [vmem:[#allocation5 + $0x4c4] ss:$16 sps:$4 sm:$0xff]   ;;  %v3323_v36 = vld [vmem:[#allocation5 + $0x4c0] ss:$16 sps:$4 sm:$0xff]  }
  0x75   :  { %v3918_v34 = vld [vmem:[#allocation2 + $0x10] sm:$0xff] }
  0x76   :  { %1710 = vmatpush1.bf16.msra.mxu1 %v3255_v42  ;;  %v3920_v35 = vld [vmem:[#allocation2 + $0x30] sm:$0xff]  ;;  %v3332_v42 = vld [vmem:[#allocation5 + $0xe8] ss:$16 sps:$4 sm:$0xff]  }
  0x77   :  { %1753 = vmatpush1.bf16.msra.mxu0 %v3256_v43  ;;  %1711 = vmatprep.subr.bf16.mxu1 %v3257_v44  ;;  %v3924_v38 = vcombine.high %v3918_v34, %v3920_v35  ;;  %v3331_v39 = vld [vmem:[#allocation5 + $0x4e4] ss:$16 sps:$4 sm:$0xff]   ;;  %v3329_v41 = vld [vmem:[#allocation5 + $0x4e0] ss:$16 sps:$4 sm:$0xff]   ;;  %v3340_v44 = vld [vmem:[#allocation5 + $0x10c] ss:$16 sps:$4 sm:$0xff]  }
  0x78   :  { %1754 = vmatprep.subr.bf16.mxu0 %v3259_v45  ;;  %v3337_v43 = vld [vmem:[#allocation5 + $0x504] ss:$16 sps:$4 sm:$0xff]   ;;  %v3335_v45 = vld [vmem:[#allocation5 + $0x500] ss:$16 sps:$4 sm:$0xff]  }
  0x79   :  { %v3341_v49 = vld [vmem:[#allocation5 + $0x520] ss:$16 sps:$4 sm:$0xff]   ;;  %v3349_v51 = vld [vmem:[#allocation5 + $0x544] ss:$16 sps:$4 sm:$0xff]  }
  0x7a   :  { %1712 = vmatpush1.bf16.msra.mxu1 %v3261_v46  ;;  %v3338_v46 = vld [vmem:[#allocation5 + $0x108] ss:$16 sps:$4 sm:$0xff]  }
  0x7b   :  { %1755 = vmatpush1.bf16.msra.mxu0 %v3262_v47  ;;  %1713 = vmatprep.subr.bf16.mxu1 %v3263_v52  ;;  %v3343_v47 = vld [vmem:[#allocation5 + $0x524] ss:$16 sps:$4 sm:$0xff]   ;;  %v3352_v52 = vld [vmem:[#allocation5 + $0x14c] ss:$16 sps:$4 sm:$0xff]  }
  0x7c   :  { %1756 = vmatprep.subr.bf16.mxu0 %v3265_v54  ;;  %v3350_v54 = vld [vmem:[#allocation5 + $0x148] ss:$16 sps:$4 sm:$0xff]  }
  0x7e   :  { %1714 = vmatpush1.bf16.msra.mxu1 %v3267_v56  ;;  %v3355_v56 = vld [vmem:[#allocation5 + $0x564] ss:$16 sps:$4 sm:$0xff]  }
  0x7f   :  { %1757 = vmatpush1.bf16.msra.mxu0 %v3268_v57  ;;  %1715 = vmatprep.subr.bf16.mxu1 %v3269_v58  ;;  %v3358_v57 = vld [vmem:[#allocation5 + $0x16c] ss:$16 sps:$4 sm:$0xff]   ;;  %v3353_v58 = vld [vmem:[#allocation5 + $0x560] ss:$16 sps:$4 sm:$0xff]  }
  0x80   :  { %1758 = vmatprep.subr.bf16.mxu0 %v3271_v59  ;;  %v3356_v59 = vld [vmem:[#allocation5 + $0x168] ss:$16 sps:$4 sm:$0xff]  }
  0x82   :  { %1716 = vmatpush1.bf16.msra.mxu1 %v3273_v60  ;;  %v3361_v60 = vld [vmem:[#allocation5 + $0x584] ss:$16 sps:$4 sm:$0xff]  }
  0x83   :  { %1759 = vmatpush1.bf16.msra.mxu0 %v3274_v61  ;;  %1717 = vmatprep.subr.bf16.mxu1 %v3275_v62  ;;  %v3364_v61 = vld [vmem:[#allocation5 + $0x18c] ss:$16 sps:$4 sm:$0xff]   ;;  %v3359_v62 = vld [vmem:[#allocation5 + $0x580] ss:$16 sps:$4 sm:$0xff]  }
  0x84   :  { %1760 = vmatprep.subr.bf16.mxu0 %v3277_v63  ;;  %v3362_v63 = vld [vmem:[#allocation5 + $0x188] ss:$16 sps:$4 sm:$0xff]  }
  0x86   :  { %1718 = vmatpush1.bf16.msra.mxu1 %v3279_v0  ;;  %v3367_v0 = vld [vmem:[#allocation5 + $0x5a4] ss:$16 sps:$4 sm:$0xff]  }
  0x87   :  { %1761 = vmatpush1.bf16.msra.mxu0 %v3280_v1  ;;  %1719 = vmatprep.subr.bf16.mxu1 %v3281_v2  ;;  %v3370_v1 = vld [vmem:[#allocation5 + $0x1ac] ss:$16 sps:$4 sm:$0xff]   ;;  %v3365_v2 = vld [vmem:[#allocation5 + $0x5a0] ss:$16 sps:$4 sm:$0xff]  }
  0x88   :  { %1762 = vmatprep.subr.bf16.mxu0 %v3283_v3  ;;  %v3368_v3 = vld [vmem:[#allocation5 + $0x1a8] ss:$16 sps:$4 sm:$0xff]  }
  0x8a   :  { %1720 = vmatpush1.bf16.msra.mxu1 %v3285_v4  ;;  %v3373_v4 = vld [vmem:[#allocation5 + $0x5c4] ss:$16 sps:$4 sm:$0xff]  }
  0x8b   :  { %1763 = vmatpush1.bf16.msra.mxu0 %v3286_v5  ;;  %1861 = vmatprep.subr.bf16.mxu1 %v3292_v7  ;;  %v3376_v5 = vld [vmem:[#allocation5 + $0x1cc] ss:$16 sps:$4 sm:$0xff]   ;;  %v3374_v7 = vld [vmem:[#allocation5 + $0x1c8] ss:$16 sps:$4 sm:$0xff]  }
  0x8c   :  { %1775 = vmatprep.subr.bf16.mxu0 %v3289_v6  ;;  %v3371_v6 = vld [vmem:[#allocation5 + $0x5c0] ss:$16 sps:$4 sm:$0xff]  }
  0x8d   :  { %1722 = vmatmul.mubr.bf16.vlgmr.msra.gmra.mrb[0].mxu1 %v3912_v8 }
  0x8e   :  { %1765 = vmatmul.mubr.bf16.vlgmr.msra.gmra.mrb[0].mxu0 %v3914_v9  ;;  %1862 = vmatpush1.bf16.msra.mxu1 %v3290_v11  ;;  %v3382_v11 = vld [vmem:[#allocation5 + $0x1ec] ss:$16 sps:$4 sm:$0xff]  }
  0x8f   :  { %1776 = vmatpush1.bf16.msra.mxu0 %v3287_v10  ;;  %1863 = vmatprep.subr.bf16.mxu1 %v3298_v13  ;;  %v3379_v10 = vld [vmem:[#allocation5 + $0x5e4] ss:$16 sps:$4 sm:$0xff]   ;;  %v3380_v13 = vld [vmem:[#allocation5 + $0x1e8] ss:$16 sps:$4 sm:$0xff]  }
  0x90   :  { %1777 = vmatprep.subr.bf16.mxu0 %v3295_v12  ;;  %1893 = vmatprep.mubr.bf16.mxu1 %v2763_v53  ;;  %v3347_v53 = vld [vmem:[#allocation5 + $0x540] ss:$16 sps:$4 sm:$0xff]  }
  0x91   :  { %1807 = vmatprep.mubr.bf16.mxu0 %v3924_v38  ;;  %v3377_v12 = vld [vmem:[#allocation5 + $0x5e0] ss:$16 sps:$4 sm:$0xff]  }
  0x92   :  { %1864 = vmatpush1.bf16.msra.mxu1 %v3296_v15  ;;  %v3388_v15 = vld [vmem:[#allocation5 + $0x20c] ss:$16 sps:$4 sm:$0xff]  }
  0x93   :  { %1778 = vmatpush1.bf16.msra.mxu0 %v3293_v14  ;;  %1865 = vmatprep.subr.bf16.mxu1 %v3304_v17  ;;  %v3385_v14 = vld [vmem:[#allocation5 + $0x604] ss:$16 sps:$4 sm:$0xff]   ;;  %v3383_v17 = vld [vmem:[#allocation5 + $0x600] ss:$16 sps:$4 sm:$0xff]  }
  0x94   :  { %1779 = vmatprep.subr.bf16.mxu0 %v3301_v16  ;;  %v3929_v16 = vcombine.low %v3918_v34, %v3920_v35  ;;  %v3412_v34 = vld [vmem:[#allocation5 + $0x28c] ss:$16 sps:$4 sm:$0xff]   ;;  %v3407_v35 = vld [vmem:[#allocation5 + $0x680] ss:$16 sps:$4 sm:$0xff]  }
  0x96   :  { %1866 = vmatpush1.bf16.msra.mxu1 %v3302_v19  ;;  %v3391_v19 = vld [vmem:[#allocation5 + $0x624] ss:$16 sps:$4 sm:$0xff]  }
  0x97   :  { %1780 = vmatpush1.bf16.msra.mxu0 %v3299_v18  ;;  %1867 = vmatprep.subr.bf16.mxu1 %v3310_v21  ;;  %v3386_v18 = vld [vmem:[#allocation5 + $0x208] ss:$16 sps:$4 sm:$0xff]  }
  0x98   :  { %1781 = vmatprep.subr.bf16.mxu0 %v3307_v20  ;;  %v3394_v20 = vld [vmem:[#allocation5 + $0x22c] ss:$16 sps:$4 sm:$0xff]  }
  0x99   :  { %v3931_v21 = vld [vmem:[#allocation2 + $0x18] sm:$0xff] }
  0x9a   :  { %1868 = vmatpush1.bf16.msra.mxu1 %v3308_v23  ;;  %v3389_v23 = vld [vmem:[#allocation5 + $0x620] ss:$16 sps:$4 sm:$0xff]  }
  0x9b   :  { %1782 = vmatpush1.bf16.msra.mxu0 %v3305_v22  ;;  %1869 = vmatprep.subr.bf16.mxu1 %v3316_v25  ;;  %v3933_v22 = vld [vmem:[#allocation2 + $0x38] sm:$0xff] }
  0x9c   :  { %1783 = vmatprep.subr.bf16.mxu0 %v3313_v24  ;;  %v3392_v24 = vld [vmem:[#allocation5 + $0x228] ss:$16 sps:$4 sm:$0xff]   ;;  %v3939_v25 = vcombine.high %v3931_v21, %v3933_v22 }
  0x9e   :  { %1870 = vmatpush1.bf16.msra.mxu1 %v3314_v27  ;;  %v3400_v27 = vld [vmem:[#allocation5 + $0x24c] ss:$16 sps:$4 sm:$0xff]  }
  0x9f   :  { %1784 = vmatpush1.bf16.msra.mxu0 %v3311_v26  ;;  %1871 = vmatprep.subr.bf16.mxu1 %v3322_v29  ;;  %v3397_v26 = vld [vmem:[#allocation5 + $0x644] ss:$16 sps:$4 sm:$0xff]   ;;  %v3398_v29 = vld [vmem:[#allocation5 + $0x248] ss:$16 sps:$4 sm:$0xff]  }
  0xa0   :  { %1785 = vmatprep.subr.bf16.mxu0 %v3319_v28  ;;  %v3395_v28 = vld [vmem:[#allocation5 + $0x640] ss:$16 sps:$4 sm:$0xff]  }
  0xa2   :  { %1872 = vmatpush1.bf16.msra.mxu1 %v3320_v31  ;;  %v3401_v31 = vld [vmem:[#allocation5 + $0x660] ss:$16 sps:$4 sm:$0xff]  }
  0xa3   :  { %1786 = vmatpush1.bf16.msra.mxu0 %v3317_v30  ;;  %1873 = vmatprep.subr.bf16.mxu1 %v3328_v33  ;;  %v3406_v30 = vld [vmem:[#allocation5 + $0x26c] ss:$16 sps:$4 sm:$0xff]   ;;  %v3409_v33 = vld [vmem:[#allocation5 + $0x684] ss:$16 sps:$4 sm:$0xff]  }
  0xa4   :  { %1787 = vmatprep.subr.bf16.mxu0 %v3325_v32  ;;  %v3404_v32 = vld [vmem:[#allocation5 + $0x268] ss:$16 sps:$4 sm:$0xff]  }
  0xa6   :  { %1874 = vmatpush1.bf16.msra.mxu1 %v3326_v37  ;;  %v3418_v37 = vld [vmem:[#allocation5 + $0x2ac] ss:$16 sps:$4 sm:$0xff]  }
  0xa7   :  { %1788 = vmatpush1.bf16.msra.mxu0 %v3323_v36  ;;  %1875 = vmatprep.subr.bf16.mxu1 %v3334_v40  ;;  %v3410_v36 = vld [vmem:[#allocation5 + $0x288] ss:$16 sps:$4 sm:$0xff]  }
  0xa8   :  { %1789 = vmatprep.subr.bf16.mxu0 %v3331_v39  ;;  %v3413_v39 = vld [vmem:[#allocation5 + $0x6a0] ss:$16 sps:$4 sm:$0xff]   ;;  %v3416_v40 = vld [vmem:[#allocation5 + $0x2a8] ss:$16 sps:$4 sm:$0xff]  }
  0xaa   :  { %1876 = vmatpush1.bf16.msra.mxu1 %v3332_v42  ;;  %v3424_v42 = vld [vmem:[#allocation5 + $0x2cc] ss:$16 sps:$4 sm:$0xff]  }
  0xab   :  { %1790 = vmatpush1.bf16.msra.mxu0 %v3329_v41  ;;  %1877 = vmatprep.subr.bf16.mxu1 %v3340_v44  ;;  %v3421_v41 = vld [vmem:[#allocation5 + $0x6c4] ss:$16 sps:$4 sm:$0xff]   ;;  %v3422_v44 = vld [vmem:[#allocation5 + $0x2c8] ss:$16 sps:$4 sm:$0xff]  }
  0xac   :  { %1791 = vmatprep.subr.bf16.mxu0 %v3337_v43  ;;  %v3419_v43 = vld [vmem:[#allocation5 + $0x6c0] ss:$16 sps:$4 sm:$0xff]  }
  0xae   :  { %1878 = vmatpush1.bf16.msra.mxu1 %v3338_v46  ;;  %v3430_v46 = vld [vmem:[#allocation5 + $0x2ec] ss:$16 sps:$4 sm:$0xff]  }
  0xaf   :  { %1792 = vmatpush1.bf16.msra.mxu0 %v3335_v45  ;;  %1879 = vmatprep.subr.bf16.mxu1 %v3346_v48  ;;  %v3427_v45 = vld [vmem:[#allocation5 + $0x6e4] ss:$16 sps:$4 sm:$0xff]   ;;  %v3428_v48 = vld [vmem:[#allocation5 + $0x2e8] ss:$16 sps:$4 sm:$0xff]  }
  0xb0   :  { %1793 = vmatprep.subr.bf16.mxu0 %v3343_v47  ;;  %v3425_v47 = vld [vmem:[#allocation5 + $0x6e0] ss:$16 sps:$4 sm:$0xff]  }
  0xb2   :  { %1880 = vmatpush1.bf16.msra.mxu1 %v3344_v50  ;;  %v3436_v50 = vld [vmem:[#allocation5 + $0x30c] ss:$16 sps:$4 sm:$0xff]  }
  0xb3   :  { %1794 = vmatpush1.bf16.msra.mxu0 %v3341_v49  ;;  %1881 = vmatprep.subr.bf16.mxu1 %v3352_v52  ;;  %v3433_v49 = vld [vmem:[#allocation5 + $0x704] ss:$16 sps:$4 sm:$0xff]   ;;  %v3434_v52 = vld [vmem:[#allocation5 + $0x308] ss:$16 sps:$4 sm:$0xff]  }
  0xb4   :  { %1795 = vmatprep.subr.bf16.mxu0 %v3349_v51  ;;  %v3431_v51 = vld [vmem:[#allocation5 + $0x700] ss:$16 sps:$4 sm:$0xff]  }
  0xb6   :  { %1882 = vmatpush1.bf16.msra.mxu1 %v3350_v54  ;;  %v3442_v54 = vld [vmem:[#allocation5 + $0x32c] ss:$16 sps:$4 sm:$0xff]  }
  0xb7   :  { %1796 = vmatpush1.bf16.msra.mxu0 %v3347_v53  ;;  %1883 = vmatprep.subr.bf16.mxu1 %v3358_v57  ;;  %v3439_v53 = vld [vmem:[#allocation5 + $0x724] ss:$16 sps:$4 sm:$0xff]   ;;  %v3440_v57 = vld [vmem:[#allocation5 + $0x328] ss:$16 sps:$4 sm:$0xff]  }
  0xb8   :  { %1797 = vmatprep.subr.bf16.mxu0 %v3355_v56  ;;  %v3437_v56 = vld [vmem:[#allocation5 + $0x720] ss:$16 sps:$4 sm:$0xff]  }
  0xba   :  { %1884 = vmatpush1.bf16.msra.mxu1 %v3356_v59  ;;  %v3448_v59 = vld [vmem:[#allocation5 + $0x34c] ss:$16 sps:$4 sm:$0xff]  }
  0xbb   :  { %1798 = vmatpush1.bf16.msra.mxu0 %v3353_v58  ;;  %1885 = vmatprep.subr.bf16.mxu1 %v3364_v61  ;;  %v3445_v58 = vld [vmem:[#allocation5 + $0x744] ss:$16 sps:$4 sm:$0xff]   ;;  %v3446_v61 = vld [vmem:[#allocation5 + $0x348] ss:$16 sps:$4 sm:$0xff]  }
  0xbc   :  { %1799 = vmatprep.subr.bf16.mxu0 %v3361_v60  ;;  %v3443_v60 = vld [vmem:[#allocation5 + $0x740] ss:$16 sps:$4 sm:$0xff]  }
  0xbe   :  { %1886 = vmatpush1.bf16.msra.mxu1 %v3362_v63  ;;  %v3454_v63 = vld [vmem:[#allocation5 + $0x36c] ss:$16 sps:$4 sm:$0xff]  }
  0xbf   :  { %1800 = vmatpush1.bf16.msra.mxu0 %v3359_v62  ;;  %1887 = vmatprep.subr.bf16.mxu1 %v3370_v1  ;;  %v3451_v62 = vld [vmem:[#allocation5 + $0x764] ss:$16 sps:$4 sm:$0xff]   ;;  %v3452_v1 = vld [vmem:[#allocation5 + $0x368] ss:$16 sps:$4 sm:$0xff]  }
  0xc0   :  { %1801 = vmatprep.subr.bf16.mxu0 %v3367_v0  ;;  %v3449_v0 = vld [vmem:[#allocation5 + $0x760] ss:$16 sps:$4 sm:$0xff]  }
  0xc2   :  { %1888 = vmatpush1.bf16.msra.mxu1 %v3368_v3  ;;  %v3460_v3 = vld [vmem:[#allocation5 + $0x38c] ss:$16 sps:$4 sm:$0xff]  }
  0xc3   :  { %1802 = vmatpush1.bf16.msra.mxu0 %v3365_v2  ;;  %1889 = vmatprep.subr.bf16.mxu1 %v3376_v5  ;;  %v3457_v2 = vld [vmem:[#allocation5 + $0x784] ss:$16 sps:$4 sm:$0xff]   ;;  %v3458_v5 = vld [vmem:[#allocation5 + $0x388] ss:$16 sps:$4 sm:$0xff]  }
  0xc4   :  { %1803 = vmatprep.subr.bf16.mxu0 %v3373_v4  ;;  %v3455_v4 = vld [vmem:[#allocation5 + $0x780] ss:$16 sps:$4 sm:$0xff]  }
  0xc6   :  { %1890 = vmatpush1.bf16.msra.mxu1 %v3374_v7  ;;  %v3466_v7 = vld [vmem:[#allocation5 + $0x3ac] ss:$16 sps:$4 sm:$0xff]  }
  0xc7   :  { %1804 = vmatpush1.bf16.msra.mxu0 %v3371_v6  ;;  %1891 = vmatprep.subr.bf16.mxu1 %v3382_v11  ;;  %v3463_v6 = vld [vmem:[#allocation5 + $0x7a4] ss:$16 sps:$4 sm:$0xff]   ;;  %v3464_v11 = vld [vmem:[#allocation5 + $0x3a8] ss:$16 sps:$4 sm:$0xff]  }
  0xc8   :  { %1805 = vmatprep.subr.bf16.mxu0 %v3379_v10  ;;  %v3461_v10 = vld [vmem:[#allocation5 + $0x7a0] ss:$16 sps:$4 sm:$0xff]  }
  0xca   :  { %1892 = vmatpush1.bf16.msra.mxu1 %v3380_v13  ;;  %v3472_v13 = vld [vmem:[#allocation5 + $0x3cc] ss:$16 sps:$4 sm:$0xff]  }
  0xcb   :  { %1806 = vmatpush1.bf16.msra.mxu0 %v3377_v12  ;;  %1904 = vmatprep.subr.bf16.mxu1 %v3388_v15  ;;  %v3469_v12 = vld [vmem:[#allocation5 + $0x7c4] ss:$16 sps:$4 sm:$0xff]   ;;  %v3470_v15 = vld [vmem:[#allocation5 + $0x3c8] ss:$16 sps:$4 sm:$0xff]  }
  0xcc   :  { %1818 = vmatprep.subr.bf16.mxu0 %v3385_v14  ;;  %v3467_v14 = vld [vmem:[#allocation5 + $0x7c0] ss:$16 sps:$4 sm:$0xff]  }
  0xcd   :  { %1894 = vmatmul.mubr.bf16.vlgmr.msra.gmra.mrb[4].mxu1 %v3912_v8  ;;  %v3403_v8 = vld [vmem:[#allocation5 + $0x664] ss:$16 sps:$4 sm:$0xff]  }
  0xce   :  { %1808 = vmatmul.mubr.bf16.vlgmr.msra.gmra.mrb[0].mxu0 %v3929_v16  ;;  %1905 = vmatpush1.bf16.msra.mxu1 %v3386_v18  ;;  %v3478_v18 = vld [vmem:[#allocation5 + $0x3ec] ss:$16 sps:$4 sm:$0xff]  }
  0xcf   :  { %1819 = vmatpush1.bf16.msra.mxu0 %v3383_v17  ;;  %1906 = vmatprep.subr.bf16.mxu1 %v3394_v20  ;;  %v3475_v17 = vld [vmem:[#allocation5 + $0x7e4] ss:$16 sps:$4 sm:$0xff]   ;;  %v3476_v20 = vld [vmem:[#allocation5 + $0x3e8] ss:$16 sps:$4 sm:$0xff]  }
  0xd0   :  { %1820 = vmatprep.subr.bf16.mxu0 %v3391_v19  ;;  %1850 = vmatprep.mubr.bf16.mxu0 %v3939_v25  ;;  %v3473_v19 = vld [vmem:[#allocation5 + $0x7e0] ss:$16 sps:$4 sm:$0xff]  }
  0xd1   :  { %1936 = vmatprep.mubr.bf16.mxu1 %v3909_v55  ;;  %v3415_v55 = vld [vmem:[#allocation5 + $0x6a4] ss:$16 sps:$4 sm:$0xff]  }
  0xd2   :  { %1907 = vmatpush1.bf16.msra.mxu1 %v3392_v24  ;;  %v3479_v24 = vld [vmem:[#allocation5 + $0x408] ss:$16 sps:$4 sm:$0xff]  }
  0xd3   :  { %1821 = vmatpush1.bf16.msra.mxu0 %v3389_v23  ;;  %1908 = vmatprep.subr.bf16.mxu1 %v3400_v27  ;;  %v3481_v23 = vld [vmem:[#allocation5 + $0x40c] ss:$16 sps:$4 sm:$0xff]  }
  0xd4   :  { %1822 = vmatprep.subr.bf16.mxu0 %v3397_v26  ;;  %v3945_v26 = vcombine.low %v3931_v21, %v3933_v22  ;;  %v3484_v27 = vld [vmem:[#allocation5 + $0x42c] ss:$16 sps:$4 sm:$0xff]   ;;  %v3578_v21 = vld [vmem:[#allocation7 + $0x10] ss:$8 sps:$4 sm:$0xff]  }
  0xd5   :  { %v3583_v22 = vld [vmem:[#allocation7 + $0x24] ss:$8 sps:$4 sm:$0xff]  }
  0xd6   :  { %1909 = vmatpush1.bf16.msra.mxu1 %v3398_v29  ;;  %v3577_v29 = vld [vmem:[#allocation7 + $0x4] ss:$8 sps:$4 sm:$0xff]  }
  0xd7   :  { %1823 = vmatpush1.bf16.msra.mxu0 %v3395_v28  ;;  %1910 = vmatprep.subr.bf16.mxu1 %v3406_v30  ;;  %v3575_v28 = vld [vmem:[#allocation7] ss:$8 sps:$4 sm:$0xff]   ;;  %v3580_v30 = vld [vmem:[#allocation7 + $0x14] ss:$8 sps:$4 sm:$0xff]  }
  0xd8   :  { %1824 = vmatprep.subr.bf16.mxu0 %v3403_v8  ;;  %v3482_v8 = vld [vmem:[#allocation5 + $0x428] ss:$16 sps:$4 sm:$0xff]  }
  0xda   :  { %1911 = vmatpush1.bf16.msra.mxu1 %v3404_v32  ;;  %v3485_v32 = vld [vmem:[#allocation5 + $0x448] ss:$16 sps:$4 sm:$0xff]  }
  0xdb   :  { %1825 = vmatpush1.bf16.msra.mxu0 %v3401_v31  ;;  %1912 = vmatprep.subr.bf16.mxu1 %v3412_v34  ;;  %v3487_v31 = vld [vmem:[#allocation5 + $0x44c] ss:$16 sps:$4 sm:$0xff]   ;;  %v3488_v34 = vld [vmem:[#allocation5 + $0x468] ss:$16 sps:$4 sm:$0xff]  }
  0xdc   :  { %1826 = vmatprep.subr.bf16.mxu0 %v3409_v33  ;;  %v3490_v33 = vld [vmem:[#allocation5 + $0x46c] ss:$16 sps:$4 sm:$0xff]  }
  0xde   :  { %1913 = vmatpush1.bf16.msra.mxu1 %v3410_v36  ;;  %v3586_v36 = vld [vmem:[#allocation7 + $0x34] ss:$8 sps:$4 sm:$0xff]  }
  0xdf   :  { %1827 = vmatpush1.bf16.msra.mxu0 %v3407_v35  ;;  %1914 = vmatprep.subr.bf16.mxu1 %v3418_v37  ;;  %v3493_v35 = vld [vmem:[#allocation5 + $0x48c] ss:$16 sps:$4 sm:$0xff]   ;;  %v3491_v37 = vld [vmem:[#allocation5 + $0x488] ss:$16 sps:$4 sm:$0xff]  }
  0xe0   :  { %1828 = vmatprep.subr.bf16.mxu0 %v3415_v55  ;;  %v3589_v55 = vld [vmem:[#allocation7 + $0x44] ss:$8 sps:$4 sm:$0xff]  }
  0xe2   :  { %1915 = vmatpush1.bf16.msra.mxu1 %v3416_v40  ;;  %v3587_v40 = vld [vmem:[#allocation7 + $0x40] ss:$8 sps:$4 sm:$0xff]  }
  0xe3   :  { %1829 = vmatpush1.bf16.msra.mxu0 %v3413_v39  ;;  %1916 = vmatprep.subr.bf16.mxu1 %v3424_v42  ;;  %v3496_v39 = vld [vmem:[#allocation5 + $0x4ac] ss:$16 sps:$4 sm:$0xff]   ;;  %v3494_v42 = vld [vmem:[#allocation5 + $0x4a8] ss:$16 sps:$4 sm:$0xff]  }
  0xe4   :  { %1830 = vmatprep.subr.bf16.mxu0 %v3421_v41  ;;  %v3592_v41 = vld [vmem:[#allocation7 + $0x54] ss:$8 sps:$4 sm:$0xff]  }
  0xe6   :  { %1917 = vmatpush1.bf16.msra.mxu1 %v3422_v44  ;;  %v3590_v44 = vld [vmem:[#allocation7 + $0x50] ss:$8 sps:$4 sm:$0xff]  }
  0xe7   :  { %1831 = vmatpush1.bf16.msra.mxu0 %v3419_v43  ;;  %1918 = vmatprep.subr.bf16.mxu1 %v3430_v46  ;;  %v3499_v43 = vld [vmem:[#allocation5 + $0x4cc] ss:$16 sps:$4 sm:$0xff]   ;;  %v3497_v46 = vld [vmem:[#allocation5 + $0x4c8] ss:$16 sps:$4 sm:$0xff]  }
  0xe8   :  { %1832 = vmatprep.subr.bf16.mxu0 %v3427_v45  ;;  %v3595_v45 = vld [vmem:[#allocation7 + $0x64] ss:$8 sps:$4 sm:$0xff]  }
  0xea   :  { %1919 = vmatpush1.bf16.msra.mxu1 %v3428_v48  ;;  %v3593_v48 = vld [vmem:[#allocation7 + $0x60] ss:$8 sps:$4 sm:$0xff]  }
  0xeb   :  { %1833 = vmatpush1.bf16.msra.mxu0 %v3425_v47  ;;  %1920 = vmatprep.subr.bf16.mxu1 %v3436_v50  ;;  %v3502_v47 = vld [vmem:[#allocation5 + $0x4ec] ss:$16 sps:$4 sm:$0xff]   ;;  %v3500_v50 = vld [vmem:[#allocation5 + $0x4e8] ss:$16 sps:$4 sm:$0xff]  }
  0xec   :  { %1834 = vmatprep.subr.bf16.mxu0 %v3433_v49  ;;  %v3598_v49 = vld [vmem:[#allocation7 + $0x74] ss:$8 sps:$4 sm:$0xff]  }
  0xee   :  { %1921 = vmatpush1.bf16.msra.mxu1 %v3434_v52  ;;  %v3596_v52 = vld [vmem:[#allocation7 + $0x70] ss:$8 sps:$4 sm:$0xff]  }
  0xef   :  { %1835 = vmatpush1.bf16.msra.mxu0 %v3431_v51  ;;  %1922 = vmatprep.subr.bf16.mxu1 %v3442_v54  ;;  %v3505_v51 = vld [vmem:[#allocation5 + $0x50c] ss:$16 sps:$4 sm:$0xff]   ;;  %v3503_v54 = vld [vmem:[#allocation5 + $0x508] ss:$16 sps:$4 sm:$0xff]  }
  0xf0   :  { %1836 = vmatprep.subr.bf16.mxu0 %v3439_v53  ;;  %v3601_v53 = vld [vmem:[#allocation7 + $0x84] ss:$8 sps:$4 sm:$0xff]  }
  0xf2   :  { %1923 = vmatpush1.bf16.msra.mxu1 %v3440_v57  ;;  %v3599_v57 = vld [vmem:[#allocation7 + $0x80] ss:$8 sps:$4 sm:$0xff]  }
  0xf3   :  { %1837 = vmatpush1.bf16.msra.mxu0 %v3437_v56  ;;  %1924 = vmatprep.subr.bf16.mxu1 %v3448_v59  ;;  %v3508_v56 = vld [vmem:[#allocation5 + $0x52c] ss:$16 sps:$4 sm:$0xff]   ;;  %v3506_v59 = vld [vmem:[#allocation5 + $0x528] ss:$16 sps:$4 sm:$0xff]  }
  0xf4   :  { %1838 = vmatprep.subr.bf16.mxu0 %v3445_v58  ;;  %v3604_v58 = vld [vmem:[#allocation7 + $0x94] ss:$8 sps:$4 sm:$0xff]  }
  0xf6   :  { %1925 = vmatpush1.bf16.msra.mxu1 %v3446_v61  ;;  %v3602_v61 = vld [vmem:[#allocation7 + $0x90] ss:$8 sps:$4 sm:$0xff]  }
  0xf7   :  { %1839 = vmatpush1.bf16.msra.mxu0 %v3443_v60  ;;  %1926 = vmatprep.subr.bf16.mxu1 %v3454_v63  ;;  %v3511_v60 = vld [vmem:[#allocation5 + $0x54c] ss:$16 sps:$4 sm:$0xff]   ;;  %v3509_v63 = vld [vmem:[#allocation5 + $0x548] ss:$16 sps:$4 sm:$0xff]  }
  0xf8   :  { %1840 = vmatprep.subr.bf16.mxu0 %v3451_v62  ;;  %v3607_v62 = vld [vmem:[#allocation7 + $0xa4] ss:$8 sps:$4 sm:$0xff]  }
  0xfa   :  { %1927 = vmatpush1.bf16.msra.mxu1 %v3452_v1  ;;  %v3605_v1 = vld [vmem:[#allocation7 + $0xa0] ss:$8 sps:$4 sm:$0xff]  }
  0xfb   :  { %1841 = vmatpush1.bf16.msra.mxu0 %v3449_v0  ;;  %1928 = vmatprep.subr.bf16.mxu1 %v3460_v3  ;;  %v3514_v0 = vld [vmem:[#allocation5 + $0x56c] ss:$16 sps:$4 sm:$0xff]   ;;  %v3512_v3 = vld [vmem:[#allocation5 + $0x568] ss:$16 sps:$4 sm:$0xff]  }
  0xfc   :  { %1842 = vmatprep.subr.bf16.mxu0 %v3457_v2  ;;  %v3610_v2 = vld [vmem:[#allocation7 + $0xb4] ss:$8 sps:$4 sm:$0xff]  }
  0xfe   :  { %1929 = vmatpush1.bf16.msra.mxu1 %v3458_v5  ;;  %v3608_v5 = vld [vmem:[#allocation7 + $0xb0] ss:$8 sps:$4 sm:$0xff]  }
  0xff   :  { %1843 = vmatpush1.bf16.msra.mxu0 %v3455_v4  ;;  %1930 = vmatprep.subr.bf16.mxu1 %v3466_v7  ;;  %v3517_v4 = vld [vmem:[#allocation5 + $0x58c] ss:$16 sps:$4 sm:$0xff]   ;;  %v3515_v7 = vld [vmem:[#allocation5 + $0x588] ss:$16 sps:$4 sm:$0xff]  }
 0x100   :  { %1844 = vmatprep.subr.bf16.mxu0 %v3463_v6  ;;  %v3613_v6 = vld [vmem:[#allocation7 + $0xc4] ss:$8 sps:$4 sm:$0xff]  }
 0x102   :  { %1931 = vmatpush1.bf16.msra.mxu1 %v3464_v11  ;;  %v3611_v11 = vld [vmem:[#allocation7 + $0xc0] ss:$8 sps:$4 sm:$0xff]  }
 0x103   :  { %1845 = vmatpush1.bf16.msra.mxu0 %v3461_v10  ;;  %1932 = vmatprep.subr.bf16.mxu1 %v3472_v13  ;;  %v3520_v10 = vld [vmem:[#allocation5 + $0x5ac] ss:$16 sps:$4 sm:$0xff]  }
 0x104   :  { %1846 = vmatprep.subr.bf16.mxu0 %v3469_v12  ;;  %v3518_v12 = vld [vmem:[#allocation5 + $0x5a8] ss:$16 sps:$4 sm:$0xff]   ;;  %v3523_v13 = vld [vmem:[#allocation5 + $0x5cc] ss:$16 sps:$4 sm:$0xff]  }
 0x106   :  { %1933 = vmatpush1.bf16.msra.mxu1 %v3470_v15  ;;  %v3526_v15 = vld [vmem:[#allocation5 + $0x5ec] ss:$16 sps:$4 sm:$0xff]  }
 0x107   :  { %1847 = vmatpush1.bf16.msra.mxu0 %v3467_v14  ;;  %1934 = vmatprep.subr.bf16.mxu1 %v3478_v18  ;;  %v3521_v14 = vld [vmem:[#allocation5 + $0x5c8] ss:$16 sps:$4 sm:$0xff]   ;;  %v3529_v18 = vld [vmem:[#allocation5 + $0x60c] ss:$16 sps:$4 sm:$0xff]  }
 0x108   :  { %1848 = vmatprep.subr.bf16.mxu0 %v3475_v17  ;;  %v3524_v17 = vld [vmem:[#allocation5 + $0x5e8] ss:$16 sps:$4 sm:$0xff]  }
 0x10a   :  { %1935 = vmatpush1.bf16.msra.mxu1 %v3476_v20  ;;  %v3532_v20 = vld [vmem:[#allocation5 + $0x62c] ss:$16 sps:$4 sm:$0xff]  }
 0x10b   :  { %1849 = vmatpush1.bf16.msra.mxu0 %v3473_v19  ;;  %1947 = vmatprep.subr.bf16.mxu1 %v3481_v23  ;;  %v3527_v19 = vld [vmem:[#allocation5 + $0x608] ss:$16 sps:$4 sm:$0xff]  }
 0x10c   :  { %2457 = vmatprep.subr.bf16.mxu0 %v3577_v29  ;;  %v3530_v23 = vld [vmem:[#allocation5 + $0x628] ss:$16 sps:$4 sm:$0xff]  }
 0x10d   :  { %1937 = vmatmul.mubr.bf16.vlgmr.msra.gmra.mrb[4].mxu1 %v3914_v9  ;;  %v3581_v9 = vld [vmem:[#allocation7 + $0x20] ss:$8 sps:$4 sm:$0xff]  }
 0x10e   :  { %1851 = vmatmul.mubr.bf16.vlgmr.msra.gmra.mrb[0].mxu0 %v3945_v26  ;;  %1948 = vmatpush1.bf16.msra.mxu1 %v3479_v24  ;;  %v3535_v24 = vld [vmem:[#allocation5 + $0x64c] ss:$16 sps:$4 sm:$0xff]   ;;  %v3536_v29 = vld [vmem:[#allocation5 + $0x668] ss:$16 sps:$4 sm:$0xff]  }
 0x10f   :  { %1979 = vmatprep.mubr.bf16.mxu1 %v3924_v38  ;;  %1949 = vmatprep.subr.bf16.mxu1 %v3484_v27  ;;  %v3584_v38 = vld [vmem:[#allocation7 + $0x30] ss:$8 sps:$4 sm:$0xff]  }
 0x110   :  { %2458 = vmatpush1.bf16.msra.mxu0 %v3575_v28  ;;  %v3533_v27 = vld [vmem:[#allocation5 + $0x648] ss:$16 sps:$4 sm:$0xff]   ;;  %v3538_v28 = vld [vmem:[#allocation5 + $0x66c] ss:$16 sps:$4 sm:$0xff]  }
 0x111   :  { %2459 = vmatprep.subr.bf16.mxu0 %v3580_v30  ;;  %v3539_v30 = vld [vmem:[#allocation5 + $0x688] ss:$16 sps:$4 sm:$0xff]  }
 0x112   :  { %1950 = vmatpush1.bf16.msra.mxu1 %v3482_v8  ;;  %v3541_v8 = vld [vmem:[#allocation5 + $0x68c] ss:$16 sps:$4 sm:$0xff]  }
 0x113   :  { %1951 = vmatprep.subr.bf16.mxu1 %v3487_v31  ;;  %v3544_v31 = vld [vmem:[#allocation5 + $0x6ac] ss:$16 sps:$4 sm:$0xff]  }
 0x114   :  { %2460 = vmatpush1.bf16.msra.mxu0 %v3578_v21  ;;  %v3616_v21 = vld [vmem:[#allocation7 + $0xd4] ss:$8 sps:$4 sm:$0xff]  }
 0x115   :  { %2461 = vmatprep.subr.bf16.mxu0 %v3583_v22  ;;  %v3547_v22 = vld [vmem:[#allocation5 + $0x6cc] ss:$16 sps:$4 sm:$0xff]  }
 0x116   :  { %1952 = vmatpush1.bf16.msra.mxu1 %v3485_v32 }
 0x117   :  { %1953 = vmatprep.subr.bf16.mxu1 %v3490_v33 }
 0x118   :  { %2462 = vmatpush1.bf16.msra.mxu0 %v3581_v9  ;;  %v3545_v9 = vld [vmem:[#allocation5 + $0x6c8] ss:$16 sps:$4 sm:$0xff]  }
 0x119   :  { %2463 = vmatprep.subr.bf16.mxu0 %v3586_v36 }
 0x11a   :  { %1954 = vmatpush1.bf16.msra.mxu1 %v3488_v34 }
 0x11b   :  { %1955 = vmatprep.subr.bf16.mxu1 %v3493_v35  ;;  %v3619_v35 = vld [vmem:[#allocation7 + $0xe4] ss:$8 sps:$4 sm:$0xff]  }
 0x11c   :  { %2464 = vmatpush1.bf16.msra.mxu0 %v3584_v38  ;;  %v3550_v38 = vld [vmem:[#allocation5 + $0x6ec] ss:$16 sps:$4 sm:$0xff]  }
 0x11d   :  { %2465 = vmatprep.subr.bf16.mxu0 %v3589_v55  ;;  %v3617_v55 = vld [vmem:[#allocation7 + $0xe0] ss:$8 sps:$4 sm:$0xff]  }
 0x11e   :  { %1956 = vmatpush1.bf16.msra.mxu1 %v3491_v37  ;;  %v3548_v37 = vld [vmem:[#allocation5 + $0x6e8] ss:$16 sps:$4 sm:$0xff]  }
 0x11f   :  { %1957 = vmatprep.subr.bf16.mxu1 %v3496_v39  ;;  %v3622_v39 = vld [vmem:[#allocation7 + $0xf4] ss:$8 sps:$4 sm:$0xff]  }
 0x120   :  { %2466 = vmatpush1.bf16.msra.mxu0 %v3587_v40  ;;  %v3553_v40 = vld [vmem:[#allocation5 + $0x70c] ss:$16 sps:$4 sm:$0xff]  }
 0x121   :  { %2467 = vmatprep.subr.bf16.mxu0 %v3592_v41  ;;  %v3620_v41 = vld [vmem:[#allocation7 + $0xf0] ss:$8 sps:$4 sm:$0xff]  }
 0x122   :  { %1958 = vmatpush1.bf16.msra.mxu1 %v3494_v42  ;;  %v3551_v42 = vld [vmem:[#allocation5 + $0x708] ss:$16 sps:$4 sm:$0xff]  }
 0x123   :  { %1959 = vmatprep.subr.bf16.mxu1 %v3499_v43  ;;  %v3556_v43 = vld [vmem:[#allocation5 + $0x72c] ss:$16 sps:$4 sm:$0xff]  }
 0x124   :  { %2468 = vmatpush1.bf16.msra.mxu0 %v3590_v44  ;;  %v3625_v44 = vld [vmem:[#allocation7 + $0x104] ss:$8 sps:$4 sm:$0xff]  }
 0x125   :  { %2469 = vmatprep.subr.bf16.mxu0 %v3595_v45  ;;  %v3554_v45 = vld [vmem:[#allocation5 + $0x728] ss:$16 sps:$4 sm:$0xff]  }
 0x126   :  { %1960 = vmatpush1.bf16.msra.mxu1 %v3497_v46  ;;  %v3559_v46 = vld [vmem:[#allocation5 + $0x74c] ss:$16 sps:$4 sm:$0xff]  }
 0x127   :  { %1961 = vmatprep.subr.bf16.mxu1 %v3502_v47  ;;  %v3557_v47 = vld [vmem:[#allocation5 + $0x748] ss:$16 sps:$4 sm:$0xff]  }
 0x128   :  { %2470 = vmatpush1.bf16.msra.mxu0 %v3593_v48  ;;  %v3562_v48 = vld [vmem:[#allocation5 + $0x76c] ss:$16 sps:$4 sm:$0xff]  }
 0x129   :  { %2471 = vmatprep.subr.bf16.mxu0 %v3598_v49  ;;  %v3560_v49 = vld [vmem:[#allocation5 + $0x768] ss:$16 sps:$4 sm:$0xff]  }
 0x12a   :  { %1962 = vmatpush1.bf16.msra.mxu1 %v3500_v50  ;;  %v3565_v50 = vld [vmem:[#allocation5 + $0x78c] ss:$16 sps:$4 sm:$0xff]  }
 0x12b   :  { %1963 = vmatprep.subr.bf16.mxu1 %v3505_v51  ;;  %v3563_v51 = vld [vmem:[#allocation5 + $0x788] ss:$16 sps:$4 sm:$0xff]  }
 0x12c   :  { %2472 = vmatpush1.bf16.msra.mxu0 %v3596_v52  ;;  %v3568_v52 = vld [vmem:[#allocation5 + $0x7ac] ss:$16 sps:$4 sm:$0xff]  }
 0x12d   :  { %2473 = vmatprep.subr.bf16.mxu0 %v3601_v53  ;;  %v3566_v53 = vld [vmem:[#allocation5 + $0x7a8] ss:$16 sps:$4 sm:$0xff]  }
 0x12e   :  { %1964 = vmatpush1.bf16.msra.mxu1 %v3503_v54  ;;  %v3571_v54 = vld [vmem:[#allocation5 + $0x7cc] ss:$16 sps:$4 sm:$0xff]  }
 0x12f   :  { %1965 = vmatprep.subr.bf16.mxu1 %v3508_v56  ;;  %v3569_v56 = vld [vmem:[#allocation5 + $0x7c8] ss:$16 sps:$4 sm:$0xff]  }
 0x130   :  { %2474 = vmatpush1.bf16.msra.mxu0 %v3599_v57  ;;  %v3574_v57 = vld [vmem:[#allocation5 + $0x7ec] ss:$16 sps:$4 sm:$0xff]  }
 0x131   :  { %2475 = vmatprep.subr.bf16.mxu0 %v3604_v58  ;;  %v3572_v58 = vld [vmem:[#allocation5 + $0x7e8] ss:$16 sps:$4 sm:$0xff]  }
 0x132   :  { %1966 = vmatpush1.bf16.msra.mxu1 %v3506_v59  ;;  %v349_v59 = vlaneseq }
 0x133   :  { %1967 = vmatprep.subr.bf16.mxu1 %v3511_v60 }
 0x134   :  { %2476 = vmatpush1.bf16.msra.mxu0 %v3602_v61  ;;  %v3959_v60 = vshrl.u32 %v349_v59, 7  ;;  %v3664_v59 = vld [vmem:[#allocation7 + $0x1d4] ss:$8 sps:$4 sm:$0xff]  }
 0x135   :  { %2477 = vmatprep.subr.bf16.mxu0 %v3607_v62  ;;  %v3965_v62 = vld [vmem:[%s4008_s2] sm:$0xf] }
 0x136   :  { %1968 = vmatpush1.bf16.msra.mxu1 %v3509_v63  ;;  %v351_v61 = vsub.s32 0, %v3959_v60  ;;  %v355_v63 = vsub.s32 1, %v3959_v60 }
 0x137   :  { %1969 = vmatprep.subr.bf16.mxu1 %v3514_v0 }
 0x138   :  { %2478 = vmatpush1.bf16.msra.mxu0 %v3605_v1  ;;  %v352_v0 = vrot.slane %v3965_v62, %v351_v61 }
 0x139   :  { %2479 = vmatprep.subr.bf16.mxu0 %v3610_v2 }
 0x13a   :  { %1970 = vmatpush1.bf16.msra.mxu1 %v3512_v3 }
 0x13b   :  { %1971 = vmatprep.subr.bf16.mxu1 %v3517_v4 }
 0x13c   :  { %2480 = vmatpush1.bf16.msra.mxu0 %v3608_v5 }
 0x13d   :  { %2481 = vmatprep.subr.bf16.mxu0 %v3613_v6 }
 0x13e   :  { %1972 = vmatpush1.bf16.msra.mxu1 %v3515_v7 }
 0x13f   :  { %1973 = vmatprep.subr.bf16.mxu1 %v3520_v10 }
 0x140   :  { %2482 = vmatpush1.bf16.msra.mxu0 %v3611_v11 }
 0x141   :  { %2483 = vmatprep.subr.bf16.mxu0 %v3616_v21  ;;  %v3673_v21 = vld [vmem:[#allocation8 + $0x48] sm:$0xff]  }
 0x142   :  { %1974 = vmatpush1.bf16.msra.mxu1 %v3518_v12 }
 0x143   :  { %1975 = vmatprep.subr.bf16.mxu1 %v3523_v13 }
 0x146   :  { %1976 = vmatpush1.bf16.msra.mxu1 %v3521_v14 }
 0x147   :  { %1977 = vmatprep.subr.bf16.mxu1 %v3526_v15 }
 0x14a   :  { %1978 = vmatpush1.bf16.msra.mxu1 %v3524_v17 }
 0x14b   :  { %1990 = vmatprep.subr.bf16.mxu1 %v3529_v18 }
 0x14d   :  { %1980 = vmatmul.mubr.bf16.vlgmr.msra.gmra.mrb[4].mxu1 %v3929_v16  ;;  %v3542_v16 = vld [vmem:[#allocation5 + $0x6a8] ss:$16 sps:$4 sm:$0xff]  }
 0x14e   :  { %1991 = vmatpush1.bf16.msra.mxu1 %v3527_v19  ;;  %2022 = vmatprep.mubr.bf16.mxu1 %v3939_v25  ;;  %v3614_v25 = vld [vmem:[#allocation7 + $0xd0] ss:$8 sps:$4 sm:$0xff]  }
 0x14f   :  { %1992 = vmatprep.subr.bf16.mxu1 %v3532_v20  ;;  %2484 = vmatpush1.bf16.msra.mxu0 %v3614_v25  ;;  %v3631_v25 = vld [vmem:[#allocation7 + $0x124] ss:$8 sps:$4 sm:$0xff]  }
 0x150   :  { %2485 = vmatprep.subr.bf16.mxu0 %v3619_v35  ;;  %v3676_v35 = vld [vmem:[#allocation8 + $0x10] sm:$0xff]  }
 0x152   :  { %1993 = vmatpush1.bf16.msra.mxu1 %v3530_v23 }
 0x153   :  { %1994 = vmatprep.subr.bf16.mxu1 %v3535_v24  ;;  %2486 = vmatpush1.bf16.msra.mxu0 %v3617_v55  ;;  %v3637_v55 = vld [vmem:[#allocation7 + $0x144] ss:$8 sps:$4 sm:$0xff]  }
 0x154   :  { %2487 = vmatprep.subr.bf16.mxu0 %v3622_v39  ;;  %v3679_v39 = vld [vmem:[#allocation8 + $0x60] sm:$0xff]  }
 0x156   :  { %1995 = vmatpush1.bf16.msra.mxu1 %v3533_v27 }
 0x157   :  { %1996 = vmatprep.subr.bf16.mxu1 %v3538_v28  ;;  %2488 = vmatpush1.bf16.msra.mxu0 %v3620_v41  ;;  %v3640_v41 = vld [vmem:[#allocation7 + $0x154] ss:$8 sps:$4 sm:$0xff]  }
 0x158   :  { %2500 = vmatprep.subr.bf16.mxu0 %v3625_v44  ;;  %v3643_v44 = vld [vmem:[#allocation7 + $0x164] ss:$8 sps:$4 sm:$0xff]  }
 0x15a   :  { %1997 = vmatpush1.bf16.msra.mxu1 %v3536_v29 }
 0x15b   :  { %1998 = vmatprep.subr.bf16.mxu1 %v3541_v8  ;;  %v3623_v8 = vld [vmem:[#allocation7 + $0x100] ss:$8 sps:$4 sm:$0xff]  }
 0x15e   :  { %1999 = vmatpush1.bf16.msra.mxu1 %v3539_v30  ;;  %v3628_v30 = vld [vmem:[#allocation7 + $0x114] ss:$8 sps:$4 sm:$0xff]  }
 0x15f   :  { %2000 = vmatprep.subr.bf16.mxu1 %v3544_v31  ;;  %v3671_v31 = vld [vmem:[#allocation8 + $0x40] sm:$0xff]  }
 0x160   :  { %v3952_v32 = vpop.f32.mrb[0].mxu1 }
 0x161   :  { %v3954_v33 = vpop.f32.mrb[1].mxu1  ;;  %v1724_v1 = vadd.f32 %v3952_v32, %v352_v0  ;;  %v3674_v32 = vld [vmem:[#allocation8 + $0x8] sm:$0xff]  }
 0x162   :  { %v3956_v34 = vpop.f32.mrb[2].mxu1  ;;  %2001 = vmatpush1.bf16.msra.mxu1 %v3542_v16  ;;  %v3672_v16 = vld [vmem:[#allocation8] sm:$0xff]  }
 0x163   :  { %v1729_v36 = vpop.f32.mrb[3].mxu1  ;;  %2002 = vmatprep.subr.bf16.mxu1 %v3547_v22  ;;  %v1728_v4 = vadd.f32 %v3956_v34, %v352_v0  ;;  %v3626_v22 = vld [vmem:[#allocation7 + $0x110] ss:$8 sps:$4 sm:$0xff]   ;;  %v3629_v34 = vld [vmem:[#allocation7 + $0x120] ss:$8 sps:$4 sm:$0xff]  }
 0x164   :  { %v3662_v0 = vld [vmem:[#allocation7 + $0x1d0] ss:$8 sps:$4 sm:$0xff]  }
 0x166   :  { %2003 = vmatpush1.bf16.msra.mxu1 %v3545_v9  ;;  %v3634_v9 = vld [vmem:[#allocation7 + $0x134] ss:$8 sps:$4 sm:$0xff]  }
 0x167   :  { %2004 = vmatprep.subr.bf16.mxu1 %v3550_v38  ;;  %v3632_v38 = vld [vmem:[#allocation7 + $0x130] ss:$8 sps:$4 sm:$0xff]  }
 0x16a   :  { %2005 = vmatpush1.bf16.msra.mxu1 %v3548_v37  ;;  %v3678_v37 = vld [vmem:[#allocation8 + $0x18] sm:$0xff]  }
 0x16b   :  { %2006 = vmatprep.subr.bf16.mxu1 %v3553_v40  ;;  %v3635_v40 = vld [vmem:[#allocation7 + $0x140] ss:$8 sps:$4 sm:$0xff]  }
 0x16e   :  { %2007 = vmatpush1.bf16.msra.mxu1 %v3551_v42  ;;  %v3680_v42 = vld [vmem:[#allocation8 + $0x20] sm:$0xff]  }
 0x16f   :  { %2008 = vmatprep.subr.bf16.mxu1 %v3556_v43  ;;  %v3638_v43 = vld [vmem:[#allocation7 + $0x150] ss:$8 sps:$4 sm:$0xff]  }
 0x172   :  { %2009 = vmatpush1.bf16.msra.mxu1 %v3554_v45  ;;  %v3641_v45 = vld [vmem:[#allocation7 + $0x160] ss:$8 sps:$4 sm:$0xff]  }
 0x173   :  { %2010 = vmatprep.subr.bf16.mxu1 %v3559_v46  ;;  %v3646_v46 = vld [vmem:[#allocation7 + $0x174] ss:$8 sps:$4 sm:$0xff]  }
 0x176   :  { %2011 = vmatpush1.bf16.msra.mxu1 %v3557_v47  ;;  %v3644_v47 = vld [vmem:[#allocation7 + $0x170] ss:$8 sps:$4 sm:$0xff]  }
 0x177   :  { %2012 = vmatprep.subr.bf16.mxu1 %v3562_v48  ;;  %v3649_v48 = vld [vmem:[#allocation7 + $0x184] ss:$8 sps:$4 sm:$0xff]  }
 0x17a   :  { %2013 = vmatpush1.bf16.msra.mxu1 %v3560_v49  ;;  %v3647_v49 = vld [vmem:[#allocation7 + $0x180] ss:$8 sps:$4 sm:$0xff]  }
 0x17b   :  { %2014 = vmatprep.subr.bf16.mxu1 %v3565_v50  ;;  %v3652_v50 = vld [vmem:[#allocation7 + $0x194] ss:$8 sps:$4 sm:$0xff]  }
 0x17e   :  { %2015 = vmatpush1.bf16.msra.mxu1 %v3563_v51  ;;  %v3650_v51 = vld [vmem:[#allocation7 + $0x190] ss:$8 sps:$4 sm:$0xff]  }
 0x17f   :  { %2016 = vmatprep.subr.bf16.mxu1 %v3568_v52  ;;  %v3655_v52 = vld [vmem:[#allocation7 + $0x1a4] ss:$8 sps:$4 sm:$0xff]  }
 0x182   :  { %2017 = vmatpush1.bf16.msra.mxu1 %v3566_v53  ;;  %v3653_v53 = vld [vmem:[#allocation7 + $0x1a0] ss:$8 sps:$4 sm:$0xff]  }
 0x183   :  { %2018 = vmatprep.subr.bf16.mxu1 %v3571_v54  ;;  %v3658_v54 = vld [vmem:[#allocation7 + $0x1b4] ss:$8 sps:$4 sm:$0xff]  }
 0x186   :  { %2019 = vmatpush1.bf16.msra.mxu1 %v3569_v56  ;;  %v3656_v56 = vld [vmem:[#allocation7 + $0x1b0] ss:$8 sps:$4 sm:$0xff]  }
 0x187   :  { %2020 = vmatprep.subr.bf16.mxu1 %v3574_v57  ;;  %v3661_v57 = vld [vmem:[#allocation7 + $0x1c4] ss:$8 sps:$4 sm:$0xff]  }
 0x18a   :  { %2021 = vmatpush1.bf16.msra.mxu1 %v3572_v58  ;;  %v3659_v58 = vld [vmem:[#allocation7 + $0x1c0] ss:$8 sps:$4 sm:$0xff]  }
 0x18b   :  { %3116 = vmatprep.subr.bf16.mxu1 %v3671_v31  ;;  %v3681_v31 = vld [vmem:[#allocation8 + $0x68] sm:$0xff]  }
 0x18d   :  { %2023 = vmatmul.mubr.bf16.vlgmr.msra.gmra.mrb[4].mxu1 %v3945_v26  ;;  %v356_v26 = vrot.slane %v3965_v62, %v355_v63 }
 0x18e   :  { %3117 = vmatpush3.bf16.msra.mxu1 %v3672_v16  ;;  %v3682_v16 = vld [vmem:[#allocation8 + $0x28] sm:$0xff]  }
 0x18f   :  { %v1726_v2 = vadd.f32 %v3954_v33, %v356_v26  ;;  %v1730_v7 = vadd.f32 %v1729_v36, %v356_v26  ;;  %3118 = vmatprep.subr.bf16.mxu1 %v3673_v21  ;;  %v3675_v33 = vld [vmem:[#allocation8 + $0x50] sm:$0xff]   ;;  %v3677_v36 = vld [vmem:[#allocation8 + $0x58] sm:$0xff]   ;;  %v3667_v26 = vld [vmem:[#allocation7 + $0x1e4] ss:$8 sps:$4 sm:$0xff]  }
 0x190   :  { %v3683_v21 = vld [vmem:[#allocation8 + $0x70] sm:$0xff]  }
 0x192   :  { %3119 = vmatpush3.bf16.msra.mxu1 %v3674_v32  ;;  %v3686_v32 = vld [vmem:[#allocation8 + $0x38] sm:$0xff]  }
 0x193   :  { %3120 = vmatprep.subr.bf16.mxu1 %v3675_v33  ;;  %v2125_v33 = vld [vmem:[%s4010_s4] sm:$0x3] }
 0x196   :  { %3121 = vmatpush3.bf16.msra.mxu1 %v3676_v35 }
 0x197   :  { %3122 = vmatprep.subr.bf16.mxu1 %v3677_v36 }
 0x19a   :  { %3123 = vmatpush3.bf16.msra.mxu1 %v3678_v37 }
 0x19b   :  { %3124 = vmatprep.subr.bf16.mxu1 %v3679_v39 }
 0x19e   :  { %3125 = vmatpush3.bf16.msra.mxu1 %v3680_v42 }
 0x19f   :  { %3126 = vmatprep.subr.bf16.mxu1 %v3681_v31 }
 0x1a2   :  { %3127 = vmatpush3.bf16.msra.mxu1 %v3682_v16 }
 0x1a3   :  { %3128 = vmatprep.subr.bf16.mxu1 %v3683_v21 }
 0x1e1   :  { %v1852_v3 = vpop.f32.mrb[0].mxu0 }
 0x1e2   :  { %v3139_v5 = vadd.f32 %v1852_v3, %v1724_v1  ;;  %v1854_v6 = vpop.f32.mrb[1].mxu0  ;;  %v3665_v1 = vld [vmem:[#allocation7 + $0x1e0] ss:$8 sps:$4 sm:$0xff]   ;;  %v3668_v3 = vld [vmem:[#allocation7 + $0x1f0] ss:$8 sps:$4 sm:$0xff]  }
 0x1e3   :  { %v3141_v10 = vadd.f32 %v1854_v6, %v1726_v2  ;;  %v1856_v11 = vpop.f32.mrb[2].mxu0  ;;  %v3670_v2 = vld [vmem:[#allocation7 + $0x1f4] ss:$8 sps:$4 sm:$0xff]  }
 0x1e4   :  { %v2041_v12 = vmul.f32 0.2, %v3139_v5  ;;  %v3143_v13 = vadd.f32 %v1856_v11, %v1728_v4  ;;  %v1858_v14 = vpop.f32.mrb[3].mxu0  ;;  %vm2033_vm0 = vcmp.gt.f32.partialorder %v3139_v5, 0.0  ;;  %v359_v4 = vsub.s32 2, %v3959_v60 }
 0x1e5   :  { %v2042_v15 = vmul.f32 0.2, %v3141_v10  ;;  %v3145_v17 = vadd.f32 %v1858_v14, %v1730_v7  ;;  %vm2034_vm1 = vcmp.gt.f32.partialorder %v3141_v10, 0.0 }
 0x1e6   :  { %vm2037_vm2 = vcmp.gt.f32.partialorder %v3143_v13, 0.0  ;;  %v2045_v18 = vmul.f32 0.2, %v3143_v13  ;;  %v2049_v20 = vsel %vm2033_vm0, %v3139_v5, %v2041_v12  ;;  %v363_v5 = vsub.s32 3, %v3959_v60 }
 0x1e7   :  { %vm2038_vm3 = vcmp.gt.f32.partialorder %v3145_v17, 0.0  ;;  %v2046_v19 = vmul.f32 0.2, %v3145_v17  ;;  %v2050_v27 = vsel %vm2034_vm1, %v3141_v10, %v2042_v15  ;;  %v360_v6 = vrot.slane %v3965_v62, %v359_v4 }
 0x1e8   :  { %v2053_v23 = vsel %vm2037_vm2, %v3143_v13, %v2045_v18  ;;  %v364_v7 = vrot.slane %v3965_v62, %v363_v5 }
 0x1e9   :  { %v2057_v24 = vpack.c.bf16 %v2053_v23, %v2049_v20  ;;  %v2054_v28 = vsel %vm2038_vm3, %v3145_v17, %v2046_v19 }
 0x1ea   :  { %v2058_v29 = vpack.c.bf16 %v2054_v28, %v2050_v27 }
 0x1ec   :  { %2489 = vmatprep.mubr.bf16.mxu0 %v2058_v29 }
 0x1ed   :  { %2490 = vmatmul.mubr.bf16.vlgmr.msra.gmra.mrb[4].mxu0 %v2057_v24 }
 0x1ee   :  { %2501 = vmatpush1.bf16.msra.mxu0 %v3623_v8 }
 0x1ef   :  { %2502 = vmatprep.subr.bf16.mxu0 %v3628_v30 }
 0x1f2   :  { %2503 = vmatpush1.bf16.msra.mxu0 %v3626_v22  ;;  %v3684_v22 = vld [vmem:[#allocation8 + $0x30] sm:$0xff]  }
 0x1f3   :  { %2504 = vmatprep.subr.bf16.mxu0 %v3631_v25  ;;  %3129 = vmatpush3.bf16.msra.mxu1 %v3684_v22  ;;  %v3685_v25 = vld [vmem:[#allocation8 + $0x78] sm:$0xff]  }
 0x1f4   :  { %3130 = vmatprep.subr.bf16.mxu1 %v3685_v25 }
 0x1f6   :  { %2505 = vmatpush1.bf16.msra.mxu0 %v3629_v34  ;;  %v2130_v34 = vrot.slane %v2125_v33, %v351_v61 }
 0x1f7   :  { %2506 = vmatprep.subr.bf16.mxu0 %v3634_v9  ;;  %3131 = vmatpush3.bf16.msra.mxu1 %v3686_v32  ;;  %v2134_v9 = vrot.slane %v2125_v33, %v355_v63 }
 0x1fa   :  { %2507 = vmatpush1.bf16.msra.mxu0 %v3632_v38 }
 0x1fb   :  { %2508 = vmatprep.subr.bf16.mxu0 %v3637_v55 }
 0x1fe   :  { %2509 = vmatpush1.bf16.msra.mxu0 %v3635_v40 }
 0x1ff   :  { %2510 = vmatprep.subr.bf16.mxu0 %v3640_v41 }
 0x202   :  { %2511 = vmatpush1.bf16.msra.mxu0 %v3638_v43 }
 0x203   :  { %2512 = vmatprep.subr.bf16.mxu0 %v3643_v44 }
 0x206   :  { %2513 = vmatpush1.bf16.msra.mxu0 %v3641_v45 }
 0x207   :  { %2514 = vmatprep.subr.bf16.mxu0 %v3646_v46 }
 0x20a   :  { %2515 = vmatpush1.bf16.msra.mxu0 %v3644_v47 }
 0x20b   :  { %2516 = vmatprep.subr.bf16.mxu0 %v3649_v48 }
 0x20e   :  { %2517 = vmatpush1.bf16.msra.mxu0 %v3647_v49 }
 0x20f   :  { %2518 = vmatprep.subr.bf16.mxu0 %v3652_v50 }
 0x212   :  { %2519 = vmatpush1.bf16.msra.mxu0 %v3650_v51 }
 0x213   :  { %2520 = vmatprep.subr.bf16.mxu0 %v3655_v52 }
 0x216   :  { %2521 = vmatpush1.bf16.msra.mxu0 %v3653_v53  ;;  %v3090_v53 = vld [vmem:[%s4012_s6] ss:$0 sm:$0xff] }
 0x217   :  { %2522 = vmatprep.subr.bf16.mxu0 %v3658_v54 }
 0x21a   :  { %2523 = vmatpush1.bf16.msra.mxu0 %v3656_v56 }
 0x21b   :  { %2524 = vmatprep.subr.bf16.mxu0 %v3661_v57 }
 0x21e   :  { %2525 = vmatpush1.bf16.msra.mxu0 %v3659_v58 }
 0x21f   :  { %2526 = vmatprep.subr.bf16.mxu0 %v3664_v59 }
 0x222   :  { %2527 = vmatpush1.bf16.msra.mxu0 %v3662_v0 }
 0x223   :  { %2528 = vmatprep.subr.bf16.mxu0 %v3667_v26 }
 0x226   :  { %2529 = vmatpush1.bf16.msra.mxu0 %v3665_v1 }
 0x227   :  { %2530 = vmatprep.subr.bf16.mxu0 %v3670_v2 }
 0x22a   :  { %2531 = vmatpush1.bf16.msra.mxu0 %v3668_v3 }
 0x260   :  { %v2024_v10 = vpop.f32.mrb[4].mxu1 }
 0x261   :  { %v3146_v11 = vadd.f32 %v2024_v10, %v360_v6  ;;  %v2026_v12 = vpop.f32.mrb[5].mxu1 }
 0x262   :  { %v3147_v13 = vadd.f32 %v2026_v12, %v364_v7  ;;  %v2028_v14 = vpop.f32.mrb[6].mxu1 }
 0x263   :  { %v2043_v15 = vmul.f32 0.2, %v3146_v11  ;;  %v3148_v17 = vadd.f32 %v2028_v14, %v360_v6  ;;  %v2030_v18 = vpop.f32.mrb[7].mxu1  ;;  %vm2035_vm4 = vcmp.gt.f32.partialorder %v3146_v11, 0.0 }
 0x264   :  { %v2044_v19 = vmul.f32 0.2, %v3147_v13  ;;  %v3149_v20 = vadd.f32 %v2030_v18, %v364_v7  ;;  %vm2036_vm5 = vcmp.gt.f32.partialorder %v3147_v13, 0.0 }
 0x265   :  { %vm2039_vm6 = vcmp.gt.f32.partialorder %v3148_v17, 0.0  ;;  %v2047_v23 = vmul.f32 0.2, %v3148_v17  ;;  %v2051_v27 = vsel %vm2035_vm4, %v3146_v11, %v2043_v15 }
 0x266   :  { %vm2040_vm7 = vcmp.gt.f32.partialorder %v3149_v20, 0.0  ;;  %v2048_v24 = vmul.f32 0.2, %v3149_v20  ;;  %v2052_v62 = vsel %vm2036_vm5, %v3147_v13, %v2044_v19 }
 0x267   :  { %v2055_v28 = vsel %vm2039_vm6, %v3148_v17, %v2047_v23 }
 0x268   :  { %v2059_v29 = vpack.c.bf16 %v2055_v28, %v2051_v27  ;;  %v2056_v8 = vsel %vm2040_vm7, %v3149_v20, %v2048_v24 }
 0x269   :  { %v2060_v30 = vpack.c.bf16 %v2056_v8, %v2052_v62 }
 0x26b   :  { %2532 = vmatprep.mubr.bf16.mxu0 %v2060_v30 }
 0x26c   :  { %2533 = vmatmul.mubr.bf16.vlgmr.msra.gmra.mrb[4].mxu0 %v2059_v29 }
 0x33f   :  { %v2534_v35 = vpop.f32.mrb[4].mxu0 }
 0x340   :  { %v3150_v36 = vadd.f32 %v2534_v35, %v2130_v34  ;;  %v2536_v38 = vpop.f32.mrb[5].mxu0 }
 0x341   :  { %v3151_v55 = vadd.f32 %v2536_v38, %v2134_v9  ;;  %v2538_v37 = vpop.f32.mrb[6].mxu0 }
 0x342   :  { %v2547_v39 = vmul.f32 0.2, %v3150_v36  ;;  %v3152_v40 = vadd.f32 %v2538_v37, %v2130_v34  ;;  %v2540_v41 = vpop.f32.mrb[7].mxu0  ;;  %vm2543_vm8 = vcmp.gt.f32.partialorder %v3150_v36, 0.0 }
 0x343   :  { %v2548_v42 = vmul.f32 0.2, %v3151_v55  ;;  %v3153_v43 = vadd.f32 %v2540_v41, %v2134_v9  ;;  %vm2544_vm9 = vcmp.gt.f32.partialorder %v3151_v55, 0.0 }
 0x344   :  { %vm2545_vm10 = vcmp.gt.f32.partialorder %v3152_v40, 0.0  ;;  %v2549_v44 = vmul.f32 0.2, %v3152_v40  ;;  %v2551_v61 = vsel %vm2543_vm8, %v3150_v36, %v2547_v39 }
 0x345   :  { %vm2546_vm11 = vcmp.gt.f32.partialorder %v3153_v43, 0.0  ;;  %v2550_v45 = vmul.f32 0.2, %v3153_v43  ;;  %v2552_v63 = vsel %vm2544_vm9, %v3151_v55, %v2548_v42 }
 0x346   :  { %v2553_v46 = vsel %vm2545_vm10, %v3152_v40, %v2549_v44 }
 0x347   :  { %v2555_v60 = vpack.c.bf16 %v2553_v46, %v2551_v61  ;;  %v2554_v47 = vsel %vm2546_vm11, %v3153_v43, %v2550_v45 }
 0x348   :  { %v2556_v48 = vpack.c.bf16 %v2554_v47, %v2552_v63 }
 0x34a   :  { %2724 = vmatprep.mubr.bf16.mxu1 %v2556_v48 }
 0x34b   :  { %2725 = vmatmul.mubr.bf16.vlgmr.msra.gmra.mrb[8].mxu1 %v2555_v60 }
 0x41e   :  { %v3132_v49 = vpop.f32.mrb[8].mxu1 }
 0x41f   :  { %v3133_v50 = vpop.f32.mrb[9].mxu1 }
 0x420   :  { %v3134_v51 = vadd.f32 %v3133_v50, %v3132_v49  ;;  %v3135_v52 = vpop.f32.mrb[10].mxu1 }
 0x421   :  { %v3136_v54 = vpop.f32.mrb[11].mxu1 }
 0x422   :  { %v3137_v56 = vadd.f32 %v3136_v54, %v3135_v52  ;;  %v2727_v57 = vadd.f32 %v3134_v51, %v3090_v53 }
 0x424   :  { %v2730_v58 = vadd.f32 %v3137_v56, %v3090_v53 }
 0x426   :  { %v3114_v59 = vpack.c.bf16 %v2730_v58, %v2727_v57 }
 0x428   :  { %3115 = vst [vmem:[#allocation10] sm:$0xff] %v3114_v59  }
 0x429   :  { %3786 = shalt.err (!%p3783_p8)
}
 0x42a   :  { %s3787_s6 = scalar_lea.hbm %s4013_s7, 128 }
 0x42b   :  { %p3788_p9 = scmp.ne.s32.totalorder %s4013_s7, %s3787_s6  ;;  %p3791_p10 = scmp.lt.u32.totalorder %s3787_s6, %s4013_s7 }
 0x42d   :  { %p3793_p11 = pnand %p3791_p10, %p3788_p9 }
 0x42f   :  { %3796 = shalt.err (!%p3793_p11)
}
 0x430   :  { %2754 = dma.vmem_to_hbm [thread:$0]  %s2749_s11, 128, %s4013_s7, [#allocation4], %s3815_s3, %s3815_s3, %s3816_s27  }
 0x431   :  { %3803 = dma.done.wait [#allocation4], 128  }
 0x432   :  { %3804 = vsyncadd [#allocation4], 4294967168 }
 0x433   :  { %2758 = vsyncpa [#allocation3], 1 }
 0x434   :  { %2759 = vsyncpa [#allocation6], 1 }
 0x435   :  { %2760 = vsyncpa [#allocation9], 1 }
 0x436   :  { %2761 = vsyncpa [#allocation4], 1 }

</bundles_post_ra>
